<compile_context>
chip_gen: v7x
topology: tpu7x:2x2x1
jax: 0.10.0
libtpu: 0.0.40
codegen_flags: <defaults>
</compile_context>

<pallas_src>
import functools

import jax
import jax.numpy as jnp
from jax.experimental import pallas as pl
from jax.experimental.pallas import tpu as pltpu

CIN, COUT, K, STRIDE, PAD, DIL, GROUPS = 16, 32, 7, 1, 3, 2, 2
CIN_G = CIN // GROUPS          # 8   input channels per group
COUT_G = COUT // GROUPS        # 16  output channels per group
KCG = K * K * CIN_G            # 392 contraction size per group (order: kh, kw, ci)

LANE = 128
NSP_TILE = 512                 # lane tile of the flattened output space (multiple of 128)


def _round_up(x, m):
    return (x + m - 1) // m * m


def _conv_tanh_kernel(w_ref, b_ref, x_ref, o_ref, patch_ref, *, w_pad, nt):
    """Fused im2col + grouped dilated conv + bias + tanh for one (group, batch).

    w_ref:     (COUT_G, KCG)          bf16, rows ordered (kh, kw, ci)
    b_ref:     (COUT_G, 1)            f32
    x_ref:     (CIN_G, L_PAD)         bf16, zero-padded input, spatially flattened
    o_ref:     (COUT_G, nt*NSP_TILE)  f32, column j = ho * w_pad + wo
    patch_ref: (KCG, NSP_TILE)        f32 VMEM scratch (im2col tile)
    """
    w = w_ref[...].astype(jnp.float32)      # weights resident per group; cast once
    bias = b_ref[...]                       # (COUT_G, 1) f32

    for t in range(nt):                     # static unroll: all slice offsets static
        col0 = t * NSP_TILE
        # Build the im2col tile in VMEM: 8-row block per (kh, kw) window offset.
        for kh in range(K):
            for kw in range(K):
                idx = kh * K + kw
                off = col0 + kh * DIL * w_pad + kw * DIL
                patch_ref[idx * CIN_G:(idx + 1) * CIN_G, :] = (
                    x_ref[:, off:off + NSP_TILE].astype(jnp.float32))
        # Single MXU dot per tile + f32 epilogue, lane-dense 512-wide store.
        acc = jnp.dot(w, patch_ref[...], preferred_element_type=jnp.float32)
        acc = acc + bias
        o_ref[:, col0:col0 + NSP_TILE] = jnp.tanh(acc).astype(o_ref.dtype)


@jax.jit
def model_tanh_forward(x, weight, bias):
    """x: (N, 16, H, W) f32 NCHW; weight: (32, 8, 7, 7) OIHW; bias: (32,)."""
    n, cin, h, w = x.shape
    assert cin == CIN
    h_pad, w_pad = h + 2 * PAD, w + 2 * PAD
    h_out = h_pad - DIL * (K - 1)           # stride 1
    w_out = w_pad - DIL * (K - 1)
    nsp_cols = h_out * w_pad                # flattened (ho, wo) incl. junk wo >= w_out
    nt = (nsp_cols + NSP_TILE - 1) // NSP_TILE
    nsp_pad = nt * NSP_TILE                 # lane-dense output width (multiple of 128)
    max_off = DIL * (K - 1) * (w_pad + 1)   # largest static window offset used in-kernel
    l_pad = _round_up(nsp_pad + max_off, LANE)

    # --- cheap XLA prep only: pad + flatten + bf16 cast (x is tiny vs. the old 49x patches)
    x_p = jnp.pad(x.astype(jnp.bfloat16), ((0, 0), (0, 0), (PAD, PAD), (PAD, PAD)))
    x_flat = x_p.reshape(n, GROUPS, CIN_G, h_pad * w_pad)
    x_flat = jnp.pad(x_flat, ((0, 0), (0, 0), (0, 0), (0, l_pad - h_pad * w_pad)))

    # weight rows reordered to the kernel's (kh, kw, ci) patch-row order
    w_mat = (weight.reshape(GROUPS, COUT_G, CIN_G, K, K)
                   .transpose(0, 1, 3, 4, 2)
                   .reshape(GROUPS, COUT_G, KCG)
                   .astype(jnp.bfloat16))
    b_mat = bias.astype(jnp.float32).reshape(GROUPS, COUT_G, 1)

    kernel = functools.partial(_conv_tanh_kernel, w_pad=w_pad, nt=nt)

    # TODO(synk): for very large H*W, add a grid-level nsp-tile axis (overlapping x
    # windows via scalar-prefetched offsets) so the per-(b,g) output block and the
    # unrolled tile loop stay bounded; fine at these sizes.
    out = pl.pallas_call(
        kernel,
        out_shape=jax.ShapeDtypeStruct((n, GROUPS, COUT_G, nsp_pad), jnp.float32),
        grid=(GROUPS, n),                   # group outer (parallel), batch inner
        in_specs=[
            pl.BlockSpec((None, COUT_G, KCG), lambda g, b: (g, 0, 0)),
            pl.BlockSpec((None, COUT_G, 1), lambda g, b: (g, 0, 0)),
            pl.BlockSpec((None, None, CIN_G, l_pad), lambda g, b: (b, g, 0, 0)),
        ],
        out_specs=pl.BlockSpec((None, None, COUT_G, nsp_pad),
                               lambda g, b: (b, g, 0, 0)),
        scratch_shapes=[pltpu.VMEM((KCG, NSP_TILE), jnp.float32)],
        compiler_params=pltpu.CompilerParams(
            dimension_semantics=("parallel", "arbitrary")),
    )(w_mat, b_mat, x_flat)

    # strip lane padding + junk (wrap-around) columns, restore NCHW
    out = out[:, :, :, :nsp_cols].reshape(n, GROUPS, COUT_G, h_out, w_pad)
    out = out[:, :, :, :, :w_out].reshape(n, COUT, h_out, w_out)
    return out


if __name__ == "__main__":
    key = jax.random.PRNGKey(0)
    kx, kw_, kb = jax.random.split(key, 3)

    # Small shapes consistent with the module (input channels fixed at 16).
    N, H, W = 2, 32, 32
    x = jax.random.normal(kx, (N, CIN, H, W), dtype=jnp.float32)

    fan_in = CIN_G * K * K
    bound = 1.0 / (fan_in ** 0.5)
    weight = jax.random.uniform(kw_, (COUT, CIN_G, K, K), jnp.float32, -bound, bound)
    bias = jax.random.uniform(kb, (COUT,), jnp.float32, -bound, bound)

    out = jax.block_until_ready(model_tanh_forward(x, weight, bias))
    assert out.shape == (N, COUT, H - 6, W - 6), out.shape

    def ref_conv_tanh(xr, wr):
        y = jax.lax.conv_general_dilated(
            xr, wr, window_strides=(STRIDE, STRIDE),
            padding=((PAD, PAD), (PAD, PAD)), rhs_dilation=(DIL, DIL),
            feature_group_count=GROUPS,
            dimension_numbers=("NCHW", "OIHW", "NCHW"),
            preferred_element_type=jnp.float32)
        return jnp.tanh(y + bias[None, :, None, None])

    # Tight check: same bf16-quantized inputs, f32 accumulation (kernel math).
    xq = x.astype(jnp.bfloat16).astype(jnp.float32)
    wq = weight.astype(jnp.bfloat16).astype(jnp.float32)
    ref_q = ref_conv_tanh(xq, wq)
    assert jnp.allclose(out, ref_q, atol=2e-3, rtol=2e-3), \
        float(jnp.max(jnp.abs(out - ref_q)))

    # Semantics check vs full-f32 reference (slack covers bf16 input quantization).
    ref_f = ref_conv_tanh(x, weight)
    assert jnp.allclose(out, ref_f, atol=2e-2, rtol=2e-2), \
        float(jnp.max(jnp.abs(out - ref_f)))

    print("KERNEL_OK")
</pallas_src>

<mosaic_0001>
module attributes {stable_mosaic.version = 11 : i64} {
  func.func @_conv_tanh_kernel(%arg0: i32, %arg1: i32, %arg2: memref<1x16x392xbf16, #tpu.memory_space<vmem>>, %arg3: memref<1x16x1xf32, #tpu.memory_space<vmem>>, %arg4: memref<1x1x8x1536xbf16, #tpu.memory_space<vmem>>, %arg5: memref<1x1x16x1024xf32, #tpu.memory_space<vmem>>, %arg6: memref<392x512xf32, #tpu.memory_space<vmem>>) attributes {dimension_semantics = [#tpu.dimension_semantics<parallel>, #tpu.dimension_semantics<arbitrary>], iteration_bounds = array<i64: 2, 2>, scalar_prefetch = 0 : i64, scratch_operands = 1 : i64, tpu.core_type = #tpu.core_type<tc>, window_params = [{transform_indices = @transform_0, window_bounds = array<i64: 1, 16, 392>}, {transform_indices = @transform_1, window_bounds = array<i64: 1, 16, 1>}, {transform_indices = @transform_2, window_bounds = array<i64: 1, 1, 8, 1536>}, {transform_indices = @transform_3, window_bounds = array<i64: 1, 1, 16, 1024>}]} {
    %c0 = arith.constant 0 : index
    %c0_0 = arith.constant 0 : index
    %c0_1 = arith.constant 0 : index
    %0 = vector.load %arg2[%c0, %c0_0, %c0_1] : memref<1x16x392xbf16, #tpu.memory_space<vmem>>, vector<1x16x392xbf16>
    %1 = vector.shape_cast %0 : vector<1x16x392xbf16> to vector<16x392xbf16>
    %2 = arith.extf %1 : vector<16x392xbf16> to vector<16x392xf32>
    %c0_2 = arith.constant 0 : index
    %c0_3 = arith.constant 0 : index
    %c0_4 = arith.constant 0 : index
    %3 = vector.load %arg3[%c0_2, %c0_3, %c0_4] : memref<1x16x1xf32, #tpu.memory_space<vmem>>, vector<1x16x1xf32>
    %4 = vector.shape_cast %3 : vector<1x16x1xf32> to vector<16x1xf32>
    %c0_5 = arith.constant 0 : index
    %c0_6 = arith.constant 0 : index
    %c0_7 = arith.constant 0 : index
    %c0_8 = arith.constant 0 : index
    %5 = vector.load %arg4[%c0_5, %c0_6, %c0_7, %c0_8] : memref<1x1x8x1536xbf16, #tpu.memory_space<vmem>>, vector<1x1x8x512xbf16>
    %6 = vector.shape_cast %5 : vector<1x1x8x512xbf16> to vector<8x512xbf16>
    %7 = arith.extf %6 : vector<8x512xbf16> to vector<8x512xf32>
    %c0_9 = arith.constant 0 : index
    %c0_10 = arith.constant 0 : index
    %8 = vector.load %arg6[%c0_9, %c0_10] : memref<392x512xf32, #tpu.memory_space<vmem>>, vector<8x512xf32>
    tpu.vector_store %arg6[%c0_9, %c0_10], %7 {strides = array<i32>} : memref<392x512xf32, #tpu.memory_space<vmem>>, vector<8x512xf32>,
    %c0_11 = arith.constant 0 : index
    %c0_12 = arith.constant 0 : index
    %c0_13 = arith.constant 0 : index
    %c2 = arith.constant 2 : index
    %9 = vector.load %arg4[%c0_11, %c0_12, %c0_13, %c2] : memref<1x1x8x1536xbf16, #tpu.memory_space<vmem>>, vector<1x1x8x512xbf16>
    %10 = vector.shape_cast %9 : vector<1x1x8x512xbf16> to vector<8x512xbf16>
    %11 = arith.extf %10 : vector<8x512xbf16> to vector<8x512xf32>
    %c8 = arith.constant 8 : index
    %c0_14 = arith.constant 0 : index
    %12 = vector.load %arg6[%c8, %c0_14] : memref<392x512xf32, #tpu.memory_space<vmem>>, vector<8x512xf32>
    tpu.vector_store %arg6[%c8, %c0_14], %11 {strides = array<i32>} : memref<392x512xf32, #tpu.memory_space<vmem>>, vector<8x512xf32>,
    %c0_15 = arith.constant 0 : index
    %c0_16 = arith.constant 0 : index
    %c0_17 = arith.constant 0 : index
    %c4 = arith.constant 4 : index
    %13 = vector.load %arg4[%c0_15, %c0_16, %c0_17, %c4] : memref<1x1x8x1536xbf16, #tpu.memory_space<vmem>>, vector<1x1x8x512xbf16>
    %14 = vector.shape_cast %13 : vector<1x1x8x512xbf16> to vector<8x512xbf16>
    %15 = arith.extf %14 : vector<8x512xbf16> to vector<8x512xf32>
    %c16 = arith.constant 16 : index
    %c0_18 = arith.constant 0 : index
    %16 = vector.load %arg6[%c16, %c0_18] : memref<392x512xf32, #tpu.memory_space<vmem>>, vector<8x512xf32>
    tpu.vector_store %arg6[%c16, %c0_18], %15 {strides = array<i32>} : memref<392x512xf32, #tpu.memory_space<vmem>>, vector<8x512xf32>,
    %c0_19 = arith.constant 0 : index
    %c0_20 = arith.constant 0 : index
    %c0_21 = arith.constant 0 : index
    %c6 = arith.constant 6 : index
    %17 = vector.load %arg4[%c0_19, %c0_20, %c0_21, %c6] : memref<1x1x8x1536xbf16, #tpu.memory_space<vmem>>, vector<1x1x8x512xbf16>
    %18 = vector.shape_cast %17 : vector<1x1x8x512xbf16> to vector<8x512xbf16>
    %19 = arith.extf %18 : vector<8x512xbf16> to vector<8x512xf32>
    %c24 = arith.constant 24 : index
    %c0_22 = arith.constant 0 : index
    %20 = vector.load %arg6[%c24, %c0_22] : memref<392x512xf32, #tpu.memory_space<vmem>>, vector<8x512xf32>
    tpu.vector_store %arg6[%c24, %c0_22], %19 {strides = array<i32>} : memref<392x512xf32, #tpu.memory_space<vmem>>, vector<8x512xf32>,
    %c0_23 = arith.constant 0 : index
    %c0_24 = arith.constant 0 : index
    %c0_25 = arith.constant 0 : index
    %c8_26 = arith.constant 8 : index
    %21 = vector.load %arg4[%c0_23, %c0_24, %c0_25, %c8_26] : memref<1x1x8x1536xbf16, #tpu.memory_space<vmem>>, vector<1x1x8x512xbf16>
    %22 = vector.shape_cast %21 : vector<1x1x8x512xbf16> to vector<8x512xbf16>
    %23 = arith.extf %22 : vector<8x512xbf16> to vector<8x512xf32>
    %c32 = arith.constant 32 : index
    %c0_27 = arith.constant 0 : index
    %24 = vector.load %arg6[%c32, %c0_27] : memref<392x512xf32, #tpu.memory_space<vmem>>, vector<8x512xf32>
    tpu.vector_store %arg6[%c32, %c0_27], %23 {strides = array<i32>} : memref<392x512xf32, #tpu.memory_space<vmem>>, vector<8x512xf32>,
    %c0_28 = arith.constant 0 : index
    %c0_29 = arith.constant 0 : index
    %c0_30 = arith.constant 0 : index
    %c10 = arith.constant 10 : index
    %25 = vector.load %arg4[%c0_28, %c0_29, %c0_30, %c10] : memref<1x1x8x1536xbf16, #tpu.memory_space<vmem>>, vector<1x1x8x512xbf16>
    %26 = vector.shape_cast %25 : vector<1x1x8x512xbf16> to vector<8x512xbf16>
    %27 = arith.extf %26 : vector<8x512xbf16> to vector<8x512xf32>
    %c40 = arith.constant 40 : index
    %c0_31 = arith.constant 0 : index
    %28 = vector.load %arg6[%c40, %c0_31] : memref<392x512xf32, #tpu.memory_space<vmem>>, vector<8x512xf32>
    tpu.vector_store %arg6[%c40, %c0_31], %27 {strides = array<i32>} : memref<392x512xf32, #tpu.memory_space<vmem>>, vector<8x512xf32>,
    %c0_32 = arith.constant 0 : index
    %c0_33 = arith.constant 0 : index
    %c0_34 = arith.constant 0 : index
    %c12 = arith.constant 12 : index
    %29 = vector.load %arg4[%c0_32, %c0_33, %c0_34, %c12] : memref<1x1x8x1536xbf16, #tpu.memory_space<vmem>>, vector<1x1x8x512xbf16>
    %30 = vector.shape_cast %29 : vector<1x1x8x512xbf16> to vector<8x512xbf16>
    %31 = arith.extf %30 : vector<8x512xbf16> to vector<8x512xf32>
    %c48 = arith.constant 48 : index
    %c0_35 = arith.constant 0 : index
    %32 = vector.load %arg6[%c48, %c0_35] : memref<392x512xf32, #tpu.memory_space<vmem>>, vector<8x512xf32>
    tpu.vector_store %arg6[%c48, %c0_35], %31 {strides = array<i32>} : memref<392x512xf32, #tpu.memory_space<vmem>>, vector<8x512xf32>,
    %c0_36 = arith.constant 0 : index
    %c0_37 = arith.constant 0 : index
    %c0_38 = arith.constant 0 : index
    %c76 = arith.constant 76 : index
    %33 = vector.load %arg4[%c0_36, %c0_37, %c0_38, %c76] : memref<1x1x8x1536xbf16, #tpu.memory_space<vmem>>, vector<1x1x8x512xbf16>
    %34 = vector.shape_cast %33 : vector<1x1x8x512xbf16> to vector<8x512xbf16>
    %35 = arith.extf %34 : vector<8x512xbf16> to vector<8x512xf32>
    %c56 = arith.constant 56 : index
    %c0_39 = arith.constant 0 : index
    %36 = vector.load %arg6[%c56, %c0_39] : memref<392x512xf32, #tpu.memory_space<vmem>>, vector<8x512xf32>
    tpu.vector_store %arg6[%c56, %c0_39], %35 {strides = array<i32>} : memref<392x512xf32, #tpu.memory_space<vmem>>, vector<8x512xf32>,
    %c0_40 = arith.constant 0 : index
    %c0_41 = arith.constant 0 : index
    %c0_42 = arith.constant 0 : index
    %c78 = arith.constant 78 : index
    %37 = vector.load %arg4[%c0_40, %c0_41, %c0_42, %c78] : memref<1x1x8x1536xbf16, #tpu.memory_space<vmem>>, vector<1x1x8x512xbf16>
    %38 = vector.shape_cast %37 : vector<1x1x8x512xbf16> to vector<8x512xbf16>
    %39 = arith.extf %38 : vector<8x512xbf16> to vector<8x512xf32>
    %c64 = arith.constant 64 : index
    %c0_43 = arith.constant 0 : index
    %40 = vector.load %arg6[%c64, %c0_43] : memref<392x512xf32, #tpu.memory_space<vmem>>, vector<8x512xf32>
    tpu.vector_store %arg6[%c64, %c0_43], %39 {strides = array<i32>} : memref<392x512xf32, #tpu.memory_space<vmem>>, vector<8x512xf32>,
    %c0_44 = arith.constant 0 : index
    %c0_45 = arith.constant 0 : index
    %c0_46 = arith.constant 0 : index
    %c80 = arith.constant 80 : index
    %41 = vector.load %arg4[%c0_44, %c0_45, %c0_46, %c80] : memref<1x1x8x1536xbf16, #tpu.memory_space<vmem>>, vector<1x1x8x512xbf16>
    %42 = vector.shape_cast %41 : vector<1x1x8x512xbf16> to vector<8x512xbf16>
    %43 = arith.extf %42 : vector<8x512xbf16> to vector<8x512xf32>
    %c72 = arith.constant 72 : index
    %c0_47 = arith.constant 0 : index
    %44 = vector.load %arg6[%c72, %c0_47] : memref<392x512xf32, #tpu.memory_space<vmem>>, vector<8x512xf32>
    tpu.vector_store %arg6[%c72, %c0_47], %43 {strides = array<i32>} : memref<392x512xf32, #tpu.memory_space<vmem>>, vector<8x512xf32>,
    %c0_48 = arith.constant 0 : index
    %c0_49 = arith.constant 0 : index
    %c0_50 = arith.constant 0 : index
    %c82 = arith.constant 82 : index
    %45 = vector.load %arg4[%c0_48, %c0_49, %c0_50, %c82] : memref<1x1x8x1536xbf16, #tpu.memory_space<vmem>>, vector<1x1x8x512xbf16>
    %46 = vector.shape_cast %45 : vector<1x1x8x512xbf16> to vector<8x512xbf16>
    %47 = arith.extf %46 : vector<8x512xbf16> to vector<8x512xf32>
    %c80_51 = arith.constant 80 : index
    %c0_52 = arith.constant 0 : index
    %48 = vector.load %arg6[%c80_51, %c0_52] : memref<392x512xf32, #tpu.memory_space<vmem>>, vector<8x512xf32>
    tpu.vector_store %arg6[%c80_51, %c0_52], %47 {strides = array<i32>} : memref<392x512xf32, #tpu.memory_space<vmem>>, vector<8x512xf32>,
    %c0_53 = arith.constant 0 : index
    %c0_54 = arith.constant 0 : index
    %c0_55 = arith.constant 0 : index
    %c84 = arith.constant 84 : index
    %49 = vector.load %arg4[%c0_53, %c0_54, %c0_55, %c84] : memref<1x1x8x1536xbf16, #tpu.memory_space<vmem>>, vector<1x1x8x512xbf16>
    %50 = vector.shape_cast %49 : vector<1x1x8x512xbf16> to vector<8x512xbf16>
    %51 = arith.extf %50 : vector<8x512xbf16> to vector<8x512xf32>
    %c88 = arith.constant 88 : index
    %c0_56 = arith.constant 0 : index
    %52 = vector.load %arg6[%c88, %c0_56] : memref<392x512xf32, #tpu.memory_space<vmem>>, vector<8x512xf32>
    tpu.vector_store %arg6[%c88, %c0_56], %51 {strides = array<i32>} : memref<392x512xf32, #tpu.memory_space<vmem>>, vector<8x512xf32>,
    %c0_57 = arith.constant 0 : index
    %c0_58 = arith.constant 0 : index
    %c0_59 = arith.constant 0 : index
    %c86 = arith.constant 86 : index
    %53 = vector.load %arg4[%c0_57, %c0_58, %c0_59, %c86] : memref<1x1x8x1536xbf16, #tpu.memory_space<vmem>>, vector<1x1x8x512xbf16>
    %54 = vector.shape_cast %53 : vector<1x1x8x512xbf16> to vector<8x512xbf16>
    %55 = arith.extf %54 : vector<8x512xbf16> to vector<8x512xf32>
    %c96 = arith.constant 96 : index
    %c0_60 = arith.constant 0 : index
    %56 = vector.load %arg6[%c96, %c0_60] : memref<392x512xf32, #tpu.memory_space<vmem>>, vector<8x512xf32>
    tpu.vector_store %arg6[%c96, %c0_60], %55 {strides = array<i32>} : memref<392x512xf32, #tpu.memory_space<vmem>>, vector<8x512xf32>,
    %c0_61 = arith.constant 0 : index
    %c0_62 = arith.constant 0 : index
    %c0_63 = arith.constant 0 : index
    %c88_64 = arith.constant 88 : index
    %57 = vector.load %arg4[%c0_61, %c0_62, %c0_63, %c88_64] : memref<1x1x8x1536xbf16, #tpu.memory_space<vmem>>, vector<1x1x8x512xbf16>
    %58 = vector.shape_cast %57 : vector<1x1x8x512xbf16> to vector<8x512xbf16>
    %59 = arith.extf %58 : vector<8x512xbf16> to vector<8x512xf32>
    %c104 = arith.constant 104 : index
    %c0_65 = arith.constant 0 : index
    %60 = vector.load %arg6[%c104, %c0_65] : memref<392x512xf32, #tpu.memory_space<vmem>>, vector<8x512xf32>
    tpu.vector_store %arg6[%c104, %c0_65], %59 {strides = array<i32>} : memref<392x512xf32, #tpu.memory_space<vmem>>, vector<8x512xf32>,
    %c0_66 = arith.constant 0 : index
    %c0_67 = arith.constant 0 : index
    %c0_68 = arith.constant 0 : index
    %c152 = arith.constant 152 : index
    %61 = vector.load %arg4[%c0_66, %c0_67, %c0_68, %c152] : memref<1x1x8x1536xbf16, #tpu.memory_space<vmem>>, vector<1x1x8x512xbf16>
    %62 = vector.shape_cast %61 : vector<1x1x8x512xbf16> to vector<8x512xbf16>
    %63 = arith.extf %62 : vector<8x512xbf16> to vector<8x512xf32>
    %c112 = arith.constant 112 : index
    %c0_69 = arith.constant 0 : index
    %64 = vector.load %arg6[%c112, %c0_69] : memref<392x512xf32, #tpu.memory_space<vmem>>, vector<8x512xf32>
    tpu.vector_store %arg6[%c112, %c0_69], %63 {strides = array<i32>} : memref<392x512xf32, #tpu.memory_space<vmem>>, vector<8x512xf32>,
    %c0_70 = arith.constant 0 : index
    %c0_71 = arith.constant 0 : index
    %c0_72 = arith.constant 0 : index
    %c154 = arith.constant 154 : index
    %65 = vector.load %arg4[%c0_70, %c0_71, %c0_72, %c154] : memref<1x1x8x1536xbf16, #tpu.memory_space<vmem>>, vector<1x1x8x512xbf16>
    %66 = vector.shape_cast %65 : vector<1x1x8x512xbf16> to vector<8x512xbf16>
    %67 = arith.extf %66 : vector<8x512xbf16> to vector<8x512xf32>
    %c120 = arith.constant 120 : index
    %c0_73 = arith.constant 0 : index
    %68 = vector.load %arg6[%c120, %c0_73] : memref<392x512xf32, #tpu.memory_space<vmem>>, vector<8x512xf32>
    tpu.vector_store %arg6[%c120, %c0_73], %67 {strides = array<i32>} : memref<392x512xf32, #tpu.memory_space<vmem>>, vector<8x512xf32>,
    %c0_74 = arith.constant 0 : index
    %c0_75 = arith.constant 0 : index
    %c0_76 = arith.constant 0 : index
    %c156 = arith.constant 156 : index
    %69 = vector.load %arg4[%c0_74, %c0_75, %c0_76, %c156] : memref<1x1x8x1536xbf16, #tpu.memory_space<vmem>>, vector<1x1x8x512xbf16>
    %70 = vector.shape_cast %69 : vector<1x1x8x512xbf16> to vector<8x512xbf16>
    %71 = arith.extf %70 : vector<8x512xbf16> to vector<8x512xf32>
    %c128 = arith.constant 128 : index
    %c0_77 = arith.constant 0 : index
    %72 = vector.load %arg6[%c128, %c0_77] : memref<392x512xf32, #tpu.memory_space<vmem>>, vector<8x512xf32>
    tpu.vector_store %arg6[%c128, %c0_77], %71 {strides = array<i32>} : memref<392x512xf32, #tpu.memory_space<vmem>>, vector<8x512xf32>,
    %c0_78 = arith.constant 0 : index
    %c0_79 = arith.constant 0 : index
    %c0_80 = arith.constant 0 : index
    %c158 = arith.constant 158 : index
    %73 = vector.load %arg4[%c0_78, %c0_79, %c0_80, %c158] : memref<1x1x8x1536xbf16, #tpu.memory_space<vmem>>, vector<1x1x8x512xbf16>
    %74 = vector.shape_cast %73 : vector<1x1x8x512xbf16> to vector<8x512xbf16>
    %75 = arith.extf %74 : vector<8x512xbf16> to vector<8x512xf32>
    %c136 = arith.constant 136 : index
    %c0_81 = arith.constant 0 : index
    %76 = vector.load %arg6[%c136, %c0_81] : memref<392x512xf32, #tpu.memory_space<vmem>>, vector<8x512xf32>
    tpu.vector_store %arg6[%c136, %c0_81], %75 {strides = array<i32>} : memref<392x512xf32, #tpu.memory_space<vmem>>, vector<8x512xf32>,
    %c0_82 = arith.constant 0 : index
    %c0_83 = arith.constant 0 : index
    %c0_84 = arith.constant 0 : index
    %c160 = arith.constant 160 : index
    %77 = vector.load %arg4[%c0_82, %c0_83, %c0_84, %c160] : memref<1x1x8x1536xbf16, #tpu.memory_space<vmem>>, vector<1x1x8x512xbf16>
    %78 = vector.shape_cast %77 : vector<1x1x8x512xbf16> to vector<8x512xbf16>
    %79 = arith.extf %78 : vector<8x512xbf16> to vector<8x512xf32>
    %c144 = arith.constant 144 : index
    %c0_85 = arith.constant 0 : index
    %80 = vector.load %arg6[%c144, %c0_85] : memref<392x512xf32, #tpu.memory_space<vmem>>, vector<8x512xf32>
    tpu.vector_store %arg6[%c144, %c0_85], %79 {strides = array<i32>} : memref<392x512xf32, #tpu.memory_space<vmem>>, vector<8x512xf32>,
    %c0_86 = arith.constant 0 : index
    %c0_87 = arith.constant 0 : index
    %c0_88 = arith.constant 0 : index
    %c162 = arith.constant 162 : index
    %81 = vector.load %arg4[%c0_86, %c0_87, %c0_88, %c162] : memref<1x1x8x1536xbf16, #tpu.memory_space<vmem>>, vector<1x1x8x512xbf16>
    %82 = vector.shape_cast %81 : vector<1x1x8x512xbf16> to vector<8x512xbf16>
    %83 = arith.extf %82 : vector<8x512xbf16> to vector<8x512xf32>
    %c152_89 = arith.constant 152 : index
    %c0_90 = arith.constant 0 : index
    %84 = vector.load %arg6[%c152_89, %c0_90] : memref<392x512xf32, #tpu.memory_space<vmem>>, vector<8x512xf32>
    tpu.vector_store %arg6[%c152_89, %c0_90], %83 {strides = array<i32>} : memref<392x512xf32, #tpu.memory_space<vmem>>, vector<8x512xf32>,
    %c0_91 = arith.constant 0 : index
    %c0_92 = arith.constant 0 : index
    %c0_93 = arith.constant 0 : index
    %c164 = arith.constant 164 : index
    %85 = vector.load %arg4[%c0_91, %c0_92, %c0_93, %c164] : memref<1x1x8x1536xbf16, #tpu.memory_space<vmem>>, vector<1x1x8x512xbf16>
    %86 = vector.shape_cast %85 : vector<1x1x8x512xbf16> to vector<8x512xbf16>
    %87 = arith.extf %86 : vector<8x512xbf16> to vector<8x512xf32>
    %c160_94 = arith.constant 160 : index
    %c0_95 = arith.constant 0 : index
    %88 = vector.load %arg6[%c160_94, %c0_95] : memref<392x512xf32, #tpu.memory_space<vmem>>, vector<8x512xf32>
    tpu.vector_store %arg6[%c160_94, %c0_95], %87 {strides = array<i32>} : memref<392x512xf32, #tpu.memory_space<vmem>>, vector<8x512xf32>,
    %c0_96 = arith.constant 0 : index
    %c0_97 = arith.constant 0 : index
    %c0_98 = arith.constant 0 : index
    %c228 = arith.constant 228 : index
    %89 = vector.load %arg4[%c0_96, %c0_97, %c0_98, %c228] : memref<1x1x8x1536xbf16, #tpu.memory_space<vmem>>, vector<1x1x8x512xbf16>
    %90 = vector.shape_cast %89 : vector<1x1x8x512xbf16> to vector<8x512xbf16>
    %91 = arith.extf %90 : vector<8x512xbf16> to vector<8x512xf32>
    %c168 = arith.constant 168 : index
    %c0_99 = arith.constant 0 : index
    %92 = vector.load %arg6[%c168, %c0_99] : memref<392x512xf32, #tpu.memory_space<vmem>>, vector<8x512xf32>
    tpu.vector_store %arg6[%c168, %c0_99], %91 {strides = array<i32>} : memref<392x512xf32, #tpu.memory_space<vmem>>, vector<8x512xf32>,
    %c0_100 = arith.constant 0 : index
    %c0_101 = arith.constant 0 : index
    %c0_102 = arith.constant 0 : index
    %c230 = arith.constant 230 : index
    %93 = vector.load %arg4[%c0_100, %c0_101, %c0_102, %c230] : memref<1x1x8x1536xbf16, #tpu.memory_space<vmem>>, vector<1x1x8x512xbf16>
    %94 = vector.shape_cast %93 : vector<1x1x8x512xbf16> to vector<8x512xbf16>
    %95 = arith.extf %94 : vector<8x512xbf16> to vector<8x512xf32>
    %c176 = arith.constant 176 : index
    %c0_103 = arith.constant 0 : index
    %96 = vector.load %arg6[%c176, %c0_103] : memref<392x512xf32, #tpu.memory_space<vmem>>, vector<8x512xf32>
    tpu.vector_store %arg6[%c176, %c0_103], %95 {strides = array<i32>} : memref<392x512xf32, #tpu.memory_space<vmem>>, vector<8x512xf32>,
    %c0_104 = arith.constant 0 : index
    %c0_105 = arith.constant 0 : index
    %c0_106 = arith.constant 0 : index
    %c232 = arith.constant 232 : index
    %97 = vector.load %arg4[%c0_104, %c0_105, %c0_106, %c232] : memref<1x1x8x1536xbf16, #tpu.memory_space<vmem>>, vector<1x1x8x512xbf16>
    %98 = vector.shape_cast %97 : vector<1x1x8x512xbf16> to vector<8x512xbf16>
    %99 = arith.extf %98 : vector<8x512xbf16> to vector<8x512xf32>
    %c184 = arith.constant 184 : index
    %c0_107 = arith.constant 0 : index
    %100 = vector.load %arg6[%c184, %c0_107] : memref<392x512xf32, #tpu.memory_space<vmem>>, vector<8x512xf32>
    tpu.vector_store %arg6[%c184, %c0_107], %99 {strides = array<i32>} : memref<392x512xf32, #tpu.memory_space<vmem>>, vector<8x512xf32>,
    %c0_108 = arith.constant 0 : index
    %c0_109 = arith.constant 0 : index
    %c0_110 = arith.constant 0 : index
    %c234 = arith.constant 234 : index
    %101 = vector.load %arg4[%c0_108, %c0_109, %c0_110, %c234] : memref<1x1x8x1536xbf16, #tpu.memory_space<vmem>>, vector<1x1x8x512xbf16>
    %102 = vector.shape_cast %101 : vector<1x1x8x512xbf16> to vector<8x512xbf16>
    %103 = arith.extf %102 : vector<8x512xbf16> to vector<8x512xf32>
    %c192 = arith.constant 192 : index
    %c0_111 = arith.constant 0 : index
    %104 = vector.load %arg6[%c192, %c0_111] : memref<392x512xf32, #tpu.memory_space<vmem>>, vector<8x512xf32>
    tpu.vector_store %arg6[%c192, %c0_111], %103 {strides = array<i32>} : memref<392x512xf32, #tpu.memory_space<vmem>>, vector<8x512xf32>,
    %c0_112 = arith.constant 0 : index
    %c0_113 = arith.constant 0 : index
    %c0_114 = arith.constant 0 : index
    %c236 = arith.constant 236 : index
    %105 = vector.load %arg4[%c0_112, %c0_113, %c0_114, %c236] : memref<1x1x8x1536xbf16, #tpu.memory_space<vmem>>, vector<1x1x8x512xbf16>
    %106 = vector.shape_cast %105 : vector<1x1x8x512xbf16> to vector<8x512xbf16>
    %107 = arith.extf %106 : vector<8x512xbf16> to vector<8x512xf32>
    %c200 = arith.constant 200 : index
    %c0_115 = arith.constant 0 : index
    %108 = vector.load %arg6[%c200, %c0_115] : memref<392x512xf32, #tpu.memory_space<vmem>>, vector<8x512xf32>
    tpu.vector_store %arg6[%c200, %c0_115], %107 {strides = array<i32>} : memref<392x512xf32, #tpu.memory_space<vmem>>, vector<8x512xf32>,
    %c0_116 = arith.constant 0 : index
    %c0_117 = arith.constant 0 : index
    %c0_118 = arith.constant 0 : index
    %c238 = arith.constant 238 : index
    %109 = vector.load %arg4[%c0_116, %c0_117, %c0_118, %c238] : memref<1x1x8x1536xbf16, #tpu.memory_space<vmem>>, vector<1x1x8x512xbf16>
    %110 = vector.shape_cast %109 : vector<1x1x8x512xbf16> to vector<8x512xbf16>
    %111 = arith.extf %110 : vector<8x512xbf16> to vector<8x512xf32>
    %c208 = arith.constant 208 : index
    %c0_119 = arith.constant 0 : index
    %112 = vector.load %arg6[%c208, %c0_119] : memref<392x512xf32, #tpu.memory_space<vmem>>, vector<8x512xf32>
    tpu.vector_store %arg6[%c208, %c0_119], %111 {strides = array<i32>} : memref<392x512xf32, #tpu.memory_space<vmem>>, vector<8x512xf32>,
    %c0_120 = arith.constant 0 : index
    %c0_121 = arith.constant 0 : index
    %c0_122 = arith.constant 0 : index
    %c240 = arith.constant 240 : index
    %113 = vector.load %arg4[%c0_120, %c0_121, %c0_122, %c240] : memref<1x1x8x1536xbf16, #tpu.memory_space<vmem>>, vector<1x1x8x512xbf16>
    %114 = vector.shape_cast %113 : vector<1x1x8x512xbf16> to vector<8x512xbf16>
    %115 = arith.extf %114 : vector<8x512xbf16> to vector<8x512xf32>
    %c216 = arith.constant 216 : index
    %c0_123 = arith.constant 0 : index
    %116 = vector.load %arg6[%c216, %c0_123] : memref<392x512xf32, #tpu.memory_space<vmem>>, vector<8x512xf32>
    tpu.vector_store %arg6[%c216, %c0_123], %115 {strides = array<i32>} : memref<392x512xf32, #tpu.memory_space<vmem>>, vector<8x512xf32>,
    %c0_124 = arith.constant 0 : index
    %c0_125 = arith.constant 0 : index
    %c0_126 = arith.constant 0 : index
    %c304 = arith.constant 304 : index
    %117 = vector.load %arg4[%c0_124, %c0_125, %c0_126, %c304] : memref<1x1x8x1536xbf16, #tpu.memory_space<vmem>>, vector<1x1x8x512xbf16>
    %118 = vector.shape_cast %117 : vector<1x1x8x512xbf16> to vector<8x512xbf16>
    %119 = arith.extf %118 : vector<8x512xbf16> to vector<8x512xf32>
    %c224 = arith.constant 224 : index
    %c0_127 = arith.constant 0 : index
    %120 = vector.load %arg6[%c224, %c0_127] : memref<392x512xf32, #tpu.memory_space<vmem>>, vector<8x512xf32>
    tpu.vector_store %arg6[%c224, %c0_127], %119 {strides = array<i32>} : memref<392x512xf32, #tpu.memory_space<vmem>>, vector<8x512xf32>,
    %c0_128 = arith.constant 0 : index
    %c0_129 = arith.constant 0 : index
    %c0_130 = arith.constant 0 : index
    %c306 = arith.constant 306 : index
    %121 = vector.load %arg4[%c0_128, %c0_129, %c0_130, %c306] : memref<1x1x8x1536xbf16, #tpu.memory_space<vmem>>, vector<1x1x8x512xbf16>
    %122 = vector.shape_cast %121 : vector<1x1x8x512xbf16> to vector<8x512xbf16>
    %123 = arith.extf %122 : vector<8x512xbf16> to vector<8x512xf32>
    %c232_131 = arith.constant 232 : index
    %c0_132 = arith.constant 0 : index
    %124 = vector.load %arg6[%c232_131, %c0_132] : memref<392x512xf32, #tpu.memory_space<vmem>>, vector<8x512xf32>
    tpu.vector_store %arg6[%c232_131, %c0_132], %123 {strides = array<i32>} : memref<392x512xf32, #tpu.memory_space<vmem>>, vector<8x512xf32>,
    %c0_133 = arith.constant 0 : index
    %c0_134 = arith.constant 0 : index
    %c0_135 = arith.constant 0 : index
    %c308 = arith.constant 308 : index
    %125 = vector.load %arg4[%c0_133, %c0_134, %c0_135, %c308] : memref<1x1x8x1536xbf16, #tpu.memory_space<vmem>>, vector<1x1x8x512xbf16>
    %126 = vector.shape_cast %125 : vector<1x1x8x512xbf16> to vector<8x512xbf16>
    %127 = arith.extf %126 : vector<8x512xbf16> to vector<8x512xf32>
    %c240_136 = arith.constant 240 : index
    %c0_137 = arith.constant 0 : index
    %128 = vector.load %arg6[%c240_136, %c0_137] : memref<392x512xf32, #tpu.memory_space<vmem>>, vector<8x512xf32>
    tpu.vector_store %arg6[%c240_136, %c0_137], %127 {strides = array<i32>} : memref<392x512xf32, #tpu.memory_space<vmem>>, vector<8x512xf32>,
    %c0_138 = arith.constant 0 : index
    %c0_139 = arith.constant 0 : index
    %c0_140 = arith.constant 0 : index
    %c310 = arith.constant 310 : index
    %129 = vector.load %arg4[%c0_138, %c0_139, %c0_140, %c310] : memref<1x1x8x1536xbf16, #tpu.memory_space<vmem>>, vector<1x1x8x512xbf16>
    %130 = vector.shape_cast %129 : vector<1x1x8x512xbf16> to vector<8x512xbf16>
    %131 = arith.extf %130 : vector<8x512xbf16> to vector<8x512xf32>
    %c248 = arith.constant 248 : index
    %c0_141 = arith.constant 0 : index
    %132 = vector.load %arg6[%c248, %c0_141] : memref<392x512xf32, #tpu.memory_space<vmem>>, vector<8x512xf32>
    tpu.vector_store %arg6[%c248, %c0_141], %131 {strides = array<i32>} : memref<392x512xf32, #tpu.memory_space<vmem>>, vector<8x512xf32>,
    %c0_142 = arith.constant 0 : index
    %c0_143 = arith.constant 0 : index
    %c0_144 = arith.constant 0 : index
    %c312 = arith.constant 312 : index
    %133 = vector.load %arg4[%c0_142, %c0_143, %c0_144, %c312] : memref<1x1x8x1536xbf16, #tpu.memory_space<vmem>>, vector<1x1x8x512xbf16>
    %134 = vector.shape_cast %133 : vector<1x1x8x512xbf16> to vector<8x512xbf16>
    %135 = arith.extf %134 : vector<8x512xbf16> to vector<8x512xf32>
    %c256 = arith.constant 256 : index
    %c0_145 = arith.constant 0 : index
    %136 = vector.load %arg6[%c256, %c0_145] : memref<392x512xf32, #tpu.memory_space<vmem>>, vector<8x512xf32>
    tpu.vector_store %arg6[%c256, %c0_145], %135 {strides = array<i32>} : memref<392x512xf32, #tpu.memory_space<vmem>>, vector<8x512xf32>,
    %c0_146 = arith.constant 0 : index
    %c0_147 = arith.constant 0 : index
    %c0_148 = arith.constant 0 : index
    %c314 = arith.constant 314 : index
    %137 = vector.load %arg4[%c0_146, %c0_147, %c0_148, %c314] : memref<1x1x8x1536xbf16, #tpu.memory_space<vmem>>, vector<1x1x8x512xbf16>
    %138 = vector.shape_cast %137 : vector<1x1x8x512xbf16> to vector<8x512xbf16>
    %139 = arith.extf %138 : vector<8x512xbf16> to vector<8x512xf32>
    %c264 = arith.constant 264 : index
    %c0_149 = arith.constant 0 : index
    %140 = vector.load %arg6[%c264, %c0_149] : memref<392x512xf32, #tpu.memory_space<vmem>>, vector<8x512xf32>
    tpu.vector_store %arg6[%c264, %c0_149], %139 {strides = array<i32>} : memref<392x512xf32, #tpu.memory_space<vmem>>, vector<8x512xf32>,
    %c0_150 = arith.constant 0 : index
    %c0_151 = arith.constant 0 : index
    %c0_152 = arith.constant 0 : index
    %c316 = arith.constant 316 : index
    %141 = vector.load %arg4[%c0_150, %c0_151, %c0_152, %c316] : memref<1x1x8x1536xbf16, #tpu.memory_space<vmem>>, vector<1x1x8x512xbf16>
    %142 = vector.shape_cast %141 : vector<1x1x8x512xbf16> to vector<8x512xbf16>
    %143 = arith.extf %142 : vector<8x512xbf16> to vector<8x512xf32>
    %c272 = arith.constant 272 : index
    %c0_153 = arith.constant 0 : index
    %144 = vector.load %arg6[%c272, %c0_153] : memref<392x512xf32, #tpu.memory_space<vmem>>, vector<8x512xf32>
    tpu.vector_store %arg6[%c272, %c0_153], %143 {strides = array<i32>} : memref<392x512xf32, #tpu.memory_space<vmem>>, vector<8x512xf32>,
    %c0_154 = arith.constant 0 : index
    %c0_155 = arith.constant 0 : index
    %c0_156 = arith.constant 0 : index
    %c380 = arith.constant 380 : index
    %145 = vector.load %arg4[%c0_154, %c0_155, %c0_156, %c380] : memref<1x1x8x1536xbf16, #tpu.memory_space<vmem>>, vector<1x1x8x512xbf16>
    %146 = vector.shape_cast %145 : vector<1x1x8x512xbf16> to vector<8x512xbf16>
    %147 = arith.extf %146 : vector<8x512xbf16> to vector<8x512xf32>
    %c280 = arith.constant 280 : index
    %c0_157 = arith.constant 0 : index
    %148 = vector.load %arg6[%c280, %c0_157] : memref<392x512xf32, #tpu.memory_space<vmem>>, vector<8x512xf32>
    tpu.vector_store %arg6[%c280, %c0_157], %147 {strides = array<i32>} : memref<392x512xf32, #tpu.memory_space<vmem>>, vector<8x512xf32>,
    %c0_158 = arith.constant 0 : index
    %c0_159 = arith.constant 0 : index
    %c0_160 = arith.constant 0 : index
    %c382 = arith.constant 382 : index
    %149 = vector.load %arg4[%c0_158, %c0_159, %c0_160, %c382] : memref<1x1x8x1536xbf16, #tpu.memory_space<vmem>>, vector<1x1x8x512xbf16>
    %150 = vector.shape_cast %149 : vector<1x1x8x512xbf16> to vector<8x512xbf16>
    %151 = arith.extf %150 : vector<8x512xbf16> to vector<8x512xf32>
    %c288 = arith.constant 288 : index
    %c0_161 = arith.constant 0 : index
    %152 = vector.load %arg6[%c288, %c0_161] : memref<392x512xf32, #tpu.memory_space<vmem>>, vector<8x512xf32>
    tpu.vector_store %arg6[%c288, %c0_161], %151 {strides = array<i32>} : memref<392x512xf32, #tpu.memory_space<vmem>>, vector<8x512xf32>,
    %c0_162 = arith.constant 0 : index
    %c0_163 = arith.constant 0 : index
    %c0_164 = arith.constant 0 : index
    %c384 = arith.constant 384 : index
    %153 = vector.load %arg4[%c0_162, %c0_163, %c0_164, %c384] : memref<1x1x8x1536xbf16, #tpu.memory_space<vmem>>, vector<1x1x8x512xbf16>
    %154 = vector.shape_cast %153 : vector<1x1x8x512xbf16> to vector<8x512xbf16>
    %155 = arith.extf %154 : vector<8x512xbf16> to vector<8x512xf32>
    %c296 = arith.constant 296 : index
    %c0_165 = arith.constant 0 : index
    %156 = vector.load %arg6[%c296, %c0_165] : memref<392x512xf32, #tpu.memory_space<vmem>>, vector<8x512xf32>
    tpu.vector_store %arg6[%c296, %c0_165], %155 {strides = array<i32>} : memref<392x512xf32, #tpu.memory_space<vmem>>, vector<8x512xf32>,
    %c0_166 = arith.constant 0 : index
    %c0_167 = arith.constant 0 : index
    %c0_168 = arith.constant 0 : index
    %c386 = arith.constant 386 : index
    %157 = vector.load %arg4[%c0_166, %c0_167, %c0_168, %c386] : memref<1x1x8x1536xbf16, #tpu.memory_space<vmem>>, vector<1x1x8x512xbf16>
    %158 = vector.shape_cast %157 : vector<1x1x8x512xbf16> to vector<8x512xbf16>
    %159 = arith.extf %158 : vector<8x512xbf16> to vector<8x512xf32>
    %c304_169 = arith.constant 304 : index
    %c0_170 = arith.constant 0 : index
    %160 = vector.load %arg6[%c304_169, %c0_170] : memref<392x512xf32, #tpu.memory_space<vmem>>, vector<8x512xf32>
    tpu.vector_store %arg6[%c304_169, %c0_170], %159 {strides = array<i32>} : memref<392x512xf32, #tpu.memory_space<vmem>>, vector<8x512xf32>,
    %c0_171 = arith.constant 0 : index
    %c0_172 = arith.constant 0 : index
    %c0_173 = arith.constant 0 : index
    %c388 = arith.constant 388 : index
    %161 = vector.load %arg4[%c0_171, %c0_172, %c0_173, %c388] : memref<1x1x8x1536xbf16, #tpu.memory_space<vmem>>, vector<1x1x8x512xbf16>
    %162 = vector.shape_cast %161 : vector<1x1x8x512xbf16> to vector<8x512xbf16>
    %163 = arith.extf %162 : vector<8x512xbf16> to vector<8x512xf32>
    %c312_174 = arith.constant 312 : index
    %c0_175 = arith.constant 0 : index
    %164 = vector.load %arg6[%c312_174, %c0_175] : memref<392x512xf32, #tpu.memory_space<vmem>>, vector<8x512xf32>
    tpu.vector_store %arg6[%c312_174, %c0_175], %163 {strides = array<i32>} : memref<392x512xf32, #tpu.memory_space<vmem>>, vector<8x512xf32>,
    %c0_176 = arith.constant 0 : index
    %c0_177 = arith.constant 0 : index
    %c0_178 = arith.constant 0 : index
    %c390 = arith.constant 390 : index
    %165 = vector.load %arg4[%c0_176, %c0_177, %c0_178, %c390] : memref<1x1x8x1536xbf16, #tpu.memory_space<vmem>>, vector<1x1x8x512xbf16>
    %166 = vector.shape_cast %165 : vector<1x1x8x512xbf16> to vector<8x512xbf16>
    %167 = arith.extf %166 : vector<8x512xbf16> to vector<8x512xf32>
    %c320 = arith.constant 320 : index
    %c0_179 = arith.constant 0 : index
    %168 = vector.load %arg6[%c320, %c0_179] : memref<392x512xf32, #tpu.memory_space<vmem>>, vector<8x512xf32>
    tpu.vector_store %arg6[%c320, %c0_179], %167 {strides = array<i32>} : memref<392x512xf32, #tpu.memory_space<vmem>>, vector<8x512xf32>,
    %c0_180 = arith.constant 0 : index
    %c0_181 = arith.constant 0 : index
    %c0_182 = arith.constant 0 : index
    %c392 = arith.constant 392 : index
    %169 = vector.load %arg4[%c0_180, %c0_181, %c0_182, %c392] : memref<1x1x8x1536xbf16, #tpu.memory_space<vmem>>, vector<1x1x8x512xbf16>
    %170 = vector.shape_cast %169 : vector<1x1x8x512xbf16> to vector<8x512xbf16>
    %171 = arith.extf %170 : vector<8x512xbf16> to vector<8x512xf32>
    %c328 = arith.constant 328 : index
    %c0_183 = arith.constant 0 : index
    %172 = vector.load %arg6[%c328, %c0_183] : memref<392x512xf32, #tpu.memory_space<vmem>>, vector<8x512xf32>
    tpu.vector_store %arg6[%c328, %c0_183], %171 {strides = array<i32>} : memref<392x512xf32, #tpu.memory_space<vmem>>, vector<8x512xf32>,
    %c0_184 = arith.constant 0 : index
    %c0_185 = arith.constant 0 : index
    %c0_186 = arith.constant 0 : index
    %c456 = arith.constant 456 : index
    %173 = vector.load %arg4[%c0_184, %c0_185, %c0_186, %c456] : memref<1x1x8x1536xbf16, #tpu.memory_space<vmem>>, vector<1x1x8x512xbf16>
    %174 = vector.shape_cast %173 : vector<1x1x8x512xbf16> to vector<8x512xbf16>
    %175 = arith.extf %174 : vector<8x512xbf16> to vector<8x512xf32>
    %c336 = arith.constant 336 : index
    %c0_187 = arith.constant 0 : index
    %176 = vector.load %arg6[%c336, %c0_187] : memref<392x512xf32, #tpu.memory_space<vmem>>, vector<8x512xf32>
    tpu.vector_store %arg6[%c336, %c0_187], %175 {strides = array<i32>} : memref<392x512xf32, #tpu.memory_space<vmem>>, vector<8x512xf32>,
    %c0_188 = arith.constant 0 : index
    %c0_189 = arith.constant 0 : index
    %c0_190 = arith.constant 0 : index
    %c458 = arith.constant 458 : index
    %177 = vector.load %arg4[%c0_188, %c0_189, %c0_190, %c458] : memref<1x1x8x1536xbf16, #tpu.memory_space<vmem>>, vector<1x1x8x512xbf16>
    %178 = vector.shape_cast %177 : vector<1x1x8x512xbf16> to vector<8x512xbf16>
    %179 = arith.extf %178 : vector<8x512xbf16> to vector<8x512xf32>
    %c344 = arith.constant 344 : index
    %c0_191 = arith.constant 0 : index
    %180 = vector.load %arg6[%c344, %c0_191] : memref<392x512xf32, #tpu.memory_space<vmem>>, vector<8x512xf32>
    tpu.vector_store %arg6[%c344, %c0_191], %179 {strides = array<i32>} : memref<392x512xf32, #tpu.memory_space<vmem>>, vector<8x512xf32>,
    %c0_192 = arith.constant 0 : index
    %c0_193 = arith.constant 0 : index
    %c0_194 = arith.constant 0 : index
    %c460 = arith.constant 460 : index
    %181 = vector.load %arg4[%c0_192, %c0_193, %c0_194, %c460] : memref<1x1x8x1536xbf16, #tpu.memory_space<vmem>>, vector<1x1x8x512xbf16>
    %182 = vector.shape_cast %181 : vector<1x1x8x512xbf16> to vector<8x512xbf16>
    %183 = arith.extf %182 : vector<8x512xbf16> to vector<8x512xf32>
    %c352 = arith.constant 352 : index
    %c0_195 = arith.constant 0 : index
    %184 = vector.load %arg6[%c352, %c0_195] : memref<392x512xf32, #tpu.memory_space<vmem>>, vector<8x512xf32>
    tpu.vector_store %arg6[%c352, %c0_195], %183 {strides = array<i32>} : memref<392x512xf32, #tpu.memory_space<vmem>>, vector<8x512xf32>,
    %c0_196 = arith.constant 0 : index
    %c0_197 = arith.constant 0 : index
    %c0_198 = arith.constant 0 : index
    %c462 = arith.constant 462 : index
    %185 = vector.load %arg4[%c0_196, %c0_197, %c0_198, %c462] : memref<1x1x8x1536xbf16, #tpu.memory_space<vmem>>, vector<1x1x8x512xbf16>
    %186 = vector.shape_cast %185 : vector<1x1x8x512xbf16> to vector<8x512xbf16>
    %187 = arith.extf %186 : vector<8x512xbf16> to vector<8x512xf32>
    %c360 = arith.constant 360 : index
    %c0_199 = arith.constant 0 : index
    %188 = vector.load %arg6[%c360, %c0_199] : memref<392x512xf32, #tpu.memory_space<vmem>>, vector<8x512xf32>
    tpu.vector_store %arg6[%c360, %c0_199], %187 {strides = array<i32>} : memref<392x512xf32, #tpu.memory_space<vmem>>, vector<8x512xf32>,
    %c0_200 = arith.constant 0 : index
    %c0_201 = arith.constant 0 : index
    %c0_202 = arith.constant 0 : index
    %c464 = arith.constant 464 : index
    %189 = vector.load %arg4[%c0_200, %c0_201, %c0_202, %c464] : memref<1x1x8x1536xbf16, #tpu.memory_space<vmem>>, vector<1x1x8x512xbf16>
    %190 = vector.shape_cast %189 : vector<1x1x8x512xbf16> to vector<8x512xbf16>
    %191 = arith.extf %190 : vector<8x512xbf16> to vector<8x512xf32>
    %c368 = arith.constant 368 : index
    %c0_203 = arith.constant 0 : index
    %192 = vector.load %arg6[%c368, %c0_203] : memref<392x512xf32, #tpu.memory_space<vmem>>, vector<8x512xf32>
    tpu.vector_store %arg6[%c368, %c0_203], %191 {strides = array<i32>} : memref<392x512xf32, #tpu.memory_space<vmem>>, vector<8x512xf32>,
    %c0_204 = arith.constant 0 : index
    %c0_205 = arith.constant 0 : index
    %c0_206 = arith.constant 0 : index
    %c466 = arith.constant 466 : index
    %193 = vector.load %arg4[%c0_204, %c0_205, %c0_206, %c466] : memref<1x1x8x1536xbf16, #tpu.memory_space<vmem>>, vector<1x1x8x512xbf16>
    %194 = vector.shape_cast %193 : vector<1x1x8x512xbf16> to vector<8x512xbf16>
    %195 = arith.extf %194 : vector<8x512xbf16> to vector<8x512xf32>
    %c376 = arith.constant 376 : index
    %c0_207 = arith.constant 0 : index
    %196 = vector.load %arg6[%c376, %c0_207] : memref<392x512xf32, #tpu.memory_space<vmem>>, vector<8x512xf32>
    tpu.vector_store %arg6[%c376, %c0_207], %195 {strides = array<i32>} : memref<392x512xf32, #tpu.memory_space<vmem>>, vector<8x512xf32>,
    %c0_208 = arith.constant 0 : index
    %c0_209 = arith.constant 0 : index
    %c0_210 = arith.constant 0 : index
    %c468 = arith.constant 468 : index
    %197 = vector.load %arg4[%c0_208, %c0_209, %c0_210, %c468] : memref<1x1x8x1536xbf16, #tpu.memory_space<vmem>>, vector<1x1x8x512xbf16>
    %198 = vector.shape_cast %197 : vector<1x1x8x512xbf16> to vector<8x512xbf16>
    %199 = arith.extf %198 : vector<8x512xbf16> to vector<8x512xf32>
    %c384_211 = arith.constant 384 : index
    %c0_212 = arith.constant 0 : index
    %200 = vector.load %arg6[%c384_211, %c0_212] : memref<392x512xf32, #tpu.memory_space<vmem>>, vector<8x512xf32>
    tpu.vector_store %arg6[%c384_211, %c0_212], %199 {strides = array<i32>} : memref<392x512xf32, #tpu.memory_space<vmem>>, vector<8x512xf32>,
    %c0_213 = arith.constant 0 : index
    %c0_214 = arith.constant 0 : index
    %201 = vector.load %arg6[%c0_213, %c0_214] : memref<392x512xf32, #tpu.memory_space<vmem>>, vector<392x512xf32>
    %cst = arith.constant dense<0.000000e+00> : vector<16x512xf32>
    %202 = tpu.matmul %2, %201, %cst {dimension_numbers = #tpu.dot_dimension_numbers<[1], [0], [0], [1], [0, 0, 1, 1], [], []>} : vector<16x392xf32>, vector<392x512xf32>, vector<16x512xf32> -> vector<16x512xf32>
    %203 = vector.broadcast %4 : vector<16x1xf32> to vector<16x512xf32>
    %204 = arith.addf %202, %203 : vector<16x512xf32>
    %205 = math.tanh %204 : vector<16x512xf32>
    %c0_215 = arith.constant 0 : index
    %c0_216 = arith.constant 0 : index
    %c0_217 = arith.constant 0 : index
    %c0_218 = arith.constant 0 : index
    %206 = vector.load %arg5[%c0_215, %c0_216, %c0_217, %c0_218] : memref<1x1x16x1024xf32, #tpu.memory_space<vmem>>, vector<1x1x16x512xf32>
    %207 = vector.shape_cast %206 : vector<1x1x16x512xf32> to vector<16x512xf32>
    %208 = vector.shape_cast %205 : vector<16x512xf32> to vector<1x1x16x512xf32>
    tpu.vector_store %arg5[%c0_215, %c0_216, %c0_217, %c0_218], %208 {strides = array<i32>} : memref<1x1x16x1024xf32, #tpu.memory_space<vmem>>, vector<1x1x16x512xf32>,
    %c0_219 = arith.constant 0 : index
    %c0_220 = arith.constant 0 : index
    %c0_221 = arith.constant 0 : index
    %c512 = arith.constant 512 : index
    %209 = vector.load %arg4[%c0_219, %c0_220, %c0_221, %c512] : memref<1x1x8x1536xbf16, #tpu.memory_space<vmem>>, vector<1x1x8x512xbf16>
    %210 = vector.shape_cast %209 : vector<1x1x8x512xbf16> to vector<8x512xbf16>
    %211 = arith.extf %210 : vector<8x512xbf16> to vector<8x512xf32>
    %c0_222 = arith.constant 0 : index
    %c0_223 = arith.constant 0 : index
    %212 = vector.load %arg6[%c0_222, %c0_223] : memref<392x512xf32, #tpu.memory_space<vmem>>, vector<8x512xf32>
    tpu.vector_store %arg6[%c0_222, %c0_223], %211 {strides = array<i32>} : memref<392x512xf32, #tpu.memory_space<vmem>>, vector<8x512xf32>,
    %c0_224 = arith.constant 0 : index
    %c0_225 = arith.constant 0 : index
    %c0_226 = arith.constant 0 : index
    %c514 = arith.constant 514 : index
    %213 = vector.load %arg4[%c0_224, %c0_225, %c0_226, %c514] : memref<1x1x8x1536xbf16, #tpu.memory_space<vmem>>, vector<1x1x8x512xbf16>
    %214 = vector.shape_cast %213 : vector<1x1x8x512xbf16> to vector<8x512xbf16>
    %215 = arith.extf %214 : vector<8x512xbf16> to vector<8x512xf32>
    %c8_227 = arith.constant 8 : index
    %c0_228 = arith.constant 0 : index
    %216 = vector.load %arg6[%c8_227, %c0_228] : memref<392x512xf32, #tpu.memory_space<vmem>>, vector<8x512xf32>
    tpu.vector_store %arg6[%c8_227, %c0_228], %215 {strides = array<i32>} : memref<392x512xf32, #tpu.memory_space<vmem>>, vector<8x512xf32>,
    %c0_229 = arith.constant 0 : index
    %c0_230 = arith.constant 0 : index
    %c0_231 = arith.constant 0 : index
    %c516 = arith.constant 516 : index
    %217 = vector.load %arg4[%c0_229, %c0_230, %c0_231, %c516] : memref<1x1x8x1536xbf16, #tpu.memory_space<vmem>>, vector<1x1x8x512xbf16>
    %218 = vector.shape_cast %217 : vector<1x1x8x512xbf16> to vector<8x512xbf16>
    %219 = arith.extf %218 : vector<8x512xbf16> to vector<8x512xf32>
    %c16_232 = arith.constant 16 : index
    %c0_233 = arith.constant 0 : index
    %220 = vector.load %arg6[%c16_232, %c0_233] : memref<392x512xf32, #tpu.memory_space<vmem>>, vector<8x512xf32>
    tpu.vector_store %arg6[%c16_232, %c0_233], %219 {strides = array<i32>} : memref<392x512xf32, #tpu.memory_space<vmem>>, vector<8x512xf32>,
    %c0_234 = arith.constant 0 : index
    %c0_235 = arith.constant 0 : index
    %c0_236 = arith.constant 0 : index
    %c518 = arith.constant 518 : index
    %221 = vector.load %arg4[%c0_234, %c0_235, %c0_236, %c518] : memref<1x1x8x1536xbf16, #tpu.memory_space<vmem>>, vector<1x1x8x512xbf16>
    %222 = vector.shape_cast %221 : vector<1x1x8x512xbf16> to vector<8x512xbf16>
    %223 = arith.extf %222 : vector<8x512xbf16> to vector<8x512xf32>
    %c24_237 = arith.constant 24 : index
    %c0_238 = arith.constant 0 : index
    %224 = vector.load %arg6[%c24_237, %c0_238] : memref<392x512xf32, #tpu.memory_space<vmem>>, vector<8x512xf32>
    tpu.vector_store %arg6[%c24_237, %c0_238], %223 {strides = array<i32>} : memref<392x512xf32, #tpu.memory_space<vmem>>, vector<8x512xf32>,
    %c0_239 = arith.constant 0 : index
    %c0_240 = arith.constant 0 : index
    %c0_241 = arith.constant 0 : index
    %c520 = arith.constant 520 : index
    %225 = vector.load %arg4[%c0_239, %c0_240, %c0_241, %c520] : memref<1x1x8x1536xbf16, #tpu.memory_space<vmem>>, vector<1x1x8x512xbf16>
    %226 = vector.shape_cast %225 : vector<1x1x8x512xbf16> to vector<8x512xbf16>
    %227 = arith.extf %226 : vector<8x512xbf16> to vector<8x512xf32>
    %c32_242 = arith.constant 32 : index
    %c0_243 = arith.constant 0 : index
    %228 = vector.load %arg6[%c32_242, %c0_243] : memref<392x512xf32, #tpu.memory_space<vmem>>, vector<8x512xf32>
    tpu.vector_store %arg6[%c32_242, %c0_243], %227 {strides = array<i32>} : memref<392x512xf32, #tpu.memory_space<vmem>>, vector<8x512xf32>,
    %c0_244 = arith.constant 0 : index
    %c0_245 = arith.constant 0 : index
    %c0_246 = arith.constant 0 : index
    %c522 = arith.constant 522 : index
    %229 = vector.load %arg4[%c0_244, %c0_245, %c0_246, %c522] : memref<1x1x8x1536xbf16, #tpu.memory_space<vmem>>, vector<1x1x8x512xbf16>
    %230 = vector.shape_cast %229 : vector<1x1x8x512xbf16> to vector<8x512xbf16>
    %231 = arith.extf %230 : vector<8x512xbf16> to vector<8x512xf32>
    %c40_247 = arith.constant 40 : index
    %c0_248 = arith.constant 0 : index
    %232 = vector.load %arg6[%c40_247, %c0_248] : memref<392x512xf32, #tpu.memory_space<vmem>>, vector<8x512xf32>
    tpu.vector_store %arg6[%c40_247, %c0_248], %231 {strides = array<i32>} : memref<392x512xf32, #tpu.memory_space<vmem>>, vector<8x512xf32>,
    %c0_249 = arith.constant 0 : index
    %c0_250 = arith.constant 0 : index
    %c0_251 = arith.constant 0 : index
    %c524 = arith.constant 524 : index
    %233 = vector.load %arg4[%c0_249, %c0_250, %c0_251, %c524] : memref<1x1x8x1536xbf16, #tpu.memory_space<vmem>>, vector<1x1x8x512xbf16>
    %234 = vector.shape_cast %233 : vector<1x1x8x512xbf16> to vector<8x512xbf16>
    %235 = arith.extf %234 : vector<8x512xbf16> to vector<8x512xf32>
    %c48_252 = arith.constant 48 : index
    %c0_253 = arith.constant 0 : index
    %236 = vector.load %arg6[%c48_252, %c0_253] : memref<392x512xf32, #tpu.memory_space<vmem>>, vector<8x512xf32>
    tpu.vector_store %arg6[%c48_252, %c0_253], %235 {strides = array<i32>} : memref<392x512xf32, #tpu.memory_space<vmem>>, vector<8x512xf32>,
    %c0_254 = arith.constant 0 : index
    %c0_255 = arith.constant 0 : index
    %c0_256 = arith.constant 0 : index
    %c588 = arith.constant 588 : index
    %237 = vector.load %arg4[%c0_254, %c0_255, %c0_256, %c588] : memref<1x1x8x1536xbf16, #tpu.memory_space<vmem>>, vector<1x1x8x512xbf16>
    %238 = vector.shape_cast %237 : vector<1x1x8x512xbf16> to vector<8x512xbf16>
    %239 = arith.extf %238 : vector<8x512xbf16> to vector<8x512xf32>
    %c56_257 = arith.constant 56 : index
    %c0_258 = arith.constant 0 : index
    %240 = vector.load %arg6[%c56_257, %c0_258] : memref<392x512xf32, #tpu.memory_space<vmem>>, vector<8x512xf32>
    tpu.vector_store %arg6[%c56_257, %c0_258], %239 {strides = array<i32>} : memref<392x512xf32, #tpu.memory_space<vmem>>, vector<8x512xf32>,
    %c0_259 = arith.constant 0 : index
    %c0_260 = arith.constant 0 : index
    %c0_261 = arith.constant 0 : index
    %c590 = arith.constant 590 : index
    %241 = vector.load %arg4[%c0_259, %c0_260, %c0_261, %c590] : memref<1x1x8x1536xbf16, #tpu.memory_space<vmem>>, vector<1x1x8x512xbf16>
    %242 = vector.shape_cast %241 : vector<1x1x8x512xbf16> to vector<8x512xbf16>
    %243 = arith.extf %242 : vector<8x512xbf16> to vector<8x512xf32>
    %c64_262 = arith.constant 64 : index
    %c0_263 = arith.constant 0 : index
    %244 = vector.load %arg6[%c64_262, %c0_263] : memref<392x512xf32, #tpu.memory_space<vmem>>, vector<8x512xf32>
    tpu.vector_store %arg6[%c64_262, %c0_263], %243 {strides = array<i32>} : memref<392x512xf32, #tpu.memory_space<vmem>>, vector<8x512xf32>,
    %c0_264 = arith.constant 0 : index
    %c0_265 = arith.constant 0 : index
    %c0_266 = arith.constant 0 : index
    %c592 = arith.constant 592 : index
    %245 = vector.load %arg4[%c0_264, %c0_265, %c0_266, %c592] : memref<1x1x8x1536xbf16, #tpu.memory_space<vmem>>, vector<1x1x8x512xbf16>
    %246 = vector.shape_cast %245 : vector<1x1x8x512xbf16> to vector<8x512xbf16>
    %247 = arith.extf %246 : vector<8x512xbf16> to vector<8x512xf32>
    %c72_267 = arith.constant 72 : index
    %c0_268 = arith.constant 0 : index
    %248 = vector.load %arg6[%c72_267, %c0_268] : memref<392x512xf32, #tpu.memory_space<vmem>>, vector<8x512xf32>
    tpu.vector_store %arg6[%c72_267, %c0_268], %247 {strides = array<i32>} : memref<392x512xf32, #tpu.memory_space<vmem>>, vector<8x512xf32>,
    %c0_269 = arith.constant 0 : index
    %c0_270 = arith.constant 0 : index
    %c0_271 = arith.constant 0 : index
    %c594 = arith.constant 594 : index
    %249 = vector.load %arg4[%c0_269, %c0_270, %c0_271, %c594] : memref<1x1x8x1536xbf16, #tpu.memory_space<vmem>>, vector<1x1x8x512xbf16>
    %250 = vector.shape_cast %249 : vector<1x1x8x512xbf16> to vector<8x512xbf16>
    %251 = arith.extf %250 : vector<8x512xbf16> to vector<8x512xf32>
    %c80_272 = arith.constant 80 : index
    %c0_273 = arith.constant 0 : index
    %252 = vector.load %arg6[%c80_272, %c0_273] : memref<392x512xf32, #tpu.memory_space<vmem>>, vector<8x512xf32>
    tpu.vector_store %arg6[%c80_272, %c0_273], %251 {strides = array<i32>} : memref<392x512xf32, #tpu.memory_space<vmem>>, vector<8x512xf32>,
    %c0_274 = arith.constant 0 : index
    %c0_275 = arith.constant 0 : index
    %c0_276 = arith.constant 0 : index
    %c596 = arith.constant 596 : index
    %253 = vector.load %arg4[%c0_274, %c0_275, %c0_276, %c596] : memref<1x1x8x1536xbf16, #tpu.memory_space<vmem>>, vector<1x1x8x512xbf16>
    %254 = vector.shape_cast %253 : vector<1x1x8x512xbf16> to vector<8x512xbf16>
    %255 = arith.extf %254 : vector<8x512xbf16> to vector<8x512xf32>
    %c88_277 = arith.constant 88 : index
    %c0_278 = arith.constant 0 : index
    %256 = vector.load %arg6[%c88_277, %c0_278] : memref<392x512xf32, #tpu.memory_space<vmem>>, vector<8x512xf32>
    tpu.vector_store %arg6[%c88_277, %c0_278], %255 {strides = array<i32>} : memref<392x512xf32, #tpu.memory_space<vmem>>, vector<8x512xf32>,
    %c0_279 = arith.constant 0 : index
    %c0_280 = arith.constant 0 : index
    %c0_281 = arith.constant 0 : index
    %c598 = arith.constant 598 : index
    %257 = vector.load %arg4[%c0_279, %c0_280, %c0_281, %c598] : memref<1x1x8x1536xbf16, #tpu.memory_space<vmem>>, vector<1x1x8x512xbf16>
    %258 = vector.shape_cast %257 : vector<1x1x8x512xbf16> to vector<8x512xbf16>
    %259 = arith.extf %258 : vector<8x512xbf16> to vector<8x512xf32>
    %c96_282 = arith.constant 96 : index
    %c0_283 = arith.constant 0 : index
    %260 = vector.load %arg6[%c96_282, %c0_283] : memref<392x512xf32, #tpu.memory_space<vmem>>, vector<8x512xf32>
    tpu.vector_store %arg6[%c96_282, %c0_283], %259 {strides = array<i32>} : memref<392x512xf32, #tpu.memory_space<vmem>>, vector<8x512xf32>,
    %c0_284 = arith.constant 0 : index
    %c0_285 = arith.constant 0 : index
    %c0_286 = arith.constant 0 : index
    %c600 = arith.constant 600 : index
    %261 = vector.load %arg4[%c0_284, %c0_285, %c0_286, %c600] : memref<1x1x8x1536xbf16, #tpu.memory_space<vmem>>, vector<1x1x8x512xbf16>
    %262 = vector.shape_cast %261 : vector<1x1x8x512xbf16> to vector<8x512xbf16>
    %263 = arith.extf %262 : vector<8x512xbf16> to vector<8x512xf32>
    %c104_287 = arith.constant 104 : index
    %c0_288 = arith.constant 0 : index
    %264 = vector.load %arg6[%c104_287, %c0_288] : memref<392x512xf32, #tpu.memory_space<vmem>>, vector<8x512xf32>
    tpu.vector_store %arg6[%c104_287, %c0_288], %263 {strides = array<i32>} : memref<392x512xf32, #tpu.memory_space<vmem>>, vector<8x512xf32>,
    %c0_289 = arith.constant 0 : index
    %c0_290 = arith.constant 0 : index
    %c0_291 = arith.constant 0 : index
    %c664 = arith.constant 664 : index
    %265 = vector.load %arg4[%c0_289, %c0_290, %c0_291, %c664] : memref<1x1x8x1536xbf16, #tpu.memory_space<vmem>>, vector<1x1x8x512xbf16>
    %266 = vector.shape_cast %265 : vector<1x1x8x512xbf16> to vector<8x512xbf16>
    %267 = arith.extf %266 : vector<8x512xbf16> to vector<8x512xf32>
    %c112_292 = arith.constant 112 : index
    %c0_293 = arith.constant 0 : index
    %268 = vector.load %arg6[%c112_292, %c0_293] : memref<392x512xf32, #tpu.memory_space<vmem>>, vector<8x512xf32>
    tpu.vector_store %arg6[%c112_292, %c0_293], %267 {strides = array<i32>} : memref<392x512xf32, #tpu.memory_space<vmem>>, vector<8x512xf32>,
    %c0_294 = arith.constant 0 : index
    %c0_295 = arith.constant 0 : index
    %c0_296 = arith.constant 0 : index
    %c666 = arith.constant 666 : index
    %269 = vector.load %arg4[%c0_294, %c0_295, %c0_296, %c666] : memref<1x1x8x1536xbf16, #tpu.memory_space<vmem>>, vector<1x1x8x512xbf16>
    %270 = vector.shape_cast %269 : vector<1x1x8x512xbf16> to vector<8x512xbf16>
    %271 = arith.extf %270 : vector<8x512xbf16> to vector<8x512xf32>
    %c120_297 = arith.constant 120 : index
    %c0_298 = arith.constant 0 : index
    %272 = vector.load %arg6[%c120_297, %c0_298] : memref<392x512xf32, #tpu.memory_space<vmem>>, vector<8x512xf32>
    tpu.vector_store %arg6[%c120_297, %c0_298], %271 {strides = array<i32>} : memref<392x512xf32, #tpu.memory_space<vmem>>, vector<8x512xf32>,
    %c0_299 = arith.constant 0 : index
    %c0_300 = arith.constant 0 : index
    %c0_301 = arith.constant 0 : index
    %c668 = arith.constant 668 : index
    %273 = vector.load %arg4[%c0_299, %c0_300, %c0_301, %c668] : memref<1x1x8x1536xbf16, #tpu.memory_space<vmem>>, vector<1x1x8x512xbf16>
    %274 = vector.shape_cast %273 : vector<1x1x8x512xbf16> to vector<8x512xbf16>
    %275 = arith.extf %274 : vector<8x512xbf16> to vector<8x512xf32>
    %c128_302 = arith.constant 128 : index
    %c0_303 = arith.constant 0 : index
    %276 = vector.load %arg6[%c128_302, %c0_303] : memref<392x512xf32, #tpu.memory_space<vmem>>, vector<8x512xf32>
    tpu.vector_store %arg6[%c128_302, %c0_303], %275 {strides = array<i32>} : memref<392x512xf32, #tpu.memory_space<vmem>>, vector<8x512xf32>,
    %c0_304 = arith.constant 0 : index
    %c0_305 = arith.constant 0 : index
    %c0_306 = arith.constant 0 : index
    %c670 = arith.constant 670 : index
    %277 = vector.load %arg4[%c0_304, %c0_305, %c0_306, %c670] : memref<1x1x8x1536xbf16, #tpu.memory_space<vmem>>, vector<1x1x8x512xbf16>
    %278 = vector.shape_cast %277 : vector<1x1x8x512xbf16> to vector<8x512xbf16>
    %279 = arith.extf %278 : vector<8x512xbf16> to vector<8x512xf32>
    %c136_307 = arith.constant 136 : index
    %c0_308 = arith.constant 0 : index
    %280 = vector.load %arg6[%c136_307, %c0_308] : memref<392x512xf32, #tpu.memory_space<vmem>>, vector<8x512xf32>
    tpu.vector_store %arg6[%c136_307, %c0_308], %279 {strides = array<i32>} : memref<392x512xf32, #tpu.memory_space<vmem>>, vector<8x512xf32>,
    %c0_309 = arith.constant 0 : index
    %c0_310 = arith.constant 0 : index
    %c0_311 = arith.constant 0 : index
    %c672 = arith.constant 672 : index
    %281 = vector.load %arg4[%c0_309, %c0_310, %c0_311, %c672] : memref<1x1x8x1536xbf16, #tpu.memory_space<vmem>>, vector<1x1x8x512xbf16>
    %282 = vector.shape_cast %281 : vector<1x1x8x512xbf16> to vector<8x512xbf16>
    %283 = arith.extf %282 : vector<8x512xbf16> to vector<8x512xf32>
    %c144_312 = arith.constant 144 : index
    %c0_313 = arith.constant 0 : index
    %284 = vector.load %arg6[%c144_312, %c0_313] : memref<392x512xf32, #tpu.memory_space<vmem>>, vector<8x512xf32>
    tpu.vector_store %arg6[%c144_312, %c0_313], %283 {strides = array<i32>} : memref<392x512xf32, #tpu.memory_space<vmem>>, vector<8x512xf32>,
    %c0_314 = arith.constant 0 : index
    %c0_315 = arith.constant 0 : index
    %c0_316 = arith.constant 0 : index
    %c674 = arith.constant 674 : index
    %285 = vector.load %arg4[%c0_314, %c0_315, %c0_316, %c674] : memref<1x1x8x1536xbf16, #tpu.memory_space<vmem>>, vector<1x1x8x512xbf16>
    %286 = vector.shape_cast %285 : vector<1x1x8x512xbf16> to vector<8x512xbf16>
    %287 = arith.extf %286 : vector<8x512xbf16> to vector<8x512xf32>
    %c152_317 = arith.constant 152 : index
    %c0_318 = arith.constant 0 : index
    %288 = vector.load %arg6[%c152_317, %c0_318] : memref<392x512xf32, #tpu.memory_space<vmem>>, vector<8x512xf32>
    tpu.vector_store %arg6[%c152_317, %c0_318], %287 {strides = array<i32>} : memref<392x512xf32, #tpu.memory_space<vmem>>, vector<8x512xf32>,
    %c0_319 = arith.constant 0 : index
    %c0_320 = arith.constant 0 : index
    %c0_321 = arith.constant 0 : index
    %c676 = arith.constant 676 : index
    %289 = vector.load %arg4[%c0_319, %c0_320, %c0_321, %c676] : memref<1x1x8x1536xbf16, #tpu.memory_space<vmem>>, vector<1x1x8x512xbf16>
    %290 = vector.shape_cast %289 : vector<1x1x8x512xbf16> to vector<8x512xbf16>
    %291 = arith.extf %290 : vector<8x512xbf16> to vector<8x512xf32>
    %c160_322 = arith.constant 160 : index
    %c0_323 = arith.constant 0 : index
    %292 = vector.load %arg6[%c160_322, %c0_323] : memref<392x512xf32, #tpu.memory_space<vmem>>, vector<8x512xf32>
    tpu.vector_store %arg6[%c160_322, %c0_323], %291 {strides = array<i32>} : memref<392x512xf32, #tpu.memory_space<vmem>>, vector<8x512xf32>,
    %c0_324 = arith.constant 0 : index
    %c0_325 = arith.constant 0 : index
    %c0_326 = arith.constant 0 : index
    %c740 = arith.constant 740 : index
    %293 = vector.load %arg4[%c0_324, %c0_325, %c0_326, %c740] : memref<1x1x8x1536xbf16, #tpu.memory_space<vmem>>, vector<1x1x8x512xbf16>
    %294 = vector.shape_cast %293 : vector<1x1x8x512xbf16> to vector<8x512xbf16>
    %295 = arith.extf %294 : vector<8x512xbf16> to vector<8x512xf32>
    %c168_327 = arith.constant 168 : index
    %c0_328 = arith.constant 0 : index
    %296 = vector.load %arg6[%c168_327, %c0_328] : memref<392x512xf32, #tpu.memory_space<vmem>>, vector<8x512xf32>
    tpu.vector_store %arg6[%c168_327, %c0_328], %295 {strides = array<i32>} : memref<392x512xf32, #tpu.memory_space<vmem>>, vector<8x512xf32>,
    %c0_329 = arith.constant 0 : index
    %c0_330 = arith.constant 0 : index
    %c0_331 = arith.constant 0 : index
    %c742 = arith.constant 742 : index
    %297 = vector.load %arg4[%c0_329, %c0_330, %c0_331, %c742] : memref<1x1x8x1536xbf16, #tpu.memory_space<vmem>>, vector<1x1x8x512xbf16>
    %298 = vector.shape_cast %297 : vector<1x1x8x512xbf16> to vector<8x512xbf16>
    %299 = arith.extf %298 : vector<8x512xbf16> to vector<8x512xf32>
    %c176_332 = arith.constant 176 : index
    %c0_333 = arith.constant 0 : index
    %300 = vector.load %arg6[%c176_332, %c0_333] : memref<392x512xf32, #tpu.memory_space<vmem>>, vector<8x512xf32>
    tpu.vector_store %arg6[%c176_332, %c0_333], %299 {strides = array<i32>} : memref<392x512xf32, #tpu.memory_space<vmem>>, vector<8x512xf32>,
    %c0_334 = arith.constant 0 : index
    %c0_335 = arith.constant 0 : index
    %c0_336 = arith.constant 0 : index
    %c744 = arith.constant 744 : index
    %301 = vector.load %arg4[%c0_334, %c0_335, %c0_336, %c744] : memref<1x1x8x1536xbf16, #tpu.memory_space<vmem>>, vector<1x1x8x512xbf16>
    %302 = vector.shape_cast %301 : vector<1x1x8x512xbf16> to vector<8x512xbf16>
    %303 = arith.extf %302 : vector<8x512xbf16> to vector<8x512xf32>
    %c184_337 = arith.constant 184 : index
    %c0_338 = arith.constant 0 : index
    %304 = vector.load %arg6[%c184_337, %c0_338] : memref<392x512xf32, #tpu.memory_space<vmem>>, vector<8x512xf32>
    tpu.vector_store %arg6[%c184_337, %c0_338], %303 {strides = array<i32>} : memref<392x512xf32, #tpu.memory_space<vmem>>, vector<8x512xf32>,
    %c0_339 = arith.constant 0 : index
    %c0_340 = arith.constant 0 : index
    %c0_341 = arith.constant 0 : index
    %c746 = arith.constant 746 : index
    %305 = vector.load %arg4[%c0_339, %c0_340, %c0_341, %c746] : memref<1x1x8x1536xbf16, #tpu.memory_space<vmem>>, vector<1x1x8x512xbf16>
    %306 = vector.shape_cast %305 : vector<1x1x8x512xbf16> to vector<8x512xbf16>
    %307 = arith.extf %306 : vector<8x512xbf16> to vector<8x512xf32>
    %c192_342 = arith.constant 192 : index
    %c0_343 = arith.constant 0 : index
    %308 = vector.load %arg6[%c192_342, %c0_343] : memref<392x512xf32, #tpu.memory_space<vmem>>, vector<8x512xf32>
    tpu.vector_store %arg6[%c192_342, %c0_343], %307 {strides = array<i32>} : memref<392x512xf32, #tpu.memory_space<vmem>>, vector<8x512xf32>,
    %c0_344 = arith.constant 0 : index
    %c0_345 = arith.constant 0 : index
    %c0_346 = arith.constant 0 : index
    %c748 = arith.constant 748 : index
    %309 = vector.load %arg4[%c0_344, %c0_345, %c0_346, %c748] : memref<1x1x8x1536xbf16, #tpu.memory_space<vmem>>, vector<1x1x8x512xbf16>
    %310 = vector.shape_cast %309 : vector<1x1x8x512xbf16> to vector<8x512xbf16>
    %311 = arith.extf %310 : vector<8x512xbf16> to vector<8x512xf32>
    %c200_347 = arith.constant 200 : index
    %c0_348 = arith.constant 0 : index
    %312 = vector.load %arg6[%c200_347, %c0_348] : memref<392x512xf32, #tpu.memory_space<vmem>>, vector<8x512xf32>
    tpu.vector_store %arg6[%c200_347, %c0_348], %311 {strides = array<i32>} : memref<392x512xf32, #tpu.memory_space<vmem>>, vector<8x512xf32>,
    %c0_349 = arith.constant 0 : index
    %c0_350 = arith.constant 0 : index
    %c0_351 = arith.constant 0 : index
    %c750 = arith.constant 750 : index
    %313 = vector.load %arg4[%c0_349, %c0_350, %c0_351, %c750] : memref<1x1x8x1536xbf16, #tpu.memory_space<vmem>>, vector<1x1x8x512xbf16>
    %314 = vector.shape_cast %313 : vector<1x1x8x512xbf16> to vector<8x512xbf16>
    %315 = arith.extf %314 : vector<8x512xbf16> to vector<8x512xf32>
    %c208_352 = arith.constant 208 : index
    %c0_353 = arith.constant 0 : index
    %316 = vector.load %arg6[%c208_352, %c0_353] : memref<392x512xf32, #tpu.memory_space<vmem>>, vector<8x512xf32>
    tpu.vector_store %arg6[%c208_352, %c0_353], %315 {strides = array<i32>} : memref<392x512xf32, #tpu.memory_space<vmem>>, vector<8x512xf32>,
    %c0_354 = arith.constant 0 : index
    %c0_355 = arith.constant 0 : index
    %c0_356 = arith.constant 0 : index
    %c752 = arith.constant 752 : index
    %317 = vector.load %arg4[%c0_354, %c0_355, %c0_356, %c752] : memref<1x1x8x1536xbf16, #tpu.memory_space<vmem>>, vector<1x1x8x512xbf16>
    %318 = vector.shape_cast %317 : vector<1x1x8x512xbf16> to vector<8x512xbf16>
    %319 = arith.extf %318 : vector<8x512xbf16> to vector<8x512xf32>
    %c216_357 = arith.constant 216 : index
    %c0_358 = arith.constant 0 : index
    %320 = vector.load %arg6[%c216_357, %c0_358] : memref<392x512xf32, #tpu.memory_space<vmem>>, vector<8x512xf32>
    tpu.vector_store %arg6[%c216_357, %c0_358], %319 {strides = array<i32>} : memref<392x512xf32, #tpu.memory_space<vmem>>, vector<8x512xf32>,
    %c0_359 = arith.constant 0 : index
    %c0_360 = arith.constant 0 : index
    %c0_361 = arith.constant 0 : index
    %c816 = arith.constant 816 : index
    %321 = vector.load %arg4[%c0_359, %c0_360, %c0_361, %c816] : memref<1x1x8x1536xbf16, #tpu.memory_space<vmem>>, vector<1x1x8x512xbf16>
    %322 = vector.shape_cast %321 : vector<1x1x8x512xbf16> to vector<8x512xbf16>
    %323 = arith.extf %322 : vector<8x512xbf16> to vector<8x512xf32>
    %c224_362 = arith.constant 224 : index
    %c0_363 = arith.constant 0 : index
    %324 = vector.load %arg6[%c224_362, %c0_363] : memref<392x512xf32, #tpu.memory_space<vmem>>, vector<8x512xf32>
    tpu.vector_store %arg6[%c224_362, %c0_363], %323 {strides = array<i32>} : memref<392x512xf32, #tpu.memory_space<vmem>>, vector<8x512xf32>,
    %c0_364 = arith.constant 0 : index
    %c0_365 = arith.constant 0 : index
    %c0_366 = arith.constant 0 : index
    %c818 = arith.constant 818 : index
    %325 = vector.load %arg4[%c0_364, %c0_365, %c0_366, %c818] : memref<1x1x8x1536xbf16, #tpu.memory_space<vmem>>, vector<1x1x8x512xbf16>
    %326 = vector.shape_cast %325 : vector<1x1x8x512xbf16> to vector<8x512xbf16>
    %327 = arith.extf %326 : vector<8x512xbf16> to vector<8x512xf32>
    %c232_367 = arith.constant 232 : index
    %c0_368 = arith.constant 0 : index
    %328 = vector.load %arg6[%c232_367, %c0_368] : memref<392x512xf32, #tpu.memory_space<vmem>>, vector<8x512xf32>
    tpu.vector_store %arg6[%c232_367, %c0_368], %327 {strides = array<i32>} : memref<392x512xf32, #tpu.memory_space<vmem>>, vector<8x512xf32>,
    %c0_369 = arith.constant 0 : index
    %c0_370 = arith.constant 0 : index
    %c0_371 = arith.constant 0 : index
    %c820 = arith.constant 820 : index
    %329 = vector.load %arg4[%c0_369, %c0_370, %c0_371, %c820] : memref<1x1x8x1536xbf16, #tpu.memory_space<vmem>>, vector<1x1x8x512xbf16>
    %330 = vector.shape_cast %329 : vector<1x1x8x512xbf16> to vector<8x512xbf16>
    %331 = arith.extf %330 : vector<8x512xbf16> to vector<8x512xf32>
    %c240_372 = arith.constant 240 : index
    %c0_373 = arith.constant 0 : index
    %332 = vector.load %arg6[%c240_372, %c0_373] : memref<392x512xf32, #tpu.memory_space<vmem>>, vector<8x512xf32>
    tpu.vector_store %arg6[%c240_372, %c0_373], %331 {strides = array<i32>} : memref<392x512xf32, #tpu.memory_space<vmem>>, vector<8x512xf32>,
    %c0_374 = arith.constant 0 : index
    %c0_375 = arith.constant 0 : index
    %c0_376 = arith.constant 0 : index
    %c822 = arith.constant 822 : index
    %333 = vector.load %arg4[%c0_374, %c0_375, %c0_376, %c822] : memref<1x1x8x1536xbf16, #tpu.memory_space<vmem>>, vector<1x1x8x512xbf16>
    %334 = vector.shape_cast %333 : vector<1x1x8x512xbf16> to vector<8x512xbf16>
    %335 = arith.extf %334 : vector<8x512xbf16> to vector<8x512xf32>
    %c248_377 = arith.constant 248 : index
    %c0_378 = arith.constant 0 : index
    %336 = vector.load %arg6[%c248_377, %c0_378] : memref<392x512xf32, #tpu.memory_space<vmem>>, vector<8x512xf32>
    tpu.vector_store %arg6[%c248_377, %c0_378], %335 {strides = array<i32>} : memref<392x512xf32, #tpu.memory_space<vmem>>, vector<8x512xf32>,
    %c0_379 = arith.constant 0 : index
    %c0_380 = arith.constant 0 : index
    %c0_381 = arith.constant 0 : index
    %c824 = arith.constant 824 : index
    %337 = vector.load %arg4[%c0_379, %c0_380, %c0_381, %c824] : memref<1x1x8x1536xbf16, #tpu.memory_space<vmem>>, vector<1x1x8x512xbf16>
    %338 = vector.shape_cast %337 : vector<1x1x8x512xbf16> to vector<8x512xbf16>
    %339 = arith.extf %338 : vector<8x512xbf16> to vector<8x512xf32>
    %c256_382 = arith.constant 256 : index
    %c0_383 = arith.constant 0 : index
    %340 = vector.load %arg6[%c256_382, %c0_383] : memref<392x512xf32, #tpu.memory_space<vmem>>, vector<8x512xf32>
    tpu.vector_store %arg6[%c256_382, %c0_383], %339 {strides = array<i32>} : memref<392x512xf32, #tpu.memory_space<vmem>>, vector<8x512xf32>,
    %c0_384 = arith.constant 0 : index
    %c0_385 = arith.constant 0 : index
    %c0_386 = arith.constant 0 : index
    %c826 = arith.constant 826 : index
    %341 = vector.load %arg4[%c0_384, %c0_385, %c0_386, %c826] : memref<1x1x8x1536xbf16, #tpu.memory_space<vmem>>, vector<1x1x8x512xbf16>
    %342 = vector.shape_cast %341 : vector<1x1x8x512xbf16> to vector<8x512xbf16>
    %343 = arith.extf %342 : vector<8x512xbf16> to vector<8x512xf32>
    %c264_387 = arith.constant 264 : index
    %c0_388 = arith.constant 0 : index
    %344 = vector.load %arg6[%c264_387, %c0_388] : memref<392x512xf32, #tpu.memory_space<vmem>>, vector<8x512xf32>
    tpu.vector_store %arg6[%c264_387, %c0_388], %343 {strides = array<i32>} : memref<392x512xf32, #tpu.memory_space<vmem>>, vector<8x512xf32>,
    %c0_389 = arith.constant 0 : index
    %c0_390 = arith.constant 0 : index
    %c0_391 = arith.constant 0 : index
    %c828 = arith.constant 828 : index
    %345 = vector.load %arg4[%c0_389, %c0_390, %c0_391, %c828] : memref<1x1x8x1536xbf16, #tpu.memory_space<vmem>>, vector<1x1x8x512xbf16>
    %346 = vector.shape_cast %345 : vector<1x1x8x512xbf16> to vector<8x512xbf16>
    %347 = arith.extf %346 : vector<8x512xbf16> to vector<8x512xf32>
    %c272_392 = arith.constant 272 : index
    %c0_393 = arith.constant 0 : index
    %348 = vector.load %arg6[%c272_392, %c0_393] : memref<392x512xf32, #tpu.memory_space<vmem>>, vector<8x512xf32>
    tpu.vector_store %arg6[%c272_392, %c0_393], %347 {strides = array<i32>} : memref<392x512xf32, #tpu.memory_space<vmem>>, vector<8x512xf32>,
    %c0_394 = arith.constant 0 : index
    %c0_395 = arith.constant 0 : index
    %c0_396 = arith.constant 0 : index
    %c892 = arith.constant 892 : index
    %349 = vector.load %arg4[%c0_394, %c0_395, %c0_396, %c892] : memref<1x1x8x1536xbf16, #tpu.memory_space<vmem>>, vector<1x1x8x512xbf16>
    %350 = vector.shape_cast %349 : vector<1x1x8x512xbf16> to vector<8x512xbf16>
    %351 = arith.extf %350 : vector<8x512xbf16> to vector<8x512xf32>
    %c280_397 = arith.constant 280 : index
    %c0_398 = arith.constant 0 : index
    %352 = vector.load %arg6[%c280_397, %c0_398] : memref<392x512xf32, #tpu.memory_space<vmem>>, vector<8x512xf32>
    tpu.vector_store %arg6[%c280_397, %c0_398], %351 {strides = array<i32>} : memref<392x512xf32, #tpu.memory_space<vmem>>, vector<8x512xf32>,
    %c0_399 = arith.constant 0 : index
    %c0_400 = arith.constant 0 : index
    %c0_401 = arith.constant 0 : index
    %c894 = arith.constant 894 : index
    %353 = vector.load %arg4[%c0_399, %c0_400, %c0_401, %c894] : memref<1x1x8x1536xbf16, #tpu.memory_space<vmem>>, vector<1x1x8x512xbf16>
    %354 = vector.shape_cast %353 : vector<1x1x8x512xbf16> to vector<8x512xbf16>
    %355 = arith.extf %354 : vector<8x512xbf16> to vector<8x512xf32>
    %c288_402 = arith.constant 288 : index
    %c0_403 = arith.constant 0 : index
    %356 = vector.load %arg6[%c288_402, %c0_403] : memref<392x512xf32, #tpu.memory_space<vmem>>, vector<8x512xf32>
    tpu.vector_store %arg6[%c288_402, %c0_403], %355 {strides = array<i32>} : memref<392x512xf32, #tpu.memory_space<vmem>>, vector<8x512xf32>,
    %c0_404 = arith.constant 0 : index
    %c0_405 = arith.constant 0 : index
    %c0_406 = arith.constant 0 : index
    %c896 = arith.constant 896 : index
    %357 = vector.load %arg4[%c0_404, %c0_405, %c0_406, %c896] : memref<1x1x8x1536xbf16, #tpu.memory_space<vmem>>, vector<1x1x8x512xbf16>
    %358 = vector.shape_cast %357 : vector<1x1x8x512xbf16> to vector<8x512xbf16>
    %359 = arith.extf %358 : vector<8x512xbf16> to vector<8x512xf32>
    %c296_407 = arith.constant 296 : index
    %c0_408 = arith.constant 0 : index
    %360 = vector.load %arg6[%c296_407, %c0_408] : memref<392x512xf32, #tpu.memory_space<vmem>>, vector<8x512xf32>
    tpu.vector_store %arg6[%c296_407, %c0_408], %359 {strides = array<i32>} : memref<392x512xf32, #tpu.memory_space<vmem>>, vector<8x512xf32>,
    %c0_409 = arith.constant 0 : index
    %c0_410 = arith.constant 0 : index
    %c0_411 = arith.constant 0 : index
    %c898 = arith.constant 898 : index
    %361 = vector.load %arg4[%c0_409, %c0_410, %c0_411, %c898] : memref<1x1x8x1536xbf16, #tpu.memory_space<vmem>>, vector<1x1x8x512xbf16>
    %362 = vector.shape_cast %361 : vector<1x1x8x512xbf16> to vector<8x512xbf16>
    %363 = arith.extf %362 : vector<8x512xbf16> to vector<8x512xf32>
    %c304_412 = arith.constant 304 : index
    %c0_413 = arith.constant 0 : index
    %364 = vector.load %arg6[%c304_412, %c0_413] : memref<392x512xf32, #tpu.memory_space<vmem>>, vector<8x512xf32>
    tpu.vector_store %arg6[%c304_412, %c0_413], %363 {strides = array<i32>} : memref<392x512xf32, #tpu.memory_space<vmem>>, vector<8x512xf32>,
    %c0_414 = arith.constant 0 : index
    %c0_415 = arith.constant 0 : index
    %c0_416 = arith.constant 0 : index
    %c900 = arith.constant 900 : index
    %365 = vector.load %arg4[%c0_414, %c0_415, %c0_416, %c900] : memref<1x1x8x1536xbf16, #tpu.memory_space<vmem>>, vector<1x1x8x512xbf16>
    %366 = vector.shape_cast %365 : vector<1x1x8x512xbf16> to vector<8x512xbf16>
    %367 = arith.extf %366 : vector<8x512xbf16> to vector<8x512xf32>
    %c312_417 = arith.constant 312 : index
    %c0_418 = arith.constant 0 : index
    %368 = vector.load %arg6[%c312_417, %c0_418] : memref<392x512xf32, #tpu.memory_space<vmem>>, vector<8x512xf32>
    tpu.vector_store %arg6[%c312_417, %c0_418], %367 {strides = array<i32>} : memref<392x512xf32, #tpu.memory_space<vmem>>, vector<8x512xf32>,
    %c0_419 = arith.constant 0 : index
    %c0_420 = arith.constant 0 : index
    %c0_421 = arith.constant 0 : index
    %c902 = arith.constant 902 : index
    %369 = vector.load %arg4[%c0_419, %c0_420, %c0_421, %c902] : memref<1x1x8x1536xbf16, #tpu.memory_space<vmem>>, vector<1x1x8x512xbf16>
    %370 = vector.shape_cast %369 : vector<1x1x8x512xbf16> to vector<8x512xbf16>
    %371 = arith.extf %370 : vector<8x512xbf16> to vector<8x512xf32>
    %c320_422 = arith.constant 320 : index
    %c0_423 = arith.constant 0 : index
    %372 = vector.load %arg6[%c320_422, %c0_423] : memref<392x512xf32, #tpu.memory_space<vmem>>, vector<8x512xf32>
    tpu.vector_store %arg6[%c320_422, %c0_423], %371 {strides = array<i32>} : memref<392x512xf32, #tpu.memory_space<vmem>>, vector<8x512xf32>,
    %c0_424 = arith.constant 0 : index
    %c0_425 = arith.constant 0 : index
    %c0_426 = arith.constant 0 : index
    %c904 = arith.constant 904 : index
    %373 = vector.load %arg4[%c0_424, %c0_425, %c0_426, %c904] : memref<1x1x8x1536xbf16, #tpu.memory_space<vmem>>, vector<1x1x8x512xbf16>
    %374 = vector.shape_cast %373 : vector<1x1x8x512xbf16> to vector<8x512xbf16>
    %375 = arith.extf %374 : vector<8x512xbf16> to vector<8x512xf32>
    %c328_427 = arith.constant 328 : index
    %c0_428 = arith.constant 0 : index
    %376 = vector.load %arg6[%c328_427, %c0_428] : memref<392x512xf32, #tpu.memory_space<vmem>>, vector<8x512xf32>
    tpu.vector_store %arg6[%c328_427, %c0_428], %375 {strides = array<i32>} : memref<392x512xf32, #tpu.memory_space<vmem>>, vector<8x512xf32>,
    %c0_429 = arith.constant 0 : index
    %c0_430 = arith.constant 0 : index
    %c0_431 = arith.constant 0 : index
    %c968 = arith.constant 968 : index
    %377 = vector.load %arg4[%c0_429, %c0_430, %c0_431, %c968] : memref<1x1x8x1536xbf16, #tpu.memory_space<vmem>>, vector<1x1x8x512xbf16>
    %378 = vector.shape_cast %377 : vector<1x1x8x512xbf16> to vector<8x512xbf16>
    %379 = arith.extf %378 : vector<8x512xbf16> to vector<8x512xf32>
    %c336_432 = arith.constant 336 : index
    %c0_433 = arith.constant 0 : index
    %380 = vector.load %arg6[%c336_432, %c0_433] : memref<392x512xf32, #tpu.memory_space<vmem>>, vector<8x512xf32>
    tpu.vector_store %arg6[%c336_432, %c0_433], %379 {strides = array<i32>} : memref<392x512xf32, #tpu.memory_space<vmem>>, vector<8x512xf32>,
    %c0_434 = arith.constant 0 : index
    %c0_435 = arith.constant 0 : index
    %c0_436 = arith.constant 0 : index
    %c970 = arith.constant 970 : index
    %381 = vector.load %arg4[%c0_434, %c0_435, %c0_436, %c970] : memref<1x1x8x1536xbf16, #tpu.memory_space<vmem>>, vector<1x1x8x512xbf16>
    %382 = vector.shape_cast %381 : vector<1x1x8x512xbf16> to vector<8x512xbf16>
    %383 = arith.extf %382 : vector<8x512xbf16> to vector<8x512xf32>
    %c344_437 = arith.constant 344 : index
    %c0_438 = arith.constant 0 : index
    %384 = vector.load %arg6[%c344_437, %c0_438] : memref<392x512xf32, #tpu.memory_space<vmem>>, vector<8x512xf32>
    tpu.vector_store %arg6[%c344_437, %c0_438], %383 {strides = array<i32>} : memref<392x512xf32, #tpu.memory_space<vmem>>, vector<8x512xf32>,
    %c0_439 = arith.constant 0 : index
    %c0_440 = arith.constant 0 : index
    %c0_441 = arith.constant 0 : index
    %c972 = arith.constant 972 : index
    %385 = vector.load %arg4[%c0_439, %c0_440, %c0_441, %c972] : memref<1x1x8x1536xbf16, #tpu.memory_space<vmem>>, vector<1x1x8x512xbf16>
    %386 = vector.shape_cast %385 : vector<1x1x8x512xbf16> to vector<8x512xbf16>
    %387 = arith.extf %386 : vector<8x512xbf16> to vector<8x512xf32>
    %c352_442 = arith.constant 352 : index
    %c0_443 = arith.constant 0 : index
    %388 = vector.load %arg6[%c352_442, %c0_443] : memref<392x512xf32, #tpu.memory_space<vmem>>, vector<8x512xf32>
    tpu.vector_store %arg6[%c352_442, %c0_443], %387 {strides = array<i32>} : memref<392x512xf32, #tpu.memory_space<vmem>>, vector<8x512xf32>,
    %c0_444 = arith.constant 0 : index
    %c0_445 = arith.constant 0 : index
    %c0_446 = arith.constant 0 : index
    %c974 = arith.constant 974 : index
    %389 = vector.load %arg4[%c0_444, %c0_445, %c0_446, %c974] : memref<1x1x8x1536xbf16, #tpu.memory_space<vmem>>, vector<1x1x8x512xbf16>
    %390 = vector.shape_cast %389 : vector<1x1x8x512xbf16> to vector<8x512xbf16>
    %391 = arith.extf %390 : vector<8x512xbf16> to vector<8x512xf32>
    %c360_447 = arith.constant 360 : index
    %c0_448 = arith.constant 0 : index
    %392 = vector.load %arg6[%c360_447, %c0_448] : memref<392x512xf32, #tpu.memory_space<vmem>>, vector<8x512xf32>
    tpu.vector_store %arg6[%c360_447, %c0_448], %391 {strides = array<i32>} : memref<392x512xf32, #tpu.memory_space<vmem>>, vector<8x512xf32>,
    %c0_449 = arith.constant 0 : index
    %c0_450 = arith.constant 0 : index
    %c0_451 = arith.constant 0 : index
    %c976 = arith.constant 976 : index
    %393 = vector.load %arg4[%c0_449, %c0_450, %c0_451, %c976] : memref<1x1x8x1536xbf16, #tpu.memory_space<vmem>>, vector<1x1x8x512xbf16>
    %394 = vector.shape_cast %393 : vector<1x1x8x512xbf16> to vector<8x512xbf16>
    %395 = arith.extf %394 : vector<8x512xbf16> to vector<8x512xf32>
    %c368_452 = arith.constant 368 : index
    %c0_453 = arith.constant 0 : index
    %396 = vector.load %arg6[%c368_452, %c0_453] : memref<392x512xf32, #tpu.memory_space<vmem>>, vector<8x512xf32>
    tpu.vector_store %arg6[%c368_452, %c0_453], %395 {strides = array<i32>} : memref<392x512xf32, #tpu.memory_space<vmem>>, vector<8x512xf32>,
    %c0_454 = arith.constant 0 : index
    %c0_455 = arith.constant 0 : index
    %c0_456 = arith.constant 0 : index
    %c978 = arith.constant 978 : index
    %397 = vector.load %arg4[%c0_454, %c0_455, %c0_456, %c978] : memref<1x1x8x1536xbf16, #tpu.memory_space<vmem>>, vector<1x1x8x512xbf16>
    %398 = vector.shape_cast %397 : vector<1x1x8x512xbf16> to vector<8x512xbf16>
    %399 = arith.extf %398 : vector<8x512xbf16> to vector<8x512xf32>
    %c376_457 = arith.constant 376 : index
    %c0_458 = arith.constant 0 : index
    %400 = vector.load %arg6[%c376_457, %c0_458] : memref<392x512xf32, #tpu.memory_space<vmem>>, vector<8x512xf32>
    tpu.vector_store %arg6[%c376_457, %c0_458], %399 {strides = array<i32>} : memref<392x512xf32, #tpu.memory_space<vmem>>, vector<8x512xf32>,
    %c0_459 = arith.constant 0 : index
    %c0_460 = arith.constant 0 : index
    %c0_461 = arith.constant 0 : index
    %c980 = arith.constant 980 : index
    %401 = vector.load %arg4[%c0_459, %c0_460, %c0_461, %c980] : memref<1x1x8x1536xbf16, #tpu.memory_space<vmem>>, vector<1x1x8x512xbf16>
    %402 = vector.shape_cast %401 : vector<1x1x8x512xbf16> to vector<8x512xbf16>
    %403 = arith.extf %402 : vector<8x512xbf16> to vector<8x512xf32>
    %c384_462 = arith.constant 384 : index
    %c0_463 = arith.constant 0 : index
    %404 = vector.load %arg6[%c384_462, %c0_463] : memref<392x512xf32, #tpu.memory_space<vmem>>, vector<8x512xf32>
    tpu.vector_store %arg6[%c384_462, %c0_463], %403 {strides = array<i32>} : memref<392x512xf32, #tpu.memory_space<vmem>>, vector<8x512xf32>,
    %c0_464 = arith.constant 0 : index
    %c0_465 = arith.constant 0 : index
    %405 = vector.load %arg6[%c0_464, %c0_465] : memref<392x512xf32, #tpu.memory_space<vmem>>, vector<392x512xf32>
    %cst_466 = arith.constant dense<0.000000e+00> : vector<16x512xf32>
    %406 = tpu.matmul %2, %405, %cst_466 {dimension_numbers = #tpu.dot_dimension_numbers<[1], [0], [0], [1], [0, 0, 1, 1], [], []>} : vector<16x392xf32>, vector<392x512xf32>, vector<16x512xf32> -> vector<16x512xf32>
    %407 = vector.broadcast %4 : vector<16x1xf32> to vector<16x512xf32>
    %408 = arith.addf %406, %407 : vector<16x512xf32>
    %409 = math.tanh %408 : vector<16x512xf32>
    %c0_467 = arith.constant 0 : index
    %c0_468 = arith.constant 0 : index
    %c0_469 = arith.constant 0 : index
    %c512_470 = arith.constant 512 : index
    %410 = vector.load %arg5[%c0_467, %c0_468, %c0_469, %c512_470] : memref<1x1x16x1024xf32, #tpu.memory_space<vmem>>, vector<1x1x16x512xf32>
    %411 = vector.shape_cast %410 : vector<1x1x16x512xf32> to vector<16x512xf32>
    %412 = vector.shape_cast %409 : vector<16x512xf32> to vector<1x1x16x512xf32>
    tpu.vector_store %arg5[%c0_467, %c0_468, %c0_469, %c512_470], %412 {strides = array<i32>} : memref<1x1x16x1024xf32, #tpu.memory_space<vmem>>, vector<1x1x16x512xf32>,
    return
  }
  func.func @transform_0(%arg0: i32, %arg1: i32) -> (i32, i32, i32) {
    %c0_i32 = arith.constant 0 : i32
    %c0_i32_0 = arith.constant 0 : i32
    %c0_i32_1 = arith.constant 0 : i32
    return %arg0, %c0_i32, %c0_i32_0 : i32, i32, i32
  }
  func.func @transform_1(%arg0: i32, %arg1: i32) -> (i32, i32, i32) {
    %c0_i32 = arith.constant 0 : i32
    %c0_i32_0 = arith.constant 0 : i32
    %c0_i32_1 = arith.constant 0 : i32
    return %arg0, %c0_i32, %c0_i32_0 : i32, i32, i32
  }
  func.func @transform_2(%arg0: i32, %arg1: i32) -> (i32, i32, i32, i32) {
    %c0_i32 = arith.constant 0 : i32
    %c0_i32_0 = arith.constant 0 : i32
    %c0_i32_1 = arith.constant 0 : i32
    return %arg1, %arg0, %c0_i32, %c0_i32_0 : i32, i32, i32, i32
  }
  func.func @transform_3(%arg0: i32, %arg1: i32) -> (i32, i32, i32, i32) {
    %c0_i32 = arith.constant 0 : i32
    %c0_i32_0 = arith.constant 0 : i32
    %c0_i32_1 = arith.constant 0 : i32
    return %arg1, %arg0, %c0_i32, %c0_i32_0 : i32, i32, i32, i32
  }
}

</mosaic_0001>

<bundles_post_ra>
// kernel: model_tanh_forward.1
= control target key start
LH: loop header
LB: loop body
LE: loop exit
PB: predicated region body
PF: predicated region fallthrough
CT: control target
= control target key end

     0   :  { %s6587_s12 = smov 0   ;;  %s6589_s13 = smov 0   ;;  %s8181_s0 = inlined_call_operand.vmem [shape: bf16[2,16,392], index: 0, kind: input, shape index: {}]   ;;  %s8182_s1 = inlined_call_operand.vmem [shape: f32[2,16,1], index: 1, kind: input, shape index: {}]   ;;  %s8183_s2 = inlined_call_operand.vmem [shape: bf16[2,2,8,1536], index: 2, kind: input, shape index: {}]   ;;  %s8184_s3 = inlined_call_operand.vmem [shape: f32[2,2,16,1024], index: 3, kind: output, shape index: {}]  }
   0x1   :  { %s6591_s14 = smov 0   ;;  %s6593_s15 = smov 0  }
   0x2   :  { %s6595_s16 = smov 0  }
   0x3 LB: > { %s22_s17 = sadd.s32 1, %s6518_s14  ;;  %s25_s18 = sadd.s32 1, %s6522_s15  ;;  %s6526_s16 = sphi %s6595_s16, %s13_s16   ;;  %s6522_s15 = sphi %s6593_s15, %s8454_s15   ;;  %s6518_s14 = sphi %s6591_s14, %s8453_s14   ;;  %s6514_s13 = sphi %s6589_s13, %s8452_s13   ;;  %s6510_s12 = sphi %s6587_s12, %s8451_s12  }
   0x4   : > { %p23_p0 = scmp.ge.s32.totalorder %s22_s17, 2  ;;  %p4809_p1 = scmp.ge.s32.totalorder %s6526_s16, 1 }
   0x5   : > { %p177_p2 = scmp.lt.s32.totalorder %s6526_s16, 5 }
   0x6   : > { %s8456_s17 = smov (%p23_p0, %s22_s17), 0  ;;  %s8458_s18 = smov (!%p23_p0, %s25_s18), %s6522_s15 }
   0x7   : > { %p178_p3 = pnand %p4809_p1, %p177_p2  ;;  %p27_p4 = scmp.ge.s32.totalorder %s8458_s18, 2 }
   0x9   : > { %s8460_s18 = smov (%p27_p4, %s8458_s18), 0  ;;  %181 = sbr.rel (%p178_p3) target bundleno = 886 (0x376), region = 32 }
  0x10   : > { %p219_p5 = scmp.lt.s32.totalorder %s6514_s13, 1  ;;  %p229_p6 = scmp.lt.s32.totalorder %s6510_s12, 1  ;;  %vm294_vm0 = vcmask 1031168   ;;  %vm330_vm1 = vcmask 1014784   ;;  %vm366_vm2 = vcmask 998400   ;;  %vm402_vm3 = vcmask 982016  }
  0x11   : > { %s6528_s26 = smov 126   ;;  %s6529_s27 = smov 124   ;;  %vm438_vm4 = vcmask 965632   ;;  %vm474_vm5 = vcmask 949248   ;;  %vm8281_vm6 = vcmask 424960   ;;  %vm8280_vm7 = vcmask 408576  }
  0x12   : > { %s8462_s13 = smov (!%p219_p5, %s6514_s13), 1  ;;  %s8464_s12 = smov (!%p229_p6, %s6510_s12), 1  ;;  %vm8279_vm8 = vcmask 392192   ;;  %vm8278_vm9 = vcmask 375808   ;;  %vm8277_vm10 = vcmask 359424   ;;  %vm690_vm11 = vcmask 343040  }
  0x13   : > { %s5246_s19 = smul.u32 12, %s8462_s13  ;;  %s6530_s28 = smov 122   ;;  %vm8268_vm12 = vcmask 326656   ;;  %vm8226_vm13 = vcmask 850944   ;;  %vm8221_vm14 = vcmask 834560   ;;  %vm8223_vm15 = vcmask 818176  }
  0x14   : > { %s5247_s20 = smul.u32 24, %s8464_s12  ;;  %s6531_s29 = smov 120  }
  0x15   : > { %s6532_s30 = smov 118   ;;  %s6533_s4 = smov 116  }
  0x16   : > { %s235_s21 = sadd.s32 %s5247_s20, %s5246_s19  ;;  %s6534_s5 = smov 52  }
  0x17   : > { %s4814_s22 = sshll.u32 %s235_s21, 2  ;;  %s6535_s6 = smov 50  }
  0x18   : > { %s6626_s25 = scalar_lea.vmem %s8183_s2, %s4814_s22  ;;  %s6536_s7 = smov 48  }
  0x19   : > { %v6629_v0 = vld [vmem:[%s6626_s25 + $0x10] sm:$0xff]   ;;  %v6635_v2 = vld [vmem:[%s6626_s25] sm:$0xff]  ;;  %v6643_v6 = vld [vmem:[%s6626_s25 + $0x8] sm:$0xff]  ;;  %s6537_s8 = smov 46   ;;  %s6538_s9 = smov 44  }
  0x1a   : > { %v6632_v1 = vld [vmem:[%s6626_s25 + $0xc] sm:$0xff]  ;;  %v278_v3 = vunpack.c.l.bf16 %v6629_v0  ;;  %v274_v5 = vunpack.c.l.bf16 %v6635_v2  ;;  %v275_v7 = vunpack.c.h.bf16 %v6635_v2  ;;  %v276_v8 = vunpack.c.l.bf16 %v6643_v6  ;;  %v2966_v21 = vld [vmem:[%s6626_s25 + $0x14] sm:$0xff]  ;;  %s6539_s10 = smov 42   ;;  %v739_v56 = vld [vmem:[%s6626_s25 + $0x4] sm:$0xff]  ;;  %s6540_s11 = smov 40  }
  0x1b   : > { %v6639_v4 = vunpack.c.l.bf16 %v6632_v1  ;;  %v277_v9 = vunpack.c.h.bf16 %v6643_v6  ;;  %v6649_v10 = vld [vmem:[%s6626_s25 + $0x10] sm:$0xff]   ;;  %v6701_v26 = vunpack.c.h.bf16 %v2966_v21  ;;  %v742_v57 = vunpack.c.l.bf16 %v739_v56  ;;  %s8217_s19 = smov 104   ;;  %s8215_s20 = smov 102  }
  0x1c   : > { %v6656_v12 = vpack.i.bf16 %v275_v7, %v274_v5  ;;  %v314_v13 = vunpack.c.l.bf16 %v6649_v10  ;;  %v6674_v16 = vld [vmem:[%s6626_s25 + $0x10] sm:$0xff]   ;;  %v743_v58 = vunpack.c.h.bf16 %v739_v56  ;;  %v746_v61 = vunpack.c.h.bf16 %v6629_v0  ;;  %s8185_s21 = smov 100   ;;  %s8213_s22 = smov 98  }
  0x1d   : > { %v5337_v11 = vpack.i.bf16 %v6639_v4, %v278_v3  ;;  %v6666_v14 = vpack.i.bf16 %v277_v9, %v276_v8  ;;  %v350_v17 = vunpack.c.l.bf16 %v6674_v16  ;;  %v6681_v18 = vld [vmem:[%s6626_s25 + $0x10] sm:$0xff]   ;;  %v1581_v62 = vunpack.c.h.bf16 %v6632_v1  ;;  %s8211_s23 = smov 96   ;;  %s8187_s24 = smov 94  }
  0x1e   : > { %5328 = vrot.lane.b32.xlu0 %v6656_v12, %s6528_s26  ;;  %v5352_v15 = vpack.i.bf16 %v6639_v4, %v314_v13  ;;  %v386_v19 = vunpack.c.l.bf16 %v6681_v18  ;;  %v6695_v23 = vld [vmem:[%s6626_s25 + $0x10] sm:$0xff]   ;;  %v6799_v60 = vpack.i.bf16 %v743_v58, %v742_v57  ;;  %v5532_v3 = vpack.i.bf16 %v6701_v26, %v746_v61 }
  0x1f   : > { %5338 = vrot.lane.b32.xlu1 %v5337_v11, %s6528_s26  ;;  %v5367_v20 = vpack.i.bf16 %v6639_v4, %v350_v17  ;;  %v6698_v24 = vld [vmem:[%s6626_s25 + $0x10] sm:$0xff]   ;;  %v1142_v27 = vunpack.c.h.bf16 %v6695_v23  ;;  %v674_v53 = vunpack.c.l.bf16 %v6695_v23  ;;  %v6813_v11 = vpack.i.bf16 %v1581_v62, %v6639_v4 }
  0x20   : > { %v5382_v22 = vpack.i.bf16 %v6639_v4, %v386_v19  ;;  %v2651_v25 = vld [vmem:[%s6626_s25 + $0x10] sm:$0xff]  ;;  %v422_v29 = vunpack.c.l.bf16 %v6698_v24  ;;  %v782_v0 = vunpack.c.h.bf16 %v6649_v10  ;;  %v854_v10 = vunpack.c.h.bf16 %v6681_v18 }
  0x21   : > { %v6706_v28 = vpack.i.bf16 %v6701_v26, %v1142_v27  ;;  %v6711_v30 = vunpack.c.l.bf16 %v2651_v25  ;;  %v6714_v31 = vld [vmem:[%s6626_s25 + $0x10] sm:$0xff]   ;;  %v6780_v52 = vunpack.c.h.bf16 %v2651_v25 }
  0x22   : > { %5333 = vrot.lane.b32.xlu0 %v6666_v14, %s6528_s26  ;;  %v6717_v32 = vld [vmem:[%s6626_s25 + $0x10] sm:$0xff]   ;;  %v458_v34 = vunpack.c.l.bf16 %v6714_v31  ;;  %v5547_v13 = vpack.i.bf16 %v6701_v26, %v782_v0  ;;  %v926_v17 = vunpack.c.h.bf16 %v6714_v31 }
  0x23   : > { %5343 = vrot.lane.b32.xlu1 %v6656_v12, %s6529_s27  ;;  %v1178_v33 = vunpack.c.h.bf16 %v6717_v32  ;;  %v5397_v36 = vpack.i.bf16 %v6711_v30, %v422_v29  ;;  %v6734_v38 = vld [vmem:[%s6626_s25 + $0x10] sm:$0xff]   ;;  %v5502_v55 = vpack.i.bf16 %v6780_v52, %v674_v53  ;;  %v710_v59 = vunpack.c.l.bf16 %v6717_v32 }
  0x24   : > { %v5412_v37 = vpack.i.bf16 %v6711_v30, %v458_v34  ;;  %v494_v39 = vunpack.c.l.bf16 %v6734_v38  ;;  %v6741_v40 = vld [vmem:[%s6626_s25 + $0x10] sm:$0xff]   ;;  %v962_v18 = vunpack.c.h.bf16 %v6734_v38  ;;  %v5607_v19 = vpack.i.bf16 %v6701_v26, %v926_v17 }
  0x25   : > { %v6724_v35 = vpack.i.bf16 %v6701_v26, %v1178_v33  ;;  %v530_v41 = vunpack.c.l.bf16 %v6741_v40  ;;  %v6754_v44 = vld [vmem:[%s6626_s25 + $0x10] sm:$0xff]   ;;  %v5517_v63 = vpack.i.bf16 %v6780_v52, %v710_v59  ;;  %v998_v25 = vunpack.c.h.bf16 %v6741_v40 }
  0x26   : > { %5348 = vrot.lane.b32.xlu0 %v6666_v14, %s6529_s27  ;;  %v5427_v42 = vpack.i.bf16 %v6639_v4, %v494_v39  ;;  %v566_v45 = vunpack.c.l.bf16 %v6754_v44  ;;  %v6761_v46 = vld [vmem:[%s6626_s25 + $0x10] sm:$0xff]   ;;  %v1034_v34 = vunpack.c.h.bf16 %v6754_v44 }
  0x27   : > { %5353 = vrot.lane.b32.xlu1 %v5352_v15, %s6529_s27  ;;  %v5442_v43 = vpack.i.bf16 %v6639_v4, %v530_v41  ;;  %v602_v47 = vunpack.c.l.bf16 %v6761_v46  ;;  %v6774_v50 = vld [vmem:[%s6626_s25 + $0x10] sm:$0xff]   ;;  %v5577_v15 = vpack.i.bf16 %v6701_v26, %v854_v10  ;;  %v1070_v56 = vunpack.c.h.bf16 %v6761_v46 }
  0x28   : > { %v5457_v48 = vpack.i.bf16 %v6639_v4, %v566_v45  ;;  %v638_v51 = vunpack.c.l.bf16 %v6774_v50  ;;  %v1106_v46 = vunpack.c.h.bf16 %v6774_v50 }
  0x29   : > { %v5472_v49 = vpack.i.bf16 %v6639_v4, %v602_v47  ;;  %v5667_v10 = vpack.i.bf16 %v6701_v26, %v1070_v56 }
  0x2a   : > { %5358 = vrot.lane.b32.xlu0 %v6656_v12, %s6530_s28  ;;  %v5487_v54 = vpack.i.bf16 %v6639_v4, %v638_v51 }
  0x2b   : > { %5363 = vrot.lane.b32.xlu1 %v6666_v14, %s6530_s28 }
  0x2e   : > { %5368 = vrot.lane.b32.xlu0 %v5367_v20, %s6530_s28  ;;  %v5622_v20 = vpack.i.bf16 %v6701_v26, %v962_v18 }
  0x2f   : > { %5373 = vrot.lane.b32.xlu1 %v6656_v12, %s6531_s29 }
  0x32   : > { %5378 = vrot.lane.b32.xlu0 %v6666_v14, %s6531_s29 }
  0x33   : > { %5383 = vrot.lane.b32.xlu1 %v5382_v22, %s6531_s29 }
  0x36   : > { %5388 = vrot.lane.b32.xlu0 %v6656_v12, %s6532_s30 }
  0x37   : > { %5393 = vrot.lane.b32.xlu1 %v6666_v14, %s6532_s30 }
  0x3a   : > { %5398 = vrot.lane.b32.xlu0 %v5397_v36, %s6532_s30  ;;  %v5637_v36 = vpack.i.bf16 %v6701_v26, %v998_v25 }
  0x3b   : > { %5403 = vrot.lane.b32.xlu1 %v6656_v12, %s6533_s4 }
  0x3e   : > { %5408 = vrot.lane.b32.xlu0 %v6666_v14, %s6533_s4 }
  0x3f   : > { %5413 = vrot.lane.b32.xlu1 %v5412_v37, %s6533_s4 }
  0x42   : > { %5418 = vrot.lane.b32.xlu0 %v6656_v12, %s6534_s5 }
  0x43   : > { %5423 = vrot.lane.b32.xlu1 %v6666_v14, %s6534_s5 }
  0x46   : > { %5428 = vrot.lane.b32.xlu0 %v5427_v42, %s6534_s5 }
  0x47   : > { %5433 = vrot.lane.b32.xlu1 %v6656_v12, %s6535_s6 }
  0x4a   : > { %5438 = vrot.lane.b32.xlu0 %v6666_v14, %s6535_s6 }
  0x4b   : > { %5443 = vrot.lane.b32.xlu1 %v5442_v43, %s6535_s6 }
  0x4e   : > { %5448 = vrot.lane.b32.xlu0 %v6656_v12, %s6536_s7 }
  0x4f   : > { %5453 = vrot.lane.b32.xlu1 %v6666_v14, %s6536_s7 }
  0x52   : > { %5458 = vrot.lane.b32.xlu0 %v5457_v48, %s6536_s7  ;;  %v5652_v48 = vpack.i.bf16 %v6701_v26, %v1034_v34 }
  0x53   : > { %5463 = vrot.lane.b32.xlu1 %v6656_v12, %s6537_s8 }
  0x56   : > { %5468 = vrot.lane.b32.xlu0 %v6666_v14, %s6537_s8 }
  0x57   : > { %5473 = vrot.lane.b32.xlu1 %v5472_v49, %s6537_s8 }
  0x5a   : > { %5478 = vrot.lane.b32.xlu0 %v6656_v12, %s6538_s9 }
  0x5b   : > { %5483 = vrot.lane.b32.xlu1 %v6666_v14, %s6538_s9 }
  0x5e   : > { %5488 = vrot.lane.b32.xlu0 %v5487_v54, %s6538_s9 }
  0x5f   : > { %5493 = vrot.lane.b32.xlu1 %v6656_v12, %s6539_s10 }
  0x62   : > { %5498 = vrot.lane.b32.xlu0 %v6666_v14, %s6539_s10 }
  0x63   : > { %5503 = vrot.lane.b32.xlu1 %v5502_v55, %s6539_s10 }
  0x66   : > { %5508 = vrot.lane.b32.xlu0 %v6656_v12, %s6540_s11  ;;  %v818_v12 = vunpack.c.h.bf16 %v6674_v16 }
  0x67   : > { %5513 = vrot.lane.b32.xlu1 %v6666_v14, %s6540_s11  ;;  %v890_v14 = vunpack.c.h.bf16 %v6698_v24 }
  0x68   : > { %v5562_v4 = vpack.i.bf16 %v6701_v26, %v818_v12 }
  0x69   : > { %v5592_v16 = vpack.i.bf16 %v6701_v26, %v890_v14 }
  0x6a   : > { %5518 = vrot.lane.b32.xlu0 %v5517_v63, %s6540_s11 }
  0x6b   : > { %5523 = vrot.lane.b32.xlu1 %v6799_v60, %s8217_s19 }
  0x6e   : > { %5528 = vrot.lane.b32.xlu0 %v6813_v11, %s8217_s19 }
  0x6f   : > { %5533 = vrot.lane.b32.xlu1 %v5532_v3, %s8217_s19  ;;  %s8239_s19 = smov 72  }
  0x72   : > { %5538 = vrot.lane.b32.xlu0 %v6799_v60, %s8215_s20 }
  0x73   : > { %5543 = vrot.lane.b32.xlu1 %v6813_v11, %s8215_s20 }
  0x76   : > { %5548 = vrot.lane.b32.xlu0 %v5547_v13, %s8215_s20 }
  0x77   : > { %5553 = vrot.lane.b32.xlu1 %v6799_v60, %s8185_s21 }
  0x7a   : > { %5558 = vrot.lane.b32.xlu0 %v6813_v11, %s8185_s21 }
  0x7b   : > { %5563 = vrot.lane.b32.xlu1 %v5562_v4, %s8185_s21  ;;  %s8189_s21 = smov 92   ;;  %v1136_v4 = vld [vmem:[%s6626_s25 + $0xc] sm:$0xff] }
  0x7e   : > { %5568 = vrot.lane.b32.xlu0 %v6799_v60, %s8213_s22 }
  0x7f   : > { %5573 = vrot.lane.b32.xlu1 %v6813_v11, %s8213_s22 }
  0x82   : > { %5578 = vrot.lane.b32.xlu0 %v5577_v15, %s8213_s22  ;;  %s8237_s22 = smov 70  }
  0x83   : > { %5583 = vrot.lane.b32.xlu1 %v6799_v60, %s8211_s23 }
  0x86   : > { %5588 = vrot.lane.b32.xlu0 %v6813_v11, %s8211_s23 }
  0x87   : > { %5593 = vrot.lane.b32.xlu1 %v5592_v16, %s8211_s23  ;;  %s8219_s23 = smov 68  }
  0x8a   : > { %5598 = vrot.lane.b32.xlu0 %v6799_v60, %s8187_s24 }
  0x8b   : > { %5603 = vrot.lane.b32.xlu1 %v6813_v11, %s8187_s24 }
  0x8e   : > { %5608 = vrot.lane.b32.xlu0 %v5607_v19, %s8187_s24  ;;  %s8191_s24 = smov 28  }
  0x8f   : > { %5613 = vrot.lane.b32.xlu1 %v6799_v60, %s8189_s21 }
  0x90   : > { %v5329_v22 = vpop.permute.xlu0 %5328 }
  0x91   : > { %v6857_v21 = vpop.permute.xlu1 %5338  ;;  %v5331_v23 = vunpack.i.h.bf16 %v5329_v22  ;;  %v5330_v24 = vunpack.i.l.bf16 %v5329_v22 }
  0x92   : > { %5618 = vrot.lane.b32.xlu0 %v6813_v11, %s8189_s21  ;;  %v5340_v31 = vunpack.i.l.bf16 %v6857_v21 }
  0x93   : > { %5623 = vrot.lane.b32.xlu1 %v5622_v20, %s8189_s21  ;;  %v295_v37 = vsel %vm294_vm0, %v5330_v24, %v5331_v23  ;;  %s8193_s21 = smov 26   ;;  %v1140_v20 = vunpack.c.l.bf16 %v1136_v4  ;;  %v1141_v24 = vunpack.c.h.bf16 %v1136_v4 }
  0x94   : > { %v5334_v29 = vpop.permute.xlu0 %5333  ;;  %v4832_v45 = vpack.c.bf16 %v295_v37, %v274_v5 }
  0x95   : > { %v5344_v27 = vpop.permute.xlu1 %5343  ;;  %v5336_v32 = vunpack.i.h.bf16 %v5334_v29  ;;  %v5335_v33 = vunpack.i.l.bf16 %v5334_v29 }
  0x96   : > { %5628 = vrot.lane.b32.xlu0 %v6799_v60, %s8191_s24  ;;  %v5346_v49 = vunpack.i.h.bf16 %v5344_v27  ;;  %v5345_v51 = vunpack.i.l.bf16 %v5344_v27 }
  0x97   : > { %5633 = vrot.lane.b32.xlu1 %v6813_v11, %s8191_s24  ;;  %v296_v39 = vsel %vm294_vm0, %v5331_v23, %v5335_v33  ;;  %v298_v40 = vsel %vm294_vm0, %v5336_v32, %v5340_v31  ;;  %v297_v41 = vsel %vm294_vm0, %v5335_v33, %v5336_v32  ;;  %v5682_v23 = vpack.i.bf16 %v6701_v26, %v1106_v46 }
  0x98   : > { %v5349_v42 = vpop.permute.xlu0 %5348  ;;  %v4830_v43 = vpack.c.bf16 %v296_v39, %v275_v7  ;;  %v4926_v44 = vpack.c.bf16 %v298_v40, %v277_v9  ;;  %v4928_v47 = vpack.c.bf16 %v297_v41, %v276_v8  ;;  %v331_v55 = vsel %vm330_vm1, %v5345_v51, %v5346_v49 }
  0x99   : > { %v6871_v38 = vpop.permute.xlu1 %5353  ;;  %v5350_v7 = vunpack.i.l.bf16 %v5349_v42  ;;  %v5351_v57 = vunpack.i.h.bf16 %v5349_v42  ;;  %v6552_v32 = vmov 0   ;;  %v6918_v39 = vpack.i.bf16 %v1141_v24, %v1140_v20 }
  0x9a   : > { %5638 = vrot.lane.b32.xlu0 %v5637_v36, %s8191_s24  ;;  %4831 = vmatprep.subr.bf16.mxu0 %v4830_v43  ;;  %v5355_v6 = vunpack.i.l.bf16 %v6871_v38  ;;  %s8195_s24 = smov 24  }
  0x9b   : > { %5643 = vrot.lane.b32.xlu1 %v6799_v60, %s8193_s21  ;;  %4927 = vmatprep.subr.bf16.mxu1 %v4926_v44  ;;  %v332_v59 = vsel %vm330_vm1, %v5346_v49, %v5350_v7  ;;  %v333_v50 = vsel %vm330_vm1, %v5350_v7, %v5351_v57 }
  0x9c   : > { %4833 = vmatpush1.bf16.msra.mxu0 %v4832_v45  ;;  %4929 = vmatpush1.bf16.msra.mxu1 %v4928_v47  ;;  %v5359_v54 = vpop.permute.xlu0 %5358  ;;  %v334_v16 = vsel %vm330_vm1, %v5351_v57, %v5355_v6 }
  0x9d   : > { %v5364_v9 = vpop.permute.xlu1 %5363  ;;  %v5361_v2 = vunpack.i.h.bf16 %v5359_v54  ;;  %v5360_v5 = vunpack.i.l.bf16 %v5359_v54  ;;  %5973 = vset.pattern.permute.xlu1 %v6552_v32  ;;  %5972 = vset.pattern.permute.xlu0 %v6552_v32 }
  0x9e   : > { %v5365_v53 = vunpack.i.l.bf16 %v5364_v9  ;;  %v5366_v8 = vunpack.i.h.bf16 %v5364_v9  ;;  %5648 = vrot.lane.b32.xlu0 %v6813_v11, %s8193_s21 }
  0x9f   : > { %5653 = vrot.lane.b32.xlu1 %v5652_v48, %s8193_s21  ;;  %v367_v63 = vsel %vm366_vm2, %v5360_v5, %v5361_v2  ;;  %s8197_s21 = smov 22  }
  0xa0   : > { %v368_v61 = vsel %vm366_vm2, %v5361_v2, %v5365_v53  ;;  %v6897_v3 = vpop.permute.xlu0 %5368  ;;  %v4836_v12 = vpack.c.bf16 %v367_v63, %v331_v55  ;;  %v369_v14 = vsel %vm366_vm2, %v5365_v53, %v5366_v8  ;;  %v1209_v63 = vld [vmem:[%s6626_s25 + $0x14] sm:$0xff]  }
  0xa1   : > { %v5374_v58 = vpop.permute.xlu1 %5373  ;;  %v4834_v0 = vpack.c.bf16 %v368_v61, %v332_v59  ;;  %v5370_v13 = vunpack.i.l.bf16 %v6897_v3  ;;  %v4932_v22 = vpack.c.bf16 %v369_v14, %v333_v50  ;;  %v1250_v32 = vunpack.c.h.bf16 %v1209_v63 }
  0xa2   : > { %5658 = vrot.lane.b32.xlu0 %v6799_v60, %s8195_s24  ;;  %v5376_v25 = vunpack.i.h.bf16 %v5374_v58  ;;  %v5375_v27 = vunpack.i.l.bf16 %v5374_v58  ;;  %v1243_v58 = vld [vmem:[%s6626_s25 + $0x8] sm:$0xff] }
  0xa3   : > { %5663 = vrot.lane.b32.xlu1 %v6813_v11, %s8195_s24  ;;  %4835 = vmatprep.subr.bf16.mxu0 %v4834_v0  ;;  %v370_v17 = vsel %vm366_vm2, %v5366_v8, %v5370_v13  ;;  %v1246_v4 = vunpack.c.l.bf16 %v1243_v58 }
  0xa4   : > { %4837 = vmatpush1.bf16.msra.mxu0 %v4836_v12  ;;  %v5379_v18 = vpop.permute.xlu0 %5378  ;;  %v4930_v19 = vpack.c.bf16 %v370_v17, %v334_v16  ;;  %v403_v42 = vsel %vm402_vm3, %v5375_v27, %v5376_v25  ;;  %v1214_v17 = vunpack.c.l.bf16 %v1209_v63 }
  0xa5   : > { %v6908_v15 = vpop.permute.xlu1 %5383  ;;  %v5380_v29 = vunpack.i.l.bf16 %v5379_v18  ;;  %v5381_v43 = vunpack.i.h.bf16 %v5379_v18  ;;  %v3456_v18 = vld [vmem:[%s6626_s25 + $0x18] sm:$0xff] }
  0xa6   : > { %5668 = vrot.lane.b32.xlu0 %v5667_v10, %s8195_s24  ;;  %4931 = vmatprep.subr.bf16.mxu1 %v4930_v19  ;;  %v5385_v40 = vunpack.i.l.bf16 %v6908_v15  ;;  %s8201_s24 = smov 20   ;;  %v1247_v10 = vunpack.c.h.bf16 %v1243_v58  ;;  %v6991_v58 = vld [vmem:[%s6626_s25 + $0x18] sm:$0xff]  }
  0xa7   : > { %5673 = vrot.lane.b32.xlu1 %v6799_v60, %s8197_s21  ;;  %4933 = vmatpush1.bf16.msra.mxu1 %v4932_v22  ;;  %v404_v45 = vsel %vm402_vm3, %v5376_v25, %v5380_v29  ;;  %v405_v8 = vsel %vm402_vm3, %v5380_v29, %v5381_v43 }
  0xa8   : > { %v5389_v34 = vpop.permute.xlu0 %5388  ;;  %v406_v54 = vsel %vm402_vm3, %v5381_v43, %v5385_v40 }
  0xa9   : > { %v5394_v31 = vpop.permute.xlu1 %5393  ;;  %v5391_v36 = vunpack.i.h.bf16 %v5389_v34  ;;  %v5390_v37 = vunpack.i.l.bf16 %v5389_v34  ;;  %v5727_v34 = vpack.i.bf16 %v6701_v26, %v1214_v17 }
  0xaa   : > { %v5395_v33 = vunpack.i.l.bf16 %v5394_v31  ;;  %v5396_v41 = vunpack.i.h.bf16 %v5394_v31  ;;  %5678 = vrot.lane.b32.xlu0 %v6813_v11, %s8197_s21  ;;  %v6962_v31 = vpack.i.bf16 %v1247_v10, %v1246_v4 }
  0xab   : > { %5683 = vrot.lane.b32.xlu1 %v5682_v23, %s8197_s21  ;;  %v439_v48 = vsel %vm438_vm4, %v5390_v37, %v5391_v36  ;;  %s8199_s21 = smov 18   ;;  %v1244_v23 = vld [vmem:[%s6626_s25 + $0x10] sm:$0xff] }
  0xac   : > { %v440_v47 = vsel %vm438_vm4, %v5391_v36, %v5395_v33  ;;  %v6927_v49 = vpop.permute.xlu0 %5398  ;;  %v4840_v7 = vpack.c.bf16 %v439_v48, %v403_v42  ;;  %v441_v11 = vsel %vm438_vm4, %v5395_v33, %v5396_v41  ;;  %v6964_v33 = vunpack.c.h.bf16 %v3456_v18 }
  0xad   : > { %v5404_v44 = vpop.permute.xlu1 %5403  ;;  %v4838_v51 = vpack.c.bf16 %v440_v47, %v404_v45  ;;  %v5400_v9 = vunpack.i.l.bf16 %v6927_v49  ;;  %v4936_v55 = vpack.c.bf16 %v441_v11, %v405_v8  ;;  %v1248_v37 = vunpack.c.l.bf16 %v1244_v23  ;;  %v6982_v11 = vld [vmem:[%s6626_s25 + $0x18] sm:$0xff]  }
  0xae   : > { %5688 = vrot.lane.b32.xlu0 %v6799_v60, %s8201_s24  ;;  %v5406_v56 = vunpack.i.h.bf16 %v5404_v44  ;;  %v5405_v57 = vunpack.i.l.bf16 %v5404_v44  ;;  %v1249_v40 = vunpack.c.h.bf16 %v1244_v23 }
  0xaf   : > { %5693 = vrot.lane.b32.xlu1 %v6918_v39, %s8201_s24  ;;  %4839 = vmatprep.subr.bf16.mxu0 %v4838_v51  ;;  %v442_v2 = vsel %vm438_vm4, %v5396_v41, %v5400_v9 }
  0xb0   : > { %4841 = vmatpush1.bf16.msra.mxu0 %v4840_v7  ;;  %v5409_v5 = vpop.permute.xlu0 %5408  ;;  %v4934_v6 = vpack.c.bf16 %v442_v2, %v406_v54  ;;  %v475_v16 = vsel %vm474_vm5, %v5405_v57, %v5406_v56  ;;  %v6979_v51 = vpack.i.bf16 %v1249_v40, %v1248_v37  ;;  %v1286_v57 = vunpack.c.l.bf16 %v6982_v11 }
  0xb1   : > { %v6935_v53 = vpop.permute.xlu1 %5413  ;;  %v5410_v59 = vunpack.i.l.bf16 %v5409_v5  ;;  %v5411_v19 = vunpack.i.h.bf16 %v5409_v5 }
  0xb2   : > { %5698 = vrot.lane.b32.xlu0 %v6706_v28, %s8201_s24  ;;  %4935 = vmatprep.subr.bf16.mxu1 %v4934_v6  ;;  %v5415_v28 = vunpack.i.l.bf16 %v6935_v53  ;;  %s8203_s24 = smov 80  }
  0xb3   : > { %5703 = vrot.lane.b32.xlu1 %v6799_v60, %s8199_s21  ;;  %4937 = vmatpush1.bf16.msra.mxu1 %v4936_v55  ;;  %v476_v20 = vsel %vm474_vm5, %v5406_v56, %v5410_v59  ;;  %v477_v45 = vsel %vm474_vm5, %v5410_v59, %v5411_v19 }
  0xb4   : > { %v5419_v12 = vpop.permute.xlu0 %5418 }
  0xb5   : > { %v5424_v61 = vpop.permute.xlu1 %5423  ;;  %v5421_v13 = vunpack.i.h.bf16 %v5419_v12  ;;  %v5420_v46 = vunpack.i.l.bf16 %v5419_v12 }
  0xb6   : > { %v5425_v0 = vunpack.i.l.bf16 %v5424_v61  ;;  %v5426_v14 = vunpack.i.h.bf16 %v5424_v61  ;;  %5708 = vrot.lane.b32.xlu0 %v6918_v39, %s8199_s21 }
  0xb7   : > { %5713 = vrot.lane.b32.xlu1 %v6724_v35, %s8199_s21  ;;  %v511_v35 = vsel %vm8281_vm6, %v5420_v46, %v5421_v13  ;;  %s8205_s21 = smov 16  }
  0xb8   : > { %v512_v22 = vsel %vm8281_vm6, %v5421_v13, %v5425_v0  ;;  %v6957_v24 = vpop.permute.xlu0 %5428  ;;  %v4844_v27 = vpack.c.bf16 %v511_v35, %v475_v16  ;;  %v513_v36 = vsel %vm8281_vm6, %v5425_v0, %v5426_v14 }
  0xb9   : > { %v5434_v50 = vpop.permute.xlu1 %5433  ;;  %v4842_v25 = vpack.c.bf16 %v512_v22, %v476_v20  ;;  %v5430_v29 = vunpack.i.l.bf16 %v6957_v24  ;;  %v4940_v26 = vpack.c.bf16 %v513_v36, %v477_v45 }
  0xba   : > { %5718 = vrot.lane.b32.xlu0 %v6799_v60, %s8205_s21  ;;  %v5742_v60 = vpack.i.bf16 %v6964_v33, %v1250_v32  ;;  %v5436_v47 = vunpack.i.h.bf16 %v5434_v50  ;;  %v5435_v48 = vunpack.i.l.bf16 %v5434_v50 }
  0xbb   : > { %5723 = vrot.lane.b32.xlu1 %v6918_v39, %s8205_s21  ;;  %4843 = vmatprep.subr.bf16.mxu0 %v4842_v25  ;;  %v478_v39 = vsel %vm474_vm5, %v5411_v19, %v5415_v28  ;;  %v514_v42 = vsel %vm8281_vm6, %v5426_v14, %v5430_v29  ;;  %v1322_v28 = vunpack.c.l.bf16 %v6991_v58  ;;  %v5757_v14 = vpack.i.bf16 %v6964_v33, %v1286_v57 }
  0xbc   : > { %4845 = vmatpush1.bf16.msra.mxu0 %v4844_v27  ;;  %v5439_v43 = vpop.permute.xlu0 %5438  ;;  %v4938_v44 = vpack.c.bf16 %v514_v42, %v478_v39  ;;  %v547_v56 = vsel %vm8280_vm7, %v5435_v48, %v5436_v47 }
  0xbd   : > { %v6970_v41 = vpop.permute.xlu1 %5443  ;;  %v5440_v7 = vunpack.i.l.bf16 %v5439_v43  ;;  %v5441_v59 = vunpack.i.h.bf16 %v5439_v43  ;;  %v5772_v23 = vpack.i.bf16 %v6964_v33, %v1322_v28 }
  0xbe   : > { %5728 = vrot.lane.b32.xlu0 %v5727_v34, %s8205_s21  ;;  %4939 = vmatprep.subr.bf16.mxu1 %v4938_v44  ;;  %v5445_v8 = vunpack.i.l.bf16 %v6970_v41  ;;  %s8207_s21 = smov 76   ;;  %v7016_v34 = vld [vmem:[%s6626_s25 + $0x18] sm:$0xff]  }
  0xbf   : > { %5733 = vrot.lane.b32.xlu1 %v6962_v31, %s8203_s24  ;;  %4941 = vmatpush1.bf16.msra.mxu1 %v4940_v26  ;;  %v548_v63 = vsel %vm8280_vm7, %v5436_v47, %v5440_v7  ;;  %v549_v22 = vsel %vm8280_vm7, %v5440_v7, %v5441_v59  ;;  %v1358_v45 = vunpack.c.l.bf16 %v7016_v34  ;;  %v7025_v26 = vld [vmem:[%s6626_s25 + $0x18] sm:$0xff]  }
  0xc0   : > { %v5449_v2 = vpop.permute.xlu0 %5448  ;;  %v550_v18 = vsel %vm8280_vm7, %v5441_v59, %v5445_v8  ;;  %v1394_v8 = vunpack.c.l.bf16 %v7025_v26 }
  0xc1   : > { %v5454_v9 = vpop.permute.xlu1 %5453  ;;  %v5451_v5 = vunpack.i.h.bf16 %v5449_v2  ;;  %v5450_v6 = vunpack.i.l.bf16 %v5449_v2 }
  0xc2   : > { %v5455_v54 = vunpack.i.l.bf16 %v5454_v9  ;;  %v5456_v55 = vunpack.i.h.bf16 %v5454_v9  ;;  %5738 = vrot.lane.b32.xlu0 %v6979_v51, %s8203_s24 }
  0xc3   : > { %5743 = vrot.lane.b32.xlu1 %v5742_v60, %s8203_s24  ;;  %v583_v12 = vsel %vm8279_vm8, %v5450_v6, %v5451_v5  ;;  %s8209_s24 = smov 78  }
  0xc4   : > { %v584_v0 = vsel %vm8279_vm8, %v5451_v5, %v5455_v54  ;;  %v6996_v13 = vpop.permute.xlu0 %5458  ;;  %v4848_v4 = vpack.c.bf16 %v583_v12, %v547_v56  ;;  %v585_v16 = vsel %vm8279_vm8, %v5455_v54, %v5456_v55 }
  0xc5   : > { %v5464_v61 = vpop.permute.xlu1 %5463  ;;  %v4846_v46 = vpack.c.bf16 %v584_v0, %v548_v63  ;;  %v5460_v10 = vunpack.i.l.bf16 %v6996_v13  ;;  %v4944_v35 = vpack.c.bf16 %v585_v16, %v549_v22 }
  0xc6   : > { %5748 = vrot.lane.b32.xlu0 %v6962_v31, %s8209_s24  ;;  %v5466_v25 = vunpack.i.h.bf16 %v5464_v61  ;;  %v5465_v27 = vunpack.i.l.bf16 %v5464_v61 }
  0xc7   : > { %5753 = vrot.lane.b32.xlu1 %v6979_v51, %s8209_s24  ;;  %4847 = vmatprep.subr.bf16.mxu0 %v4846_v46  ;;  %v586_v19 = vsel %vm8279_vm8, %v5456_v55, %v5460_v10  ;;  %v5787_v55 = vpack.i.bf16 %v6964_v33, %v1358_v45  ;;  %v5802_v10 = vpack.i.bf16 %v6964_v33, %v1394_v8 }
  0xc8   : > { %4849 = vmatpush1.bf16.msra.mxu0 %v4848_v4  ;;  %v5469_v50 = vpop.permute.xlu0 %5468  ;;  %v4942_v20 = vpack.c.bf16 %v586_v19, %v550_v18  ;;  %v619_v44 = vsel %vm8278_vm9, %v5465_v27, %v5466_v25 }
  0xc9   : > { %v7006_v17 = vpop.permute.xlu1 %5473  ;;  %v5470_v29 = vunpack.i.l.bf16 %v5469_v50  ;;  %v5471_v60 = vunpack.i.h.bf16 %v5469_v50  ;;  %v7062_v50 = vld [vmem:[%s6626_s25 + $0x18] sm:$0xff]  }
  0xca   : > { %5758 = vrot.lane.b32.xlu0 %v5757_v14, %s8209_s24  ;;  %4943 = vmatprep.subr.bf16.mxu1 %v4942_v20  ;;  %v5475_v42 = vunpack.i.l.bf16 %v7006_v17  ;;  %s4828_s24 = sshll.u32 %s8462_s13, 5 }
  0xcb   : > { %5763 = vrot.lane.b32.xlu1 %v6962_v31, %s8207_s21  ;;  %4945 = vmatpush1.bf16.msra.mxu1 %v4944_v35  ;;  %v620_v48 = vsel %vm8278_vm9, %v5466_v25, %v5470_v29  ;;  %s7048_s20 = scalar_lea.vmem %s8181_s0, %s4828_s24  ;;  %v621_v12 = vsel %vm8278_vm9, %v5470_v29, %v5471_v60  ;;  %s8228_s24 = smov 4  }
  0xcc   : > { %v5479_v37 = vpop.permute.xlu0 %5478  ;;  %v622_v59 = vsel %vm8278_vm9, %v5471_v60, %v5475_v42  ;;  %v7052_v46 = vld [vmem:[%s7048_s20] sm:$0xff] }
  0xcd   : > { %v5484_v32 = vpop.permute.xlu1 %5483  ;;  %v5481_v40 = vunpack.i.h.bf16 %v5479_v37  ;;  %v5480_v39 = vunpack.i.l.bf16 %v5479_v37  ;;  %v7058_v28 = vunpack.c.h.bf16 %v7052_v46 }
  0xce   : > { %v5485_v36 = vunpack.i.l.bf16 %v5484_v32  ;;  %v5486_v43 = vunpack.i.h.bf16 %v5484_v32  ;;  %5768 = vrot.lane.b32.xlu0 %v6979_v51, %s8207_s21  ;;  %v1430_v32 = vunpack.c.l.bf16 %v7062_v50 }
  0xcf   : > { %5773 = vrot.lane.b32.xlu1 %v5772_v23, %s8207_s21  ;;  %v655_v9 = vsel %vm8277_vm10, %v5480_v39, %v5481_v40  ;;  %s6559_s21 = smov 74   ;;  %2241 = vmatprep.mubr.f32.mxu0 %v7058_v28 }
  0xd0   : > { %v656_v7 = vsel %vm8277_vm10, %v5481_v40, %v5485_v36  ;;  %v7030_v54 = vpop.permute.xlu0 %5488  ;;  %v4852_v5 = vpack.c.bf16 %v655_v9, %v619_v44  ;;  %v657_v56 = vsel %vm8277_vm10, %v5485_v36, %v5486_v43  ;;  %2395 = vmatprep.mubr.f32.mxu1 %v7058_v28  ;;  %v7073_v36 = vld [vmem:[%s6626_s25 + $0x18] sm:$0xff]  }
  0xd1   : > { %v5494_v47 = vpop.permute.xlu1 %5493  ;;  %v4850_v2 = vpack.c.bf16 %v656_v7, %v620_v48  ;;  %v5490_v6 = vunpack.i.l.bf16 %v7030_v54  ;;  %v4948_v4 = vpack.c.bf16 %v657_v56, %v621_v12  ;;  %v1466_v48 = vunpack.c.l.bf16 %v7073_v36 }
  0xd2   : > { %5778 = vrot.lane.b32.xlu0 %v6962_v31, %s6559_s21  ;;  %v5496_v14 = vunpack.i.h.bf16 %v5494_v47  ;;  %v5495_v16 = vunpack.i.l.bf16 %v5494_v47  ;;  %v5817_v7 = vpack.i.bf16 %v6964_v33, %v1430_v32 }
  0xd3   : > { %5783 = vrot.lane.b32.xlu1 %v6979_v51, %s6559_s21  ;;  %4851 = vmatprep.subr.bf16.mxu0 %v4850_v2  ;;  %v658_v61 = vsel %vm8277_vm10, %v5486_v43, %v5490_v6 }
  0xd4   : > { %4853 = vmatpush1.bf16.msra.mxu0 %v4852_v5  ;;  %v5499_v63 = vpop.permute.xlu0 %5498  ;;  %v4946_v0 = vpack.c.bf16 %v658_v61, %v622_v59  ;;  %v691_v29 = vsel %vm690_vm11, %v5495_v16, %v5496_v14  ;;  %v5832_v61 = vpack.i.bf16 %v6964_v33, %v1466_v48  ;;  %v7122_v48 = vld [vmem:[%s6626_s25 + $0x14] sm:$0xff] }
  0xd5   : > { %v7041_v57 = vpop.permute.xlu1 %5503  ;;  %v5500_v18 = vunpack.i.l.bf16 %v5499_v63  ;;  %v5501_v37 = vunpack.i.h.bf16 %v5499_v63 }
  0xd6   : > { %5788 = vrot.lane.b32.xlu0 %v5787_v55, %s6559_s21  ;;  %4947 = vmatprep.subr.bf16.mxu1 %v4946_v0  ;;  %v5505_v25 = vunpack.i.l.bf16 %v7041_v57 }
  0xd7   : > { %5793 = vrot.lane.b32.xlu1 %v6962_v31, %s8239_s19  ;;  %4949 = vmatpush1.bf16.msra.mxu1 %v4948_v4  ;;  %v692_v39 = vsel %vm690_vm11, %v5496_v14, %v5500_v18  ;;  %v693_v56 = vsel %vm690_vm11, %v5500_v18, %v5501_v37 }
  0xd8   : > { %v5509_v22 = vpop.permute.xlu0 %5508  ;;  %v694_v5 = vsel %vm690_vm11, %v5501_v37, %v5505_v25 }
  0xd9   : > { %v5514_v19 = vpop.permute.xlu1 %5513  ;;  %v5511_v35 = vunpack.i.h.bf16 %v5509_v22  ;;  %v5510_v23 = vunpack.i.l.bf16 %v5509_v22 }
  0xda   : > { %v5515_v20 = vunpack.i.l.bf16 %v5514_v19  ;;  %v5516_v27 = vunpack.i.h.bf16 %v5514_v19  ;;  %5798 = vrot.lane.b32.xlu0 %v6979_v51, %s8239_s19 }
  0xdb   : > { %5803 = vrot.lane.b32.xlu1 %v5802_v10, %s8239_s19  ;;  %v727_v43 = vsel %vm8268_vm12, %v5510_v23, %v5511_v35  ;;  %v7098_v10 = vld [vmem:[%s6626_s25 + $0x18] sm:$0xff]  }
  0xdc   : > { %v728_v42 = vsel %vm8268_vm12, %v5511_v35, %v5515_v20  ;;  %v7078_v44 = vpop.permute.xlu0 %5518  ;;  %v4856_v60 = vpack.c.bf16 %v727_v43, %v691_v29  ;;  %v729_v9 = vsel %vm8268_vm12, %v5515_v20, %v5516_v27  ;;  %v1502_v23 = vunpack.c.l.bf16 %v7098_v10 }
  0xdd   : > { %v5524_v40 = vpop.permute.xlu1 %5523  ;;  %v4854_v45 = vpack.c.bf16 %v728_v42, %v692_v39  ;;  %v5520_v47 = vunpack.i.l.bf16 %v7078_v44  ;;  %v4952_v59 = vpack.c.bf16 %v729_v9, %v693_v56 }
  0xde   : > { %5808 = vrot.lane.b32.xlu0 %v6962_v31, %s8237_s22  ;;  %v5526_v63 = vunpack.i.h.bf16 %v5524_v40  ;;  %v5525_v0 = vunpack.i.l.bf16 %v5524_v40 }
  0xdf   : > { %5813 = vrot.lane.b32.xlu1 %v6979_v51, %s8237_s22  ;;  %4855 = vmatprep.subr.bf16.mxu0 %v4854_v45  ;;  %v730_v6 = vsel %vm8268_vm12, %v5516_v27, %v5520_v47  ;;  %v5847_v45 = vpack.i.bf16 %v6964_v33, %v1502_v23  ;;  %v7119_v47 = vld [vmem:[%s6626_s25 + $0x18] sm:$0xff]   ;;  %vm8275_vm12 = vcmask 15360  }
  0xe0   : > { %4857 = vmatpush1.bf16.msra.mxu0 %v4856_v60  ;;  %v5529_v8 = vpop.permute.xlu0 %5528  ;;  %v4950_v55 = vpack.c.bf16 %v730_v6, %v694_v5  ;;  %v763_v35 = vsel %vm8226_vm13, %v5525_v0, %v5526_v63  ;;  %v1538_v56 = vunpack.c.l.bf16 %v7119_v47 }
  0xe1   : > { %v7088_v2 = vpop.permute.xlu1 %5533  ;;  %v5530_v12 = vunpack.i.l.bf16 %v5529_v8  ;;  %v5531_v25 = vunpack.i.h.bf16 %v5529_v8 }
  0xe2   : > { %5818 = vrot.lane.b32.xlu0 %v5817_v7, %s8237_s22  ;;  %4951 = vmatprep.subr.bf16.mxu1 %v4950_v55  ;;  %v5535_v20 = vunpack.i.l.bf16 %v7088_v2  ;;  %s8304_s22 = smov 94  }
  0xe3   : > { %5823 = vrot.lane.b32.xlu1 %v6962_v31, %s8219_s23  ;;  %4953 = vmatpush1.bf16.msra.mxu1 %v4952_v59  ;;  %v764_v29 = vsel %vm8226_vm13, %v5526_v63, %v5530_v12  ;;  %v765_v55 = vsel %vm8226_vm13, %v5530_v12, %v5531_v25  ;;  %v7133_v59 = vunpack.c.h.bf16 %v7122_v48 }
  0xe4   : > { %v5539_v16 = vpop.permute.xlu0 %5538  ;;  %v766_v9 = vsel %vm8226_vm13, %v5531_v25, %v5535_v20  ;;  %v1619_v20 = vunpack.c.h.bf16 %v6991_v58  ;;  %vm8231_vm13 = vcmask 752640  }
  0xe5   : > { %v5544_v4 = vpop.permute.xlu1 %5543  ;;  %v5541_v18 = vunpack.i.h.bf16 %v5539_v16  ;;  %v5540_v19 = vunpack.i.l.bf16 %v5539_v16 }
  0xe6   : > { %v5545_v14 = vunpack.i.l.bf16 %v5544_v4  ;;  %v5546_v22 = vunpack.i.h.bf16 %v5544_v4  ;;  %5828 = vrot.lane.b32.xlu0 %v6979_v51, %s8219_s23  ;;  %v1582_v4 = vunpack.c.l.bf16 %v7122_v48 }
  0xe7   : > { %5833 = vrot.lane.b32.xlu1 %v5832_v61, %s8219_s23  ;;  %v799_v37 = vsel %vm8221_vm14, %v5540_v19, %v5541_v18  ;;  %s8224_s23 = smov 2   ;;  %v1584_v61 = vunpack.c.h.bf16 %v6982_v11 }
  0xe8   : > { %v800_v32 = vsel %vm8221_vm14, %v5541_v18, %v5545_v14  ;;  %v7109_v40 = vpop.permute.xlu0 %5548  ;;  %v4860_v42 = vpack.c.bf16 %v799_v37, %v763_v35  ;;  %v801_v60 = vsel %vm8221_vm14, %v5545_v14, %v5546_v22  ;;  %v7148_v23 = vpack.i.bf16 %v1582_v4, %v1581_v62 }
  0xe9   : > { %v5554_v27 = vpop.permute.xlu1 %5553  ;;  %v4858_v39 = vpack.c.bf16 %v800_v32, %v764_v29  ;;  %v5550_v43 = vunpack.i.l.bf16 %v7109_v40  ;;  %v4956_v33 = vpack.c.bf16 %v801_v60, %v765_v55  ;;  %v5867_v11 = vpack.i.bf16 %v1584_v61, %v7133_v59 }
  0xea   : > { %5838 = vrot.lane.b32.xlu0 %v6962_v31, %s8228_s24  ;;  %v5556_v63 = vunpack.i.h.bf16 %v5554_v27  ;;  %v5555_v0 = vunpack.i.l.bf16 %v5554_v27  ;;  %v5877_v62 = vpack.i.bf16 %v1619_v20, %v7133_v59 }
  0xeb   : > { %5843 = vrot.lane.b32.xlu1 %v6979_v51, %s8228_s24  ;;  %4859 = vmatprep.subr.bf16.mxu0 %v4858_v39  ;;  %v802_v5 = vsel %vm8221_vm14, %v5546_v22, %v5550_v43  ;;  %vm8222_vm14 = vcmask 801792   ;;  %v1654_v43 = vunpack.c.h.bf16 %v7016_v34 }
  0xec   : > { %4861 = vmatpush1.bf16.msra.mxu0 %v4860_v42  ;;  %v5559_v6 = vpop.permute.xlu0 %5558  ;;  %v4954_v8 = vpack.c.bf16 %v802_v5, %v766_v9  ;;  %v835_v25 = vsel %vm8223_vm15, %v5555_v0, %v5556_v63  ;;  %v1717_v0 = vld [vmem:[%s6626_s25 + $0xc] sm:$0xff] }
  0xed   : > { %v7124_v7 = vpop.permute.xlu1 %5563  ;;  %v5560_v12 = vunpack.i.l.bf16 %v5559_v6  ;;  %v5561_v27 = vunpack.i.h.bf16 %v5559_v6 }
  0xee   : > { %5848 = vrot.lane.b32.xlu0 %v5847_v45, %s8228_s24  ;;  %4955 = vmatprep.subr.bf16.mxu1 %v4954_v8  ;;  %v5565_v22 = vunpack.i.l.bf16 %v7124_v7  ;;  %s8232_s24 = smov 54  }
  0xef   : > { %5853 = vrot.lane.b32.xlu1 %v6962_v31, %s8224_s23  ;;  %4957 = vmatpush1.bf16.msra.mxu1 %v4956_v33  ;;  %v836_v32 = vsel %vm8223_vm15, %v5556_v63, %v5560_v12  ;;  %v837_v55 = vsel %vm8223_vm15, %v5560_v12, %v5561_v27  ;;  %v5887_v33 = vpack.i.bf16 %v1654_v43, %v7133_v59 }
  0xf0   : > { %v5569_v16 = vpop.permute.xlu0 %5568  ;;  %v838_v9 = vsel %vm8223_vm15, %v5561_v27, %v5565_v22  ;;  %vm8227_vm15 = vcmask 769024   ;;  %v5907_v43 = vpack.i.bf16 %v7133_v59, %v1582_v4 }
  0xf1   : > { %v5574_v14 = vpop.permute.xlu1 %5573  ;;  %v5571_v18 = vunpack.i.h.bf16 %v5569_v16  ;;  %v5570_v19 = vunpack.i.l.bf16 %v5569_v16 }
  0xf2   : > { %v5575_v31 = vunpack.i.l.bf16 %v5574_v14  ;;  %v5576_v35 = vunpack.i.h.bf16 %v5574_v14  ;;  %5858 = vrot.lane.b32.xlu0 %v6979_v51, %s8224_s23 }
  0xf3   : > { %1552 = vrot.lane.b32.xlu1 %v1538_v56, %s8224_s23  ;;  %v871_v37 = vsel %vm8222_vm14, %v5570_v19, %v5571_v18  ;;  %v1689_v56 = vunpack.c.h.bf16 %v7025_v26  ;;  %s8235_s23 = smov 56  }
  0xf4   : > { %v872_v58 = vsel %vm8222_vm14, %v5571_v18, %v5575_v31  ;;  %v7154_v39 = vpop.permute.xlu0 %5578  ;;  %v4864_v51 = vpack.c.bf16 %v871_v37, %v835_v25  ;;  %v873_v45 = vsel %vm8222_vm14, %v5575_v31, %v5576_v35  ;;  %v1721_v25 = vunpack.c.h.bf16 %v1717_v0 }
  0xf5   : > { %v5584_v29 = vpop.permute.xlu1 %5583  ;;  %v4862_v42 = vpack.c.bf16 %v872_v58, %v836_v32  ;;  %v5580_v1 = vunpack.i.l.bf16 %v7154_v39  ;;  %v4960_v34 = vpack.c.bf16 %v873_v45, %v837_v55  ;;  %v5897_v26 = vpack.i.bf16 %v1689_v56, %v7133_v59 }
  0xf6   : > { %5863 = vrot.lane.b32.xlu0 %v7148_v23, %s6528_s26  ;;  %v5586_v61 = vunpack.i.h.bf16 %v5584_v29  ;;  %v5585_v63 = vunpack.i.l.bf16 %v5584_v29 }
  0xf7   : > { %5868 = vrot.lane.b32.xlu1 %v5867_v11, %s6528_s26  ;;  %4863 = vmatprep.subr.bf16.mxu0 %v4862_v42  ;;  %v874_v5 = vsel %vm8222_vm14, %v5576_v35, %v5580_v1  ;;  %vm8246_vm14 = vcmask 785408   ;;  %v1720_v11 = vunpack.c.l.bf16 %v1717_v0 }
  0xf8   : > { %4865 = vmatpush1.bf16.msra.mxu0 %v4864_v51  ;;  %v5589_v6 = vpop.permute.xlu0 %5588  ;;  %v4958_v8 = vpack.c.bf16 %v874_v5, %v838_v9  ;;  %v907_v35 = vsel %vm8246_vm14, %v5585_v63, %v5586_v61 }
  0xf9   : > { %v7163_v60 = vpop.permute.xlu1 %5593  ;;  %v5590_v14 = vunpack.i.l.bf16 %v5589_v6  ;;  %v5591_v27 = vunpack.i.h.bf16 %v5589_v6  ;;  %v5902_v45 = vpack.i.bf16 %v1721_v25, %v1720_v11 }
  0xfa   : > { %5873 = vrot.lane.b32.xlu0 %v7148_v23, %s6529_s27  ;;  %4959 = vmatprep.subr.bf16.mxu1 %v4958_v8  ;;  %v5595_v20 = vunpack.i.l.bf16 %v7163_v60 }
  0xfb   : > { %5878 = vrot.lane.b32.xlu1 %v5877_v62, %s6529_s27  ;;  %4961 = vmatpush1.bf16.msra.mxu1 %v4960_v34  ;;  %v908_v32 = vsel %vm8246_vm14, %v5586_v61, %v5590_v14  ;;  %v909_v48 = vsel %vm8246_vm14, %v5590_v14, %v5591_v27  ;;  %v1724_v61 = vunpack.c.h.bf16 %v7062_v50 }
  0xfc   : > { %v5599_v12 = vpop.permute.xlu0 %5598  ;;  %v910_v6 = vsel %vm8246_vm14, %v5591_v27, %v5595_v20  ;;  %vm8249_vm14 = vcmask 621568  }
  0xfd   : > { %v5604_v31 = vpop.permute.xlu1 %5603  ;;  %v5601_v18 = vunpack.i.h.bf16 %v5599_v12  ;;  %v5600_v19 = vunpack.i.l.bf16 %v5599_v12 }
  0xfe   : > { %v5605_v16 = vunpack.i.l.bf16 %v5604_v31  ;;  %v5606_v22 = vunpack.i.h.bf16 %v5604_v31  ;;  %5883 = vrot.lane.b32.xlu0 %v7148_v23, %s6530_s28 }
  0xff   : > { %5888 = vrot.lane.b32.xlu1 %v5887_v33, %s6530_s28  ;;  %v943_v37 = vsel %vm8227_vm15, %v5600_v19, %v5601_v18  ;;  %v1796_v19 = vunpack.c.h.bf16 %v7098_v10 }
 0x100   : > { %v944_v58 = vsel %vm8227_vm15, %v5601_v18, %v5605_v16  ;;  %v7183_v42 = vpop.permute.xlu0 %5608  ;;  %v4868_v1 = vpack.c.bf16 %v943_v37, %v907_v35  ;;  %v945_v9 = vsel %vm8227_vm15, %v5605_v16, %v5606_v22  ;;  %v1760_v18 = vunpack.c.h.bf16 %v7073_v36 }
 0x101   : > { %v5614_v29 = vpop.permute.xlu1 %5613  ;;  %v4866_v51 = vpack.c.bf16 %v944_v58, %v908_v32  ;;  %v5610_v62 = vunpack.i.l.bf16 %v7183_v42  ;;  %v4964_v4 = vpack.c.bf16 %v945_v9, %v909_v48  ;;  %v5927_v58 = vpack.i.bf16 %v1796_v19, %v7133_v59 }
 0x102   : > { %5893 = vrot.lane.b32.xlu0 %v7148_v23, %s6531_s29  ;;  %v5616_v33 = vunpack.i.h.bf16 %v5614_v29  ;;  %v5615_v56 = vunpack.i.l.bf16 %v5614_v29  ;;  %v1831_v37 = vunpack.c.h.bf16 %v7119_v47 }
 0x103   : > { %5898 = vrot.lane.b32.xlu1 %v5897_v26, %s6531_s29  ;;  %4867 = vmatprep.subr.bf16.mxu0 %v4866_v51  ;;  %v946_v8 = vsel %vm8227_vm15, %v5606_v22, %v5610_v62  ;;  %vm8230_vm15 = vcmask 228352  }
 0x104   : > { %4869 = vmatpush1.bf16.msra.mxu0 %v4868_v1  ;;  %v5619_v55 = vpop.permute.xlu0 %5618  ;;  %v4962_v34 = vpack.c.bf16 %v946_v8, %v910_v6  ;;  %v979_v50 = vsel %vm8231_vm13, %v5615_v56, %v5616_v33  ;;  %v7219_v1 = vld [vmem:[%s6626_s25 + $0x1c] sm:$0xff]  }
 0x105   : > { %v7193_v5 = vpop.permute.xlu1 %5623  ;;  %v5620_v63 = vunpack.i.l.bf16 %v5619_v55  ;;  %v5621_v20 = vunpack.i.h.bf16 %v5619_v55 }
 0x106   : > { %5903 = vrot.lane.b32.xlu0 %v5902_v45, %s8235_s23  ;;  %4963 = vmatprep.subr.bf16.mxu1 %v4962_v34  ;;  %v5625_v26 = vunpack.i.l.bf16 %v7193_v5  ;;  %v1866_v34 = vunpack.c.l.bf16 %v7219_v1 }
 0x107   : > { %5908 = vrot.lane.b32.xlu1 %v5907_v43, %s8235_s23  ;;  %4965 = vmatpush1.bf16.msra.mxu1 %v4964_v4  ;;  %v980_v35 = vsel %vm8231_vm13, %v5616_v33, %v5620_v63  ;;  %v981_v55 = vsel %vm8231_vm13, %v5620_v63, %v5621_v20  ;;  %v7232_v33 = vld [vmem:[%s6626_s25 + $0x1c] sm:$0xff]  }
 0x108   : > { %v5629_v16 = vpop.permute.xlu0 %5628 }
 0x109   : > { %v5634_v0 = vpop.permute.xlu1 %5633  ;;  %v5631_v12 = vunpack.i.h.bf16 %v5629_v16  ;;  %v5630_v14 = vunpack.i.l.bf16 %v5629_v16 }
 0x10a   : > { %v5635_v31 = vunpack.i.l.bf16 %v5634_v0  ;;  %v5636_v11 = vunpack.i.h.bf16 %v5634_v0  ;;  %1738 = vrot.lane.b32.xlu0 %v1724_v61, %s8235_s23  ;;  %s8305_s23 = smov 92  }
 0x10b   : > { %5913 = vrot.lane.b32.xlu1 %v5902_v45, %s8232_s24  ;;  %v1015_v27 = vsel %vm8230_vm15, %v5630_v14, %v5631_v12  ;;  %v982_v45 = vsel %vm8231_vm13, %v5621_v20, %v5625_v26  ;;  %vm8234_vm13 = vcmask 195584   ;;  %v1901_v14 = vunpack.c.l.bf16 %v7232_v33 }
 0x10c   : > { %v1016_v25 = vsel %vm8230_vm15, %v5631_v12, %v5635_v31  ;;  %v7210_v29 = vpop.permute.xlu0 %5638  ;;  %v4872_v10 = vpack.c.bf16 %v1015_v27, %v979_v50  ;;  %v1017_v51 = vsel %vm8230_vm15, %v5635_v31, %v5636_v11  ;;  %v5947_v12 = vpack.i.bf16 %v1866_v34, %v7133_v59 }
 0x10d   : > { %v5644_v22 = vpop.permute.xlu1 %5643  ;;  %v4870_v36 = vpack.c.bf16 %v1016_v25, %v980_v35  ;;  %v5640_v32 = vunpack.i.l.bf16 %v7210_v29  ;;  %v4968_v47 = vpack.c.bf16 %v1017_v51, %v981_v55 }
 0x10e   : > { %5918 = vrot.lane.b32.xlu0 %v5907_v43, %s8232_s24  ;;  %v5937_v43 = vpack.i.bf16 %v1831_v37, %v7133_v59  ;;  %v5646_v48 = vunpack.i.h.bf16 %v5644_v22  ;;  %v5645_v4 = vunpack.i.l.bf16 %v5644_v22 }
 0x10f   : > { %1774 = vrot.lane.b32.xlu1 %v1760_v18, %s8232_s24  ;;  %4871 = vmatprep.subr.bf16.mxu0 %v4870_v36  ;;  %v1018_v9 = vsel %vm8230_vm15, %v5636_v11, %v5640_v32  ;;  %vm8241_vm15 = vcmask 211968   ;;  %v7242_v11 = vld [vmem:[%s6626_s25 + $0x1c] sm:$0xff]   ;;  %s4829_s24 = sshll.u32 %s8462_s13, 4 }
 0x110   : > { %4873 = vmatpush1.bf16.msra.mxu0 %v4872_v10  ;;  %v5649_v6 = vpop.permute.xlu0 %5648  ;;  %v4966_v8 = vpack.c.bf16 %v1018_v9, %v982_v45  ;;  %v1051_v26 = vsel %vm8241_vm15, %v5645_v4, %v5646_v48  ;;  %v1936_v37 = vunpack.c.l.bf16 %v7242_v11  ;;  %s228_s19 = scalar_lea.vmem %s8182_s1, %s4829_s24 }
 0x111   : > { %v7221_v62 = vpop.permute.xlu1 %5653  ;;  %v5650_v56 = vunpack.i.l.bf16 %v5649_v6  ;;  %v5651_v50 = vunpack.i.h.bf16 %v5649_v6 }
 0x112   : > { %5923 = vrot.lane.b32.xlu0 %v7148_v23, %s6534_s5  ;;  %4967 = vmatprep.subr.bf16.mxu1 %v4966_v8  ;;  %v5655_v18 = vunpack.i.l.bf16 %v7221_v62  ;;  %v5967_v34 = vpack.i.bf16 %v1936_v37, %v7133_v59  ;;  %v259_v37 = vld [vmem:[%s228_s19] sm:$0xff] }
 0x113   : > { %5928 = vrot.lane.b32.xlu1 %v5927_v58, %s6534_s5  ;;  %4969 = vmatpush1.bf16.msra.mxu1 %v4968_v47  ;;  %v1052_v22 = vsel %vm8241_vm15, %v5646_v48, %v5650_v56  ;;  %v5957_v58 = vpack.i.bf16 %v1901_v14, %v7133_v59  ;;  %v1053_v47 = vsel %vm8241_vm15, %v5650_v56, %v5651_v50  ;;  %v2511_v48 = vld [vmem:[%s6626_s25 + $0x10] sm:$0xff] }
 0x114   : > { %v5659_v0 = vpop.permute.xlu0 %5658  ;;  %v1054_v9 = vsel %vm8241_vm15, %v5651_v50, %v5655_v18  ;;  %vm8242_vm15 = vcmask 162816   ;;  %v2515_v18 = vunpack.c.h.bf16 %v2511_v48 }
 0x115   : > { %v5664_v61 = vpop.permute.xlu1 %5663  ;;  %v5661_v31 = vunpack.i.h.bf16 %v5659_v0  ;;  %v5660_v16 = vunpack.i.l.bf16 %v5659_v0 }
 0x116   : > { %v5665_v63 = vunpack.i.l.bf16 %v5664_v61  ;;  %v5666_v19 = vunpack.i.h.bf16 %v5664_v61  ;;  %5933 = vrot.lane.b32.xlu0 %v7148_v23, %s6535_s6 }
 0x117   : > { %5938 = vrot.lane.b32.xlu1 %v5937_v43, %s6535_s6  ;;  %v1087_v25 = vsel %vm8234_vm13, %v5660_v16, %v5661_v31  ;;  %v2514_v16 = vunpack.c.l.bf16 %v2511_v48 }
 0x118   : > { %v1088_v35 = vsel %vm8234_vm13, %v5661_v31, %v5665_v63  ;;  %v7247_v27 = vpop.permute.xlu0 %5668  ;;  %v4876_v10 = vpack.c.bf16 %v1087_v25, %v1051_v26  ;;  %v1089_v51 = vsel %vm8234_vm13, %v5665_v63, %v5666_v19  ;;  %v7268_v63 = vld [vmem:[%s6626_s25 + $0x18] sm:$0xff] }
 0x119   : > { %v5674_v20 = vpop.permute.xlu1 %5673  ;;  %8282 = vst [vmem:[#allocation3_spill] sm:$0xff] %v7247_v27  ;;  %v4874_v36 = vpack.c.bf16 %v1088_v35, %v1052_v22  ;;  %v5670_v32 = vunpack.i.l.bf16 %v7247_v27  ;;  %v4972_v43 = vpack.c.bf16 %v1089_v51, %v1053_v47  ;;  %v7282_v35 = vunpack.c.h.bf16 %v7268_v63  ;;  %v7285_v25 = vld [vmem:[%s6626_s25 + $0x1c] sm:$0xff] }
 0x11a   : > { %5943 = vrot.lane.b32.xlu0 %v7148_v23, %s6536_s7  ;;  %v5676_v4 = vunpack.i.h.bf16 %v5674_v20  ;;  %v5675_v61 = vunpack.i.l.bf16 %v5674_v20  ;;  %v260_v20 = vld [vmem:[%s228_s19 + $0x8] sm:$0xff]  ;;  %v7293_v47 = vpack.i.bf16 %v2515_v18, %v2514_v16  ;;  %s8303_s19 = smov 96  }
 0x11b   : > { %5948 = vrot.lane.b32.xlu1 %v5947_v12, %s6536_s7  ;;  %4875 = vmatprep.subr.bf16.mxu0 %v4874_v36  ;;  %v1090_v6 = vsel %vm8234_vm13, %v5666_v19, %v5670_v32  ;;  %vm8243_vm13 = vcmask 179200   ;;  %v2516_v19 = vunpack.c.l.bf16 %v7268_v63 }
 0x11c   : > { %4877 = vmatpush1.bf16.msra.mxu0 %v4876_v10  ;;  %v5679_v8 = vpop.permute.xlu0 %5678  ;;  %v4970_v55 = vpack.c.bf16 %v1090_v6, %v1054_v9  ;;  %v1123_v22 = vsel %vm8243_vm13, %v5675_v61, %v5676_v4 }
 0x11d   : > { %v7256_v45 = vpop.permute.xlu1 %5683  ;;  %v5680_v0 = vunpack.i.l.bf16 %v5679_v8  ;;  %v5681_v36 = vunpack.i.h.bf16 %v5679_v8  ;;  %v7297_v8 = vunpack.c.h.bf16 %v7285_v25  ;;  %v7303_v48 = vpack.i.bf16 %v7282_v35, %v2516_v19 }
 0x11e   : > { %8283 = vst [vmem:[#allocation4_spill] sm:$0xff] %v7256_v45  ;;  %5953 = vrot.lane.b32.xlu0 %v7148_v23, %s6537_s8  ;;  %4971 = vmatprep.subr.bf16.mxu1 %v4970_v55  ;;  %v5685_v26 = vunpack.i.l.bf16 %v7256_v45 }
 0x11f   : > { %5958 = vrot.lane.b32.xlu1 %v5957_v58, %s6537_s8  ;;  %4973 = vmatpush1.bf16.msra.mxu1 %v4972_v43  ;;  %v1124_v32 = vsel %vm8243_vm13, %v5676_v4, %v5680_v0  ;;  %v2518_v43 = vunpack.c.h.bf16 %v7219_v1  ;;  %v1125_v16 = vsel %vm8243_vm13, %v5680_v0, %v5681_v36 }
 0x120   : > { %v5689_v56 = vpop.permute.xlu0 %5688  ;;  %v1126_v61 = vsel %vm8243_vm13, %v5681_v36, %v5685_v26  ;;  %v2553_v26 = vunpack.c.h.bf16 %v7232_v33  ;;  %vm8244_vm13 = vcmask 130048  }
 0x121   : > { %v5694_v31 = vpop.permute.xlu1 %5693  ;;  %v5691_v12 = vunpack.i.h.bf16 %v5689_v56  ;;  %v5690_v14 = vunpack.i.l.bf16 %v5689_v56 }
 0x122   : > { %v5695_v59 = vunpack.i.l.bf16 %v5694_v31  ;;  %v5696_v50 = vunpack.i.h.bf16 %v5694_v31  ;;  %5963 = vrot.lane.b32.xlu0 %v7148_v23, %s6538_s9  ;;  %v5999_v33 = vpack.i.bf16 %v7297_v8, %v2553_v26 }
 0x123   : > { %5968 = vrot.lane.b32.xlu1 %v5967_v34, %s6538_s9  ;;  %v1159_v51 = vsel %vm8242_vm15, %v5690_v14, %v5691_v12 }
 0x124   : > { %v1160_v58 = vsel %vm8242_vm15, %v5691_v12, %v5695_v59  ;;  %v7290_v9 = vpop.permute.xlu0 %5698  ;;  %v4880_v6 = vpack.c.bf16 %v1159_v51, %v1123_v22  ;;  %v1161_v34 = vsel %vm8242_vm15, %v5695_v59, %v5696_v50  ;;  %v5984_v59 = vpack.i.bf16 %v7297_v8, %v2518_v43 }
 0x125   : > { %v5704_v10 = vpop.permute.xlu1 %5703  ;;  %8284 = vst [vmem:[#allocation5_spill] sm:$0xff] %v7290_v9  ;;  %v4878_v23 = vpack.c.bf16 %v1160_v58, %v1124_v32  ;;  %v5700_v55 = vunpack.i.l.bf16 %v7290_v9  ;;  %v4976_v12 = vpack.c.bf16 %v1161_v34, %v1125_v16 }
 0x126   : > { %2162 = vperm.xlu0 %5972, %v259_v37   ;;  %v5706_v14 = vunpack.i.h.bf16 %v5704_v10  ;;  %v5705_v18 = vunpack.i.l.bf16 %v5704_v10 }
 0x127   : > { %2167 = vperm.xlu1 %5973, %v260_v20   ;;  %4879 = vmatprep.subr.bf16.mxu0 %v4878_v23  ;;  %v1162_v31 = vsel %vm8242_vm15, %v5696_v50, %v5700_v55  ;;  %vm8245_vm15 = vcmask 146432  }
 0x128   : > { %4881 = vmatpush1.bf16.msra.mxu0 %v4880_v6  ;;  %v5709_v1 = vpop.permute.xlu0 %5708  ;;  %v4974_v56 = vpack.c.bf16 %v1162_v31, %v1126_v61  ;;  %v1195_v37 = vsel %vm8245_vm15, %v5705_v18, %v5706_v14 }
 0x129   : > { %v7305_v4 = vpop.permute.xlu1 %5713  ;;  %v5710_v20 = vunpack.i.l.bf16 %v5709_v1  ;;  %v5711_v51 = vunpack.i.h.bf16 %v5709_v1 }
 0x12a   : > { %8285 = vst [vmem:[#allocation6_spill] sm:$0xff] %v7305_v4  ;;  %4975 = vmatprep.subr.bf16.mxu1 %v4974_v56  ;;  %5980 = vrot.lane.b32.xlu0 %v7303_v48, %s6528_s26  ;;  %v5715_v58 = vunpack.i.l.bf16 %v7305_v4  ;;  %v7493_v4 = vld [vmem:[%s6626_s25 + $0x20] sm:$0xff]  }
 0x12b   : > { %5975 = vrot.lane.b32.xlu1 %v7293_v47, %s6528_s26  ;;  %4977 = vmatpush1.bf16.msra.mxu1 %v4976_v12  ;;  %v1196_v6 = vsel %vm8245_vm15, %v5706_v14, %v5710_v20  ;;  %v1197_v26 = vsel %vm8245_vm15, %v5710_v20, %v5711_v51 }
 0x12c   : > { %v5719_v0 = vpop.permute.xlu0 %5718  ;;  %v1198_v12 = vsel %vm8245_vm15, %v5711_v51, %v5715_v58  ;;  %vm8247_vm15 = vcmask 637952  }
 0x12d   : > { %v5724_v50 = vpop.permute.xlu1 %5723  ;;  %v5721_v36 = vunpack.i.h.bf16 %v5719_v0  ;;  %v5720_v32 = vunpack.i.l.bf16 %v5719_v0 }
 0x12e   : > { %v5725_v22 = vunpack.i.l.bf16 %v5724_v50  ;;  %v5726_v10 = vunpack.i.h.bf16 %v5724_v50  ;;  %5990 = vrot.lane.b32.xlu0 %v7293_v47, %s6529_s27 }
 0x12f   : > { %5985 = vrot.lane.b32.xlu1 %v5984_v59, %s6528_s26  ;;  %v1231_v43 = vsel %vm8244_vm13, %v5720_v32, %v5721_v36  ;;  %v7343_v32 = vld [vmem:[%s6626_s25 + $0x20] sm:$0xff]  }
 0x130   : > { %v1232_v55 = vsel %vm8244_vm13, %v5721_v36, %v5725_v22  ;;  %v7325_v34 = vpop.permute.xlu0 %5728  ;;  %v4884_v31 = vpack.c.bf16 %v1231_v43, %v1195_v37  ;;  %v1233_v16 = vsel %vm8244_vm13, %v5725_v22, %v5726_v10  ;;  %v2588_v22 = vunpack.c.h.bf16 %v7242_v11  ;;  %v7346_v37 = vld [vmem:[%s6626_s25 + $0x20] sm:$0xff]  }
 0x131   : > { %v5734_v23 = vpop.permute.xlu1 %5733  ;;  %8286 = vst [vmem:[#allocation7_spill] sm:$0xff] %v7325_v34  ;;  %v4882_v61 = vpack.c.bf16 %v1232_v55, %v1196_v6  ;;  %v5730_v56 = vunpack.i.l.bf16 %v7325_v34  ;;  %v4980_v50 = vpack.c.bf16 %v1233_v16, %v1197_v26 }
 0x132   : > { %6000 = vrot.lane.b32.xlu0 %v5999_v33, %s6529_s27  ;;  %v5736_v0 = vunpack.i.h.bf16 %v5734_v23  ;;  %v5735_v36 = vunpack.i.l.bf16 %v5734_v23  ;;  %v2623_v23 = vunpack.c.l.bf16 %v7343_v32 }
 0x133   : > { %5995 = vrot.lane.b32.xlu1 %v7303_v48, %s6529_s27  ;;  %4883 = vmatprep.subr.bf16.mxu0 %v4882_v61  ;;  %v1234_v59 = vsel %vm8244_vm13, %v5726_v10, %v5730_v56  ;;  %vm8250_vm13 = vcmask 654336   ;;  %v2658_v61 = vunpack.c.l.bf16 %v7346_v37 }
 0x134   : > { %4885 = vmatpush1.bf16.msra.mxu0 %v4884_v31  ;;  %v5739_v14 = vpop.permute.xlu0 %5738  ;;  %v4978_v18 = vpack.c.bf16 %v1234_v59, %v1198_v12  ;;  %v1267_v43 = vsel %vm8250_vm13, %v5735_v36, %v5736_v0 }
 0x135   : > { %v7332_v1 = vpop.permute.xlu1 %5743  ;;  %v5740_v58 = vunpack.i.l.bf16 %v5739_v14  ;;  %v5741_v31 = vunpack.i.h.bf16 %v5739_v14  ;;  %v6024_v14 = vpack.i.bf16 %v2516_v19, %v6780_v52 }
 0x136   : > { %8287 = vst [vmem:[#allocation8_spill] sm:$0xff] %v7332_v1  ;;  %4979 = vmatprep.subr.bf16.mxu1 %v4978_v18  ;;  %6010 = vrot.lane.b32.xlu0 %v7303_v48, %s6530_s28  ;;  %v5745_v6 = vunpack.i.l.bf16 %v7332_v1  ;;  %v7359_v18 = vld [vmem:[%s6626_s25 + $0x20] sm:$0xff]  }
 0x137   : > { %6005 = vrot.lane.b32.xlu1 %v7293_v47, %s6530_s28  ;;  %4981 = vmatpush1.bf16.msra.mxu1 %v4980_v50  ;;  %v1268_v16 = vsel %vm8250_vm13, %v5736_v0, %v5740_v58  ;;  %v1269_v52 = vsel %vm8250_vm13, %v5740_v58, %v5741_v31 }
 0x138   : > { %v5749_v33 = vpop.permute.xlu0 %5748 }
 0x139   : > { %v5754_v10 = vpop.permute.xlu1 %5753  ;;  %v5751_v51 = vunpack.i.h.bf16 %v5749_v33  ;;  %v5750_v11 = vunpack.i.l.bf16 %v5749_v33  ;;  %v2693_v33 = vunpack.c.l.bf16 %v7359_v18 }
 0x13a   : > { %v5755_v20 = vunpack.i.l.bf16 %v5754_v10  ;;  %v5756_v55 = vunpack.i.h.bf16 %v5754_v10  ;;  %6015 = vrot.lane.b32.xlu0 %v7293_v47, %s6531_s29  ;;  %v6029_v10 = vpack.i.bf16 %v2658_v61, %v7282_v35 }
 0x13b   : > { %2602 = vrot.lane.b32.xlu1 %v2588_v22, %s6530_s28  ;;  %v1303_v59 = vsel %vm8247_vm15, %v5750_v11, %v5751_v51  ;;  %v1270_v11 = vsel %vm8250_vm13, %v5741_v31, %v5745_v6  ;;  %vm2170_vm13 = vcmask 64512  }
 0x13c   : > { %v1304_v12 = vsel %vm8247_vm15, %v5751_v51, %v5755_v20  ;;  %v7361_v26 = vpop.permute.xlu0 %5758  ;;  %v4888_v22 = vpack.c.bf16 %v1303_v59, %v1267_v43  ;;  %v1305_v0 = vsel %vm8247_vm15, %v5755_v20, %v5756_v55 }
 0x13d   : > { %v5764_v56 = vpop.permute.xlu1 %5763  ;;  %8288 = vst [vmem:[#allocation9_spill] sm:$0xff] %v7361_v26  ;;  %v4886_v50 = vpack.c.bf16 %v1304_v12, %v1268_v16  ;;  %v5760_v36 = vunpack.i.l.bf16 %v7361_v26  ;;  %v4984_v63 = vpack.c.bf16 %v1305_v0, %v1269_v52 }
 0x13e   : > { %2637 = vrot.lane.b32.xlu0 %v2623_v23, %s6531_s29  ;;  %v5766_v19 = vunpack.i.h.bf16 %v5764_v56  ;;  %v5765_v20 = vunpack.i.l.bf16 %v5764_v56  ;;  %v6039_v23 = vpack.i.bf16 %v2693_v33, %v7282_v35  ;;  %v7386_v35 = vld [vmem:[%s6626_s25 + $0x20] sm:$0xff]  }
 0x13f   : > { %6020 = vrot.lane.b32.xlu1 %v7303_v48, %s6531_s29  ;;  %4887 = vmatprep.subr.bf16.mxu0 %v4886_v50  ;;  %v1306_v43 = vsel %vm8247_vm15, %v5756_v55, %v5760_v36  ;;  %vm8248_vm15 = vcmask 605184  }
 0x140   : > { %4889 = vmatpush1.bf16.msra.mxu0 %v4888_v22  ;;  %v5769_v16 = vpop.permute.xlu0 %5768  ;;  %v4982_v12 = vpack.c.bf16 %v1306_v43, %v1270_v11  ;;  %v1339_v22 = vsel %vm8249_vm14, %v5765_v20, %v5766_v19  ;;  %v7402_v20 = vunpack.c.l.bf16 %v7052_v46  ;;  %v7416_v46 = vld [vmem:[%s7048_s20 + $0x8] sm:$0xff] }
 0x141   : > { %v7373_v51 = vpop.permute.xlu1 %5773  ;;  %v5770_v61 = vunpack.i.l.bf16 %v5769_v16  ;;  %v5771_v36 = vunpack.i.h.bf16 %v5769_v16  ;;  %v249_v16 = vld [vmem:[%s7048_s20 + $0x10] sm:$0xff] }
 0x142   : > { %8289 = vst [vmem:[#allocation10_spill] sm:$0xff] %v7373_v51  ;;  %4983 = vmatprep.subr.bf16.mxu1 %v4982_v12  ;;  %6030 = vrot.lane.b32.xlu0 %v6029_v10, %s6532_s30  ;;  %v5775_v31 = vunpack.i.l.bf16 %v7373_v51  ;;  %8291 = vst [vmem:[#allocation12_spill] sm:$0xff] %v7402_v20 }
 0x143   : > { %6025 = vrot.lane.b32.xlu1 %v6024_v14, %s6532_s30  ;;  %4985 = vmatpush1.bf16.msra.mxu1 %v4984_v63  ;;  %v1340_v10 = vsel %vm8249_vm14, %v5766_v19, %v5770_v61  ;;  %v2728_v63 = vunpack.c.l.bf16 %v7386_v35  ;;  %s8299_s30 = smov 104  }
 0x144   : > { %v5779_v59 = vpop.permute.xlu0 %5778 }
 0x145   : > { %v5784_v6 = vpop.permute.xlu1 %5783  ;;  %v5781_v50 = vunpack.i.h.bf16 %v5779_v59  ;;  %v5780_v58 = vunpack.i.l.bf16 %v5779_v59 }
 0x146   : > { %v5785_v55 = vunpack.i.l.bf16 %v5784_v6  ;;  %v5786_v56 = vunpack.i.h.bf16 %v5784_v6  ;;  %6040 = vrot.lane.b32.xlu0 %v6039_v23, %s6533_s4  ;;  %v1342_v6 = vsel %vm8249_vm14, %v5771_v36, %v5775_v31  ;;  %v7419_v31 = vunpack.c.l.bf16 %v249_v16 }
 0x147   : > { %6035 = vrot.lane.b32.xlu1 %v6024_v14, %s6533_s4  ;;  %v1375_v11 = vsel %vm8248_vm15, %v5780_v58, %v5781_v50  ;;  %s8300_s4 = smov 102  }
 0x148   : > { %v1376_v33 = vsel %vm8248_vm15, %v5781_v50, %v5785_v55  ;;  %v7391_v43 = vpop.permute.xlu0 %5788  ;;  %v4892_v12 = vpack.c.bf16 %v1375_v11, %v1339_v22  ;;  %v1377_v19 = vsel %vm8248_vm15, %v5785_v55, %v5786_v56  ;;  %v1341_v22 = vsel %vm8249_vm14, %v5770_v61, %v5771_v36  ;;  %8294 = vst [vmem:[#allocation15_spill] sm:$0xff] %v7419_v31 }
 0x149   : > { %v5794_v0 = vpop.permute.xlu1 %5793  ;;  %8290 = vst [vmem:[#allocation11_spill] sm:$0xff] %v7391_v43  ;;  %v4890_v14 = vpack.c.bf16 %v1376_v33, %v1340_v10  ;;  %v5790_v52 = vunpack.i.l.bf16 %v7391_v43  ;;  %v7410_v10 = vld [vmem:[%s6626_s25 + $0x20] sm:$0xff]   ;;  %v7412_v55 = vunpack.c.h.bf16 %v249_v16  ;;  %v4988_v33 = vpack.c.bf16 %v1377_v19, %v1341_v22 }
 0x14a   : > { %6050 = vrot.lane.b32.xlu0 %v7303_v48, %s6534_s5  ;;  %v5796_v11 = vunpack.i.h.bf16 %v5794_v0  ;;  %v2763_v36 = vunpack.c.l.bf16 %v7410_v10  ;;  %vm8257_vm14 = vcmask 572416  }
 0x14b   : > { %6045 = vrot.lane.b32.xlu1 %v7293_v47, %s6534_s5  ;;  %4891 = vmatprep.subr.bf16.mxu0 %v4890_v14  ;;  %v1378_v59 = vsel %vm8248_vm15, %v5786_v56, %v5790_v52  ;;  %8293 = vst [vmem:[#allocation14_spill] sm:$0xff] %v7412_v55  ;;  %v5795_v14 = vunpack.i.l.bf16 %v5794_v0  ;;  %vm8258_vm15 = vcmask 588800   ;;  %v7426_v0 = vunpack.c.h.bf16 %v7416_v46 }
 0x14c   : > { %4893 = vmatpush1.bf16.msra.mxu0 %v4892_v12  ;;  %v5799_v50 = vpop.permute.xlu0 %5798  ;;  %v4986_v58 = vpack.c.bf16 %v1378_v59, %v1342_v6 }
 0x14d   : > { %v7404_v23 = vpop.permute.xlu1 %5803  ;;  %v5800_v56 = vunpack.i.l.bf16 %v5799_v50  ;;  %8295 = vst [vmem:[#allocation16_spill] sm:$0xff] %v7426_v0  ;;  %v1411_v19 = vsel %vm8258_vm15, %v5795_v14, %v5796_v11  ;;  %v5801_v22 = vunpack.i.h.bf16 %v5799_v50 }
 0x14e   : > { %8292 = vst [vmem:[#allocation13_spill] sm:$0xff] %v7404_v23  ;;  %4987 = vmatprep.subr.bf16.mxu1 %v4986_v58  ;;  %6055 = vrot.lane.b32.xlu0 %v7293_v47, %s6535_s6  ;;  %v5805_v6 = vunpack.i.l.bf16 %v7404_v23  ;;  %v7434_v58 = vld [vmem:[%s6626_s25 + $0x20] sm:$0xff]   ;;  %v1567_v23 = vld [vmem:[%s6626_s25 + $0xc] sm:$0xff] }
 0x14f   : > { %2742 = vrot.lane.b32.xlu1 %v2728_v63, %s6534_s5  ;;  %2242 = vmatmul.mubr.f32.vlgmr.msra.gmra.mrb[0].mxu0 %v7402_v20 }
 0x150   : > { %4989 = vmatpush1.bf16.msra.mxu1 %v4988_v33  ;;  %v5809_v52 = vpop.permute.xlu0 %5808  ;;  %2247 = vmatprep.mubr.f32.mxu0 %v7412_v55 }
 0x151   : > { %v5814_v61 = vpop.permute.xlu1 %5813  ;;  %v5811_v63 = vunpack.i.h.bf16 %v5809_v52  ;;  %v5810_v16 = vunpack.i.l.bf16 %v5809_v52  ;;  %v1412_v52 = vsel %vm8258_vm15, %v5796_v11, %v5800_v56  ;;  %v2798_v11 = vunpack.c.l.bf16 %v7434_v58 }
 0x152   : > { %v5815_v12 = vunpack.i.l.bf16 %v5814_v61  ;;  %v5816_v59 = vunpack.i.h.bf16 %v5814_v61  ;;  %2777 = vrot.lane.b32.xlu0 %v2763_v36, %s6535_s6 }
 0x153   : > { %6060 = vrot.lane.b32.xlu1 %v7303_v48, %s6535_s6  ;;  %2396 = vmatmul.mubr.f32.vlgmr.msra.gmra.mrb[0].mxu1 %v7402_v20  ;;  %v1447_v33 = vsel %vm8257_vm14, %v5810_v16, %v5811_v63 }
 0x154   : > { %2248 = vmatmul.mubr.f32.gmra.mrb[2].mxu0 %v7419_v31  ;;  %v1448_v51 = vsel %vm8257_vm14, %v5811_v63, %v5815_v12  ;;  %2401 = vmatprep.mubr.f32.mxu1 %v7412_v55  ;;  %v7442_v14 = vpop.permute.xlu0 %5818  ;;  %v4896_v20 = vpack.c.bf16 %v1447_v33, %v1411_v19  ;;  %v1449_v63 = vsel %vm8257_vm14, %v5815_v12, %v5816_v59  ;;  %v7460_v55 = vld [vmem:[%s6626_s25 + $0x20] sm:$0xff]  }
 0x155   : > { %v5824_v43 = vpop.permute.xlu1 %5823  ;;  %8296 = vst [vmem:[#allocation17_spill] sm:$0xff] %v7442_v14  ;;  %v4894_v61 = vpack.c.bf16 %v1448_v51, %v1412_v52  ;;  %4818 = vmatprep.mubr.msk.f32.mxu0 %vm2170_vm13, %v7426_v0  ;;  %v5820_v50 = vunpack.i.l.bf16 %v7442_v14  ;;  %v1414_v51 = vsel %vm8258_vm15, %v5801_v22, %v5805_v6  ;;  %v1413_v19 = vsel %vm8258_vm15, %v5800_v56, %v5801_v22 }
 0x156   : > { %6070 = vrot.lane.b32.xlu0 %v7303_v48, %s6536_s7  ;;  %v4992_v12 = vpack.c.bf16 %v1449_v63, %v1413_v19  ;;  %v5825_v6 = vunpack.i.l.bf16 %v5824_v43  ;;  %v2833_v56 = vunpack.c.l.bf16 %v7460_v55  ;;  %vm8276_vm15 = vcmask 31744  }
 0x157   : > { %6065 = vrot.lane.b32.xlu1 %v7293_v47, %s6536_s7  ;;  %4895 = vmatprep.subr.bf16.mxu0 %v4894_v61  ;;  %v1450_v16 = vsel %vm8257_vm14, %v5816_v59, %v5820_v50  ;;  %vm1482_vm14 = vcmask 556032  }
 0x158   : > { %2402 = vmatmul.mubr.f32.gmra.mrb[2].mxu1 %v7419_v31  ;;  %4897 = vmatpush1.bf16.msra.mxu0 %v4896_v20  ;;  %v5829_v33 = vpop.permute.xlu0 %5828  ;;  %v4990_v52 = vpack.c.bf16 %v1450_v16, %v1414_v51  ;;  %v5826_v20 = vunpack.i.h.bf16 %v5824_v43  ;;  %v7471_v43 = vld [vmem:[%s6626_s25 + $0x20] sm:$0xff]  }
 0x159   : > { %v7452_v36 = vpop.permute.xlu1 %5833  ;;  %4820 = vmatprep.mubr.msk.f32.mxu1 %vm2170_vm13, %v7426_v0  ;;  %v5830_v59 = vunpack.i.l.bf16 %v5829_v33 }
 0x15a   : > { %8297 = vst [vmem:[#allocation18_spill] sm:$0xff] %v7452_v36  ;;  %4991 = vmatprep.subr.bf16.mxu1 %v4990_v52  ;;  %6075 = vrot.lane.b32.xlu0 %v7293_v47, %s6537_s8  ;;  %v1483_v51 = vsel %vm1482_vm14, %v5825_v6, %v5826_v20  ;;  %v5835_v16 = vunpack.i.l.bf16 %v7452_v36  ;;  %v7476_v52 = vld [vmem:[%s6626_s25 + $0x20] sm:$0xff]   ;;  %v1568_v36 = vld [vmem:[%s6626_s25 + $0x14] sm:$0xff] }
 0x15b   : > { %2812 = vrot.lane.b32.xlu1 %v2798_v11, %s6536_s7  ;;  %4993 = vmatpush1.bf16.msra.mxu1 %v4992_v12  ;;  %v5831_v12 = vunpack.i.h.bf16 %v5829_v33  ;;  %v1484_v14 = vsel %vm1482_vm14, %v5826_v20, %v5830_v59  ;;  %v2868_v20 = vunpack.c.l.bf16 %v7476_v52 }
 0x15c   : > { %v5839_v50 = vpop.permute.xlu0 %5838 }
 0x15d   : > { %v5844_v61 = vpop.permute.xlu1 %5843  ;;  %v5841_v63 = vunpack.i.h.bf16 %v5839_v50  ;;  %v5840_v11 = vunpack.i.l.bf16 %v5839_v50 }
 0x15e   : > { %v5845_v22 = vunpack.i.l.bf16 %v5844_v61  ;;  %v5846_v19 = vunpack.i.h.bf16 %v5844_v61  ;;  %2847 = vrot.lane.b32.xlu0 %v2833_v56, %s6537_s8  ;;  %v2903_v61 = vunpack.c.l.bf16 %v7471_v43  ;;  %v1569_v56 = vunpack.c.l.bf16 %v1567_v23 }
 0x15f   : > { %6080 = vrot.lane.b32.xlu1 %v7303_v48, %s6537_s8  ;;  %v1519_v0 = vsel %vm8276_vm15, %v5840_v11, %v5841_v63 }
 0x160   : > { %v1520_v50 = vsel %vm8276_vm15, %v5841_v63, %v5845_v22  ;;  %v7483_v26 = vpop.permute.xlu0 %5848  ;;  %v4900_v1 = vpack.c.bf16 %v1519_v0, %v1483_v51  ;;  %v1521_v63 = vsel %vm8276_vm15, %v5845_v22, %v5846_v19 }
 0x161   : > { %v5854_v31 = vpop.permute.xlu1 %5853  ;;  %8298 = vst [vmem:[#allocation19_spill] sm:$0xff] %v7483_v26  ;;  %v4898_v6 = vpack.c.bf16 %v1520_v50, %v1484_v14  ;;  %v5850_v33 = vunpack.i.l.bf16 %v7483_v26  ;;  %v1486_v14 = vsel %vm1482_vm14, %v5831_v12, %v5835_v16  ;;  %v1570_v50 = vunpack.c.h.bf16 %v1567_v23 }
 0x162   : > { %v5856_v11 = vunpack.i.h.bf16 %v5854_v31  ;;  %v5855_v34 = vunpack.i.l.bf16 %v5854_v31  ;;  %v1571_v26 = vunpack.c.l.bf16 %v1568_v36  ;;  %6090 = vrot.lane.b32.xlu0 %v7303_v48, %s6538_s9  ;;  %v1572_v31 = vunpack.c.h.bf16 %v1568_v36 }
 0x163   : > { %6085 = vrot.lane.b32.xlu1 %v7293_v47, %s6538_s9  ;;  %4899 = vmatprep.subr.bf16.mxu0 %v4898_v6  ;;  %v1522_v51 = vsel %vm8276_vm15, %v5846_v19, %v5850_v33  ;;  %v1485_v47 = vsel %vm1482_vm14, %v5830_v59, %v5831_v12  ;;  %v6099_v6 = vpack.i.bf16 %v6711_v30, %v2903_v61  ;;  %v2938_v16 = vunpack.c.l.bf16 %v7493_v4  ;;  %v6486_v61 = vld [vmem:[%s6626_s25 + $0x14] sm:$0xff] }
 0x164   : > { %4901 = vmatpush1.bf16.msra.mxu0 %v4900_v1  ;;  %v5859_v22 = vpop.permute.xlu0 %5858  ;;  %v4994_v9 = vpack.c.bf16 %v1522_v51, %v1486_v14  ;;  %v4996_v27 = vpack.c.bf16 %v1521_v63, %v1485_v47  ;;  %v1555_v23 = vsel %vm8275_vm12, %v5855_v34, %v5856_v11  ;;  %v7510_v33 = vunpack.c.l.bf16 %v6486_v61 }
 0x165   : > { %v1553_v0 = vpop.permute.xlu1 %1552  ;;  %v5861_v45 = vunpack.i.h.bf16 %v5859_v22  ;;  %v5860_v1 = vunpack.i.l.bf16 %v5859_v22  ;;  %v7513_v34 = vunpack.c.l.bf16 %v7285_v25  ;;  %vm1776_vm15 = vcmask 441344  }
 0x166   : > { %4995 = vmatprep.subr.bf16.mxu1 %v4994_v9  ;;  %6095 = vrot.lane.b32.xlu0 %v7303_v48, %s6539_s10  ;;  %v4904_v9 = vpack.c.bf16 %v1569_v56, %v1555_v23  ;;  %v5356_v56 = vunpack.i.h.bf16 %v6871_v38 }
 0x167   : > { %2882 = vrot.lane.b32.xlu1 %v2868_v20, %s6538_s9  ;;  %v1557_v19 = vsel %vm8275_vm12, %v5860_v1, %v5861_v45  ;;  %4997 = vmatpush1.bf16.msra.mxu1 %v4996_v27  ;;  %v1556_v12 = vsel %vm8275_vm12, %v5856_v11, %v5860_v1  ;;  %v1558_v36 = vsel %vm8275_vm12, %v5861_v45, %v1553_v0  ;;  %v2973_v45 = vunpack.c.h.bf16 %v7343_v32 }
 0x168   : > { %v5864_v20 = vpop.permute.xlu0 %5863  ;;  %v4902_v63 = vpack.c.bf16 %v1570_v50, %v1556_v12  ;;  %v4998_v14 = vpack.c.bf16 %v1572_v31, %v1558_v36  ;;  %v5000_v51 = vpack.c.bf16 %v1571_v26, %v1557_v19  ;;  %v6109_v27 = vpack.i.bf16 %v6711_v30, %v2938_v16 }
 0x169   : > { %v5869_v59 = vpop.permute.xlu1 %5868  ;;  %v5866_v47 = vunpack.i.h.bf16 %v5864_v20  ;;  %v5865_v22 = vunpack.i.l.bf16 %v5864_v20  ;;  %v5341_v50 = vunpack.i.h.bf16 %v6857_v21  ;;  %v7524_v30 = vpack.i.bf16 %v7297_v8, %v7513_v34 }
 0x16a   : > { %v5871_v11 = vunpack.i.h.bf16 %v5869_v59  ;;  %v5870_v0 = vunpack.i.l.bf16 %v5869_v59  ;;  %4903 = vmatprep.subr.bf16.mxu0 %v4902_v63  ;;  %4999 = vmatprep.subr.bf16.mxu1 %v4998_v14  ;;  %v6119_v21 = vpack.i.bf16 %v7510_v33, %v2973_v45  ;;  %v3008_v16 = vunpack.c.h.bf16 %v7346_v37 }
 0x16b   : > { %6100 = vrot.lane.b32.xlu1 %v6099_v6, %s6539_s10  ;;  %4905 = vmatpush1.bf16.msra.mxu0 %v4904_v9  ;;  %v1600_v38 = vsel %vm294_vm0, %v5341_v50, %v5865_v22  ;;  %v1601_v23 = vsel %vm294_vm0, %v5865_v22, %v5866_v47  ;;  %s8301_s10 = smov 100   ;;  %vm1740_vm12 = vcmask 457728  }
 0x16c   : > { %5001 = vmatpush1.bf16.msra.mxu1 %v5000_v51  ;;  %v5874_v6 = vpop.permute.xlu0 %5873  ;;  %6105 = vrot.lane.b32.xlu0 %v7303_v48, %s6540_s11  ;;  %v1603_v19 = vsel %vm294_vm0, %v5870_v0, %v5871_v11  ;;  %v1602_v20 = vsel %vm294_vm0, %v5866_v47, %v5870_v0  ;;  %v6129_v51 = vpack.i.bf16 %v7510_v33, %v3008_v16  ;;  %v5371_v47 = vunpack.i.h.bf16 %v6897_v3 }
 0x16d   : > { %v5879_v25 = vpop.permute.xlu1 %5878  ;;  %v5876_v32 = vunpack.i.h.bf16 %v5874_v6  ;;  %v5875_v1 = vunpack.i.l.bf16 %v5874_v6 }
 0x16e   : > { %v5881_v26 = vunpack.i.h.bf16 %v5879_v25  ;;  %v5880_v31 = vunpack.i.l.bf16 %v5879_v25  ;;  %v5386_v25 = vunpack.i.h.bf16 %v6908_v15 }
 0x16f   : > { %6110 = vrot.lane.b32.xlu1 %v6109_v27, %s6540_s11  ;;  %v1635_v8 = vsel %vm330_vm1, %v5356_v56, %v5875_v1  ;;  %v1636_v36 = vsel %vm330_vm1, %v5875_v1, %v5876_v32  ;;  %v3043_v27 = vunpack.c.h.bf16 %v7359_v18  ;;  %v3078_v1 = vunpack.c.h.bf16 %v7386_v35  ;;  %s8302_s11 = smov 98  }
 0x170   : > { %v1638_v48 = vsel %vm330_vm1, %v5880_v31, %v5881_v26  ;;  %v1637_v59 = vsel %vm330_vm1, %v5876_v32, %v5880_v31  ;;  %v5884_v63 = vpop.permute.xlu0 %5883  ;;  %v4906_v37 = vpack.c.bf16 %v1636_v36, %v1601_v23  ;;  %v4908_v14 = vpack.c.bf16 %v1635_v8, %v1600_v38  ;;  %6115 = vrot.lane.b32.xlu0 %v7524_v30, %s8299_s30 }
 0x171   : > { %v5889_v12 = vpop.permute.xlu1 %5888  ;;  %v5002_v61 = vpack.c.bf16 %v1638_v48, %v1603_v19  ;;  %v5004_v9 = vpack.c.bf16 %v1637_v59, %v1602_v20  ;;  %v5886_v22 = vunpack.i.h.bf16 %v5884_v63  ;;  %v5885_v50 = vunpack.i.l.bf16 %v5884_v63 }
 0x172   : > { %v5891_v45 = vunpack.i.h.bf16 %v5889_v12  ;;  %v5890_v11 = vunpack.i.l.bf16 %v5889_v12  ;;  %4907 = vmatprep.subr.bf16.mxu0 %v4906_v37  ;;  %v6139_v32 = vpack.i.bf16 %v7510_v33, %v3043_v27  ;;  %v6149_v20 = vpack.i.bf16 %v7510_v33, %v3078_v1 }
 0x173   : > { %5003 = vmatprep.subr.bf16.mxu1 %v5002_v61  ;;  %6120 = vrot.lane.b32.xlu1 %v6119_v21, %s8299_s30  ;;  %v1670_v21 = vsel %vm366_vm2, %v5371_v47, %v5885_v50  ;;  %v1671_v3 = vsel %vm366_vm2, %v5885_v50, %v5886_v22  ;;  %v3113_v63 = vunpack.c.h.bf16 %v7410_v10  ;;  %v7568_v50 = vld [vmem:[%s6626_s25 + $0x1c] sm:$0xff]  ;;  %s8306_s30 = smov 28  }
 0x174   : > { %4909 = vmatpush1.bf16.msra.mxu0 %v4908_v14  ;;  %5005 = vmatpush1.bf16.msra.mxu1 %v5004_v9  ;;  %v5894_v31 = vpop.permute.xlu0 %5893  ;;  %v1673_v15 = vsel %vm366_vm2, %v5890_v11, %v5891_v45  ;;  %v1672_v8 = vsel %vm366_vm2, %v5886_v22, %v5890_v11  ;;  %v3217_v1 = vunpack.c.h.bf16 %v7568_v50 }
 0x175   : > { %v5899_v0 = vpop.permute.xlu1 %5898  ;;  %6125 = vrot.lane.b32.xlu0 %v7524_v30, %s8300_s4  ;;  %v5896_v6 = vunpack.i.h.bf16 %v5894_v31  ;;  %v5895_v18 = vunpack.i.l.bf16 %v5894_v31  ;;  %v6159_v9 = vpack.i.bf16 %v7510_v33, %v3113_v63  ;;  %v3183_v31 = vunpack.c.h.bf16 %v7460_v55 }
 0x176   : > { %v5901_v56 = vunpack.i.h.bf16 %v5899_v0  ;;  %v5900_v26 = vunpack.i.l.bf16 %v5899_v0 }
 0x177   : > { %6130 = vrot.lane.b32.xlu1 %v6129_v51, %s8300_s4  ;;  %v1705_v23 = vsel %vm402_vm3, %v5386_v25, %v5895_v18  ;;  %v1706_v48 = vsel %vm402_vm3, %v5895_v18, %v5896_v6  ;;  %v3148_v51 = vunpack.c.h.bf16 %v7434_v58  ;;  %s8307_s4 = smov 26  }
 0x178   : > { %v1708_v16 = vsel %vm402_vm3, %v5900_v26, %v5901_v56  ;;  %v1707_v38 = vsel %vm402_vm3, %v5896_v6, %v5900_v26  ;;  %v5904_v12 = vpop.permute.xlu0 %5903  ;;  %v4910_v35 = vpack.c.bf16 %v1706_v48, %v1671_v3  ;;  %v4912_v36 = vpack.c.bf16 %v1705_v23, %v1670_v21 }
 0x179   : > { %v5909_v19 = vpop.permute.xlu1 %5908  ;;  %v5006_v59 = vpack.c.bf16 %v1708_v16, %v1673_v15  ;;  %6135 = vrot.lane.b32.xlu0 %v7524_v30, %s8301_s10  ;;  %v5008_v61 = vpack.c.bf16 %v1707_v38, %v1672_v8  ;;  %v5906_v45 = vunpack.i.h.bf16 %v5904_v12  ;;  %v5905_v47 = vunpack.i.l.bf16 %v5904_v12 }
 0x17a   : > { %4911 = vmatprep.subr.bf16.mxu0 %v4910_v35  ;;  %v5910_v27 = vunpack.i.l.bf16 %v5909_v19  ;;  %v5911_v0 = vunpack.i.h.bf16 %v5909_v19  ;;  %v6169_v58 = vpack.i.bf16 %v7510_v33, %v3148_v51  ;;  %v6179_v35 = vpack.i.bf16 %v7510_v33, %v3183_v31 }
 0x17b   : > { %5007 = vmatprep.subr.bf16.mxu1 %v5006_v59  ;;  %6140 = vrot.lane.b32.xlu1 %v6139_v32, %s8301_s10  ;;  %v7578_v32 = vunpack.c.l.bf16 %v7568_v50  ;;  %v1741_v23 = vsel %vm1740_vm12, %v5905_v47, %v5906_v45  ;;  %v5446_v51 = vunpack.i.h.bf16 %v6970_v41  ;;  %s8308_s10 = smov 24  }
 0x17c   : > { %4913 = vmatpush1.bf16.msra.mxu0 %v4912_v36  ;;  %5009 = vmatpush1.bf16.msra.mxu1 %v5008_v61  ;;  %v1739_v14 = vpop.permute.xlu0 %1738  ;;  %v1742_v18 = vsel %vm1740_vm12, %v5906_v45, %v5910_v27  ;;  %v1743_v55 = vsel %vm1740_vm12, %v5910_v27, %v5911_v0  ;;  %v3218_v36 = vunpack.c.h.bf16 %v7476_v52 }
 0x17d   : > { %v5914_v37 = vpop.permute.xlu1 %5913  ;;  %6145 = vrot.lane.b32.xlu0 %v7524_v30, %s8302_s11  ;;  %v1744_v21 = vsel %vm1740_vm12, %v5911_v0, %v1739_v14  ;;  %v5431_v14 = vunpack.i.h.bf16 %v6957_v24  ;;  %v7599_v52 = vpack.i.bf16 %v3217_v1, %v7578_v32  ;;  %v3253_v0 = vunpack.c.h.bf16 %v7471_v43 }
 0x17e   : > { %v5916_v11 = vunpack.i.h.bf16 %v5914_v37  ;;  %v5915_v22 = vunpack.i.l.bf16 %v5914_v37  ;;  %v6189_v24 = vpack.i.bf16 %v7510_v33, %v3218_v36 }
 0x17f   : > { %6150 = vrot.lane.b32.xlu1 %v6149_v20, %s8302_s11  ;;  %s8309_s11 = smov 22  }
 0x180   : > { %v5919_v25 = vpop.permute.xlu0 %5918  ;;  %v1777_v6 = vsel %vm1776_vm15, %v5915_v22, %v5916_v11 }
 0x181   : > { %v1775_v10 = vpop.permute.xlu1 %1774  ;;  %6155 = vrot.lane.b32.xlu0 %v7524_v30, %s8303_s19  ;;  %v5921_v56 = vunpack.i.h.bf16 %v5919_v25  ;;  %v5920_v26 = vunpack.i.l.bf16 %v5919_v25  ;;  %v4916_v8 = vpack.c.bf16 %v1777_v6, %v1741_v23  ;;  %v6199_v23 = vpack.i.bf16 %v7510_v33, %v3253_v0  ;;  %v7636_v0 = vld [vmem:[%s6626_s25 + $0x24] sm:$0xff]  }
 0x183   : > { %6160 = vrot.lane.b32.xlu1 %v6159_v9, %s8303_s19  ;;  %v1779_v3 = vsel %vm1776_vm15, %v5920_v26, %v5921_v56  ;;  %v1778_v16 = vsel %vm1776_vm15, %v5916_v11, %v5920_v26  ;;  %v1780_v38 = vsel %vm1776_vm15, %v5921_v56, %v1775_v10  ;;  %s8311_s19 = smov 18  }
 0x184   : > { %v5924_v19 = vpop.permute.xlu0 %5923  ;;  %v4914_v48 = vpack.c.bf16 %v1778_v16, %v1742_v18  ;;  %v5010_v59 = vpack.c.bf16 %v1780_v38, %v1744_v21  ;;  %v5012_v12 = vpack.c.bf16 %v1779_v3, %v1743_v55 }
 0x185   : > { %v5929_v15 = vpop.permute.xlu1 %5928  ;;  %6165 = vrot.lane.b32.xlu0 %v7524_v30, %s8304_s22  ;;  %v5926_v63 = vunpack.i.h.bf16 %v5924_v19  ;;  %v5925_v37 = vunpack.i.l.bf16 %v5924_v19 }
 0x186   : > { %v5931_v61 = vunpack.i.h.bf16 %v5929_v15  ;;  %v5930_v20 = vunpack.i.l.bf16 %v5929_v15  ;;  %4915 = vmatprep.subr.bf16.mxu0 %v4914_v48  ;;  %5011 = vmatprep.subr.bf16.mxu1 %v5010_v59  ;;  %v3288_v15 = vunpack.c.h.bf16 %v7493_v4  ;;  %v7618_v59 = vld [vmem:[%s6626_s25 + $0x24] sm:$0xff]   ;;  %v5476_v4 = vunpack.i.h.bf16 %v7006_v17 }
 0x187   : > { %6170 = vrot.lane.b32.xlu1 %v6169_v58, %s8304_s22  ;;  %4917 = vmatpush1.bf16.msra.mxu0 %v4916_v8  ;;  %v1812_v41 = vsel %vm8281_vm6, %v5431_v14, %v5925_v37  ;;  %v1813_v47 = vsel %vm8281_vm6, %v5925_v37, %v5926_v63  ;;  %v5461_v8 = vunpack.i.h.bf16 %v6996_v13  ;;  %v3323_v13 = vunpack.c.l.bf16 %v7618_v59  ;;  %s8312_s22 = smov 16  }
 0x188   : > { %5013 = vmatpush1.bf16.msra.mxu1 %v5012_v12  ;;  %v5934_v11 = vpop.permute.xlu0 %5933  ;;  %v1815_v25 = vsel %vm8281_vm6, %v5930_v20, %v5931_v61  ;;  %v1814_v18 = vsel %vm8281_vm6, %v5926_v63, %v5930_v20  ;;  %v6209_v20 = vpack.i.bf16 %v7510_v33, %v3288_v15  ;;  %v7647_v15 = vld [vmem:[%s6626_s25 + $0x24] sm:$0xff]  }
 0x189   : > { %v5939_v9 = vpop.permute.xlu1 %5938  ;;  %6175 = vrot.lane.b32.xlu0 %v7524_v30, %s8305_s23  ;;  %v5936_v22 = vunpack.i.h.bf16 %v5934_v11  ;;  %v5935_v10 = vunpack.i.l.bf16 %v5934_v11 }
 0x18a   : > { %v5941_v27 = vunpack.i.h.bf16 %v5939_v9  ;;  %v5940_v45 = vunpack.i.l.bf16 %v5939_v9 }
 0x18b   : > { %6180 = vrot.lane.b32.xlu1 %v6179_v35, %s8305_s23  ;;  %v1847_v26 = vsel %vm8280_vm7, %v5446_v51, %v5935_v10  ;;  %v1848_v31 = vsel %vm8280_vm7, %v5935_v10, %v5936_v22  ;;  %s8313_s23 = smov 80  }
 0x18c   : > { %v1850_v30 = vsel %vm8280_vm7, %v5940_v45, %v5941_v27  ;;  %v1849_v56 = vsel %vm8280_vm7, %v5936_v22, %v5940_v45  ;;  %v5944_v43 = vpop.permute.xlu0 %5943  ;;  %v4918_v21 = vpack.c.bf16 %v1848_v31, %v1813_v47  ;;  %v4920_v3 = vpack.c.bf16 %v1847_v26, %v1812_v41 }
 0x18d   : > { %v5949_v58 = vpop.permute.xlu1 %5948  ;;  %v5014_v6 = vpack.c.bf16 %v1850_v30, %v1815_v25  ;;  %6185 = vrot.lane.b32.xlu0 %v7599_v52, %s8306_s30  ;;  %v5016_v55 = vpack.c.bf16 %v1849_v56, %v1814_v18  ;;  %v5946_v19 = vunpack.i.h.bf16 %v5944_v43  ;;  %v5945_v48 = vunpack.i.l.bf16 %v5944_v43  ;;  %v250_v43 = vld [vmem:[%s7048_s20 + $0x18] sm:$0xff]  ;;  %s8310_s20 = smov 20  }
 0x18e   : > { %v5951_v16 = vunpack.i.h.bf16 %v5949_v58  ;;  %v5950_v38 = vunpack.i.l.bf16 %v5949_v58  ;;  %4919 = vmatprep.subr.bf16.mxu0 %v4918_v21  ;;  %v3358_v21 = vunpack.c.l.bf16 %v7636_v0 }
 0x18f   : > { %5015 = vmatprep.subr.bf16.mxu1 %v5014_v6  ;;  %6190 = vrot.lane.b32.xlu1 %v6189_v24, %s8306_s30  ;;  %v1882_v17 = vsel %vm8279_vm8, %v5461_v8, %v5945_v48  ;;  %v1883_v51 = vsel %vm8279_vm8, %v5945_v48, %v5946_v19  ;;  %v6219_v6 = vpack.i.bf16 %v7510_v33, %v3323_v13  ;;  %v7667_v8 = vunpack.c.l.bf16 %v250_v43  ;;  %s8314_s30 = smov 78  }
 0x190   : > { %4921 = vmatpush1.bf16.msra.mxu0 %v4920_v3  ;;  %5017 = vmatpush1.bf16.msra.mxu1 %v5016_v55  ;;  %v5954_v61 = vpop.permute.xlu0 %5953  ;;  %v1885_v14 = vsel %vm8279_vm8, %v5950_v38, %v5951_v16  ;;  %v1884_v9 = vsel %vm8279_vm8, %v5946_v19, %v5950_v38  ;;  %v5491_v16 = vunpack.i.h.bf16 %v7030_v54  ;;  %v7651_v38 = vunpack.c.l.bf16 %v7416_v46  ;;  %v7663_v46 = vld [vmem:[%s6626_s25 + $0x24] sm:$0xff]  }
 0x191   : > { %v5959_v12 = vpop.permute.xlu1 %5958  ;;  %6195 = vrot.lane.b32.xlu0 %v7599_v52, %s8307_s4  ;;  %v5956_v63 = vunpack.i.h.bf16 %v5954_v61  ;;  %v5955_v37 = vunpack.i.l.bf16 %v5954_v61  ;;  %v7653_v55 = vunpack.c.h.bf16 %v250_v43  ;;  %v6229_v48 = vpack.i.bf16 %v7510_v33, %v3358_v21 }
 0x192   : > { %v5961_v35 = vunpack.i.h.bf16 %v5959_v12  ;;  %v5960_v36 = vunpack.i.l.bf16 %v5959_v12  ;;  %v3393_v54 = vunpack.c.l.bf16 %v7647_v15 }
 0x193   : > { %6200 = vrot.lane.b32.xlu1 %v6199_v23, %s8307_s4  ;;  %v1917_v11 = vsel %vm8278_vm9, %v5476_v4, %v5955_v37  ;;  %v1918_v10 = vsel %vm8278_vm9, %v5955_v37, %v5956_v63  ;;  %v3428_v4 = vunpack.c.l.bf16 %v7663_v46  ;;  %s8315_s4 = smov 76  }
 0x194   : > { %v1920_v27 = vsel %vm8278_vm9, %v5960_v36, %v5961_v35  ;;  %v1919_v45 = vsel %vm8278_vm9, %v5956_v63, %v5960_v36  ;;  %v5964_v25 = vpop.permute.xlu0 %5963  ;;  %v4922_v30 = vpack.c.bf16 %v1918_v10, %v1883_v51  ;;  %v4924_v56 = vpack.c.bf16 %v1917_v11, %v1882_v17  ;;  %v7679_v35 = vld [vmem:[%s6626_s25 + $0x20] sm:$0xff]  ;;  %v6487_v36 = vld [vmem:[%s6626_s25 + $0x18] sm:$0xff]  ;;  %v2501_v17 = vld [vmem:[%s6626_s25 + $0x10] sm:$0xff] }
 0x195   : > { %v5969_v22 = vpop.permute.xlu1 %5968  ;;  %v5018_v24 = vpack.c.bf16 %v1920_v27, %v1885_v14  ;;  %6205 = vrot.lane.b32.xlu0 %v7599_v52, %s8308_s10  ;;  %v5966_v26 = vunpack.i.h.bf16 %v5964_v25  ;;  %v5965_v58 = vunpack.i.l.bf16 %v5964_v25  ;;  %v5020_v31 = vpack.c.bf16 %v1919_v45, %v1884_v9 }
 0x196   : > { %v5971_v41 = vunpack.i.h.bf16 %v5969_v22  ;;  %v5970_v47 = vunpack.i.l.bf16 %v5969_v22  ;;  %4923 = vmatprep.subr.bf16.mxu0 %v4922_v30  ;;  %v6239_v12 = vpack.i.bf16 %v7510_v33, %v3393_v54  ;;  %v7684_v61 = vunpack.c.l.bf16 %v6487_v36 }
 0x197   : > { %5019 = vmatprep.subr.bf16.mxu1 %v5018_v24  ;;  %6210 = vrot.lane.b32.xlu1 %v6209_v20, %s8308_s10  ;;  %v1953_v3 = vsel %vm8277_vm10, %v5965_v58, %v5966_v26  ;;  %v1952_v23 = vsel %vm8277_vm10, %v5491_v16, %v5965_v58  ;;  %v6249_v20 = vpack.i.bf16 %v7510_v33, %v3428_v4  ;;  %v3461_v63 = vunpack.c.l.bf16 %v7679_v35  ;;  %s8317_s10 = smov 70  }
 0x198   : > { %v1955_v18 = vsel %vm8277_vm10, %v5970_v47, %v5971_v41  ;;  %4925 = vmatpush1.bf16.msra.mxu0 %v4924_v56  ;;  %5021 = vmatpush1.bf16.msra.mxu1 %v5020_v31  ;;  %v1954_v19 = vsel %vm8277_vm10, %v5966_v26, %v5970_v47  ;;  %v3462_v37 = vunpack.c.h.bf16 %v7679_v35  ;;  %v3463_v14 = vunpack.c.h.bf16 %v7618_v59  ;;  %v7714_v41 = vld [vmem:[%s6626_s25 + $0x18] sm:$0xff] }
 0x199   : > { %2440 = vmatprep.subr.mxu1 %v1955_v18  ;;  %2286 = vmatprep.subr.mxu0 %v1953_v3  ;;  %v3498_v59 = vunpack.c.h.bf16 %v7636_v0  ;;  %v2503_v27 = vunpack.c.l.bf16 %v2501_v17  ;;  %v2504_v10 = vunpack.c.h.bf16 %v2501_v17  ;;  %v3533_v0 = vunpack.c.h.bf16 %v7647_v15 }
 0x19a   : > { %6215 = vrot.lane.b32.xlu0 %v7599_v52, %s8309_s11  ;;  %v6259_v33 = vpack.i.bf16 %v7684_v61, %v3463_v14  ;;  %v2506_v58 = vunpack.c.h.bf16 %v7714_v41  ;;  %v2505_v43 = vunpack.c.l.bf16 %v7714_v41  ;;  %v3568_v16 = vunpack.c.h.bf16 %v7663_v46 }
 0x19b   : > { %6220 = vrot.lane.b32.xlu1 %v6219_v6, %s8309_s11  ;;  %v6269_v47 = vpack.i.bf16 %v7684_v61, %v3498_v59  ;;  %v6279_v15 = vpack.i.bf16 %v7684_v61, %v3533_v0  ;;  %s8318_s11 = smov 68  }
 0x19c   : > { %2287 = vmatpush1.msra.mxu0 %v1952_v23  ;;  %2441 = vmatpush1.msra.mxu1 %v1954_v19  ;;  %v7734_v23 = vld [vmem:[%s6626_s25 + $0x28] sm:$0xff]  }
 0x19d   : > { %2319 = vmatmul.mubr.f32.vlgmr.msra.gmra.mrb[0].mxu0 %v7651_v38  ;;  %2473 = vmatmul.mubr.f32.vlgmr.msra.gmra.mrb[0].mxu1 %v7651_v38  ;;  %v3603_v4 = vunpack.c.l.bf16 %v7734_v23 }
 0x19e   : > { %4819 = vmatprep.mubr.msk.f32.mxu0 %vm2170_vm13, %v7653_v55  ;;  %4821 = vmatprep.mubr.msk.f32.mxu1 %vm2170_vm13, %v7653_v55 }
 0x19f   : > { %6225 = vrot.lane.b32.xlu0 %v7599_v52, %s8310_s20  ;;  %6230 = vrot.lane.b32.xlu1 %v6229_v48, %s8310_s20  ;;  %s8319_s20 = smov 4  }
 0x1a1   : > { %2325 = vmatmul.mubr.f32.gmra.mrb[2].mxu0 %v7667_v8  ;;  %2479 = vmatmul.mubr.f32.gmra.mrb[2].mxu1 %v7667_v8 }
 0x1a2   : > { %4426 = vmatprep.mubr.f32.mxu0 %v7058_v28  ;;  %4580 = vmatprep.mubr.f32.mxu1 %v7058_v28  ;;  %v7707_v28 = vpack.i.bf16 %v3462_v37, %v3461_v63 }
 0x1a3   : > { %6235 = vrot.lane.b32.xlu0 %v7599_v52, %s8311_s19  ;;  %6240 = vrot.lane.b32.xlu1 %v6239_v12, %s8311_s19  ;;  %s8320_s19 = smov 2  }
 0x1a5   : > { %v7697_v9 = vpop.permute.xlu0 %2162 }
 0x1a6   : > { %v7695_v13 = vpop.permute.xlu1 %2167 }
 0x1a7   : > { %6245 = vrot.lane.b32.xlu0 %v7599_v52, %s8312_s22  ;;  %6250 = vrot.lane.b32.xlu1 %v6249_v20, %s8312_s22  ;;  %v6289_v20 = vpack.i.bf16 %v7684_v61, %v3568_v16 }
 0x1a9   : > { %v5981_v22 = vpop.permute.xlu0 %5980 }
 0x1aa   : > { %v5976_v51 = vpop.permute.xlu1 %5975  ;;  %v5983_v24 = vunpack.i.h.bf16 %v5981_v22  ;;  %v5982_v52 = vunpack.i.l.bf16 %v5981_v22 }
 0x1ab   : > { %v5978_v45 = vunpack.i.h.bf16 %v5976_v51  ;;  %v5977_v11 = vunpack.i.l.bf16 %v5976_v51  ;;  %6255 = vrot.lane.b32.xlu0 %v7707_v28, %s8313_s23  ;;  %6260 = vrot.lane.b32.xlu1 %v6259_v33, %s8313_s23  ;;  %v7748_v33 = vld [vmem:[%s6626_s25 + $0x28] sm:$0xff]  }
 0x1ac   : > { %v2536_v21 = vsel %vm294_vm0, %v5982_v52, %v5983_v24 }
 0x1ad   : > { %v2534_v25 = vsel %vm294_vm0, %v5977_v11, %v5978_v45  ;;  %v2535_v56 = vsel %vm294_vm0, %v5978_v45, %v5982_v52  ;;  %v5991_v6 = vpop.permute.xlu0 %5990  ;;  %v5120_v12 = vpack.c.bf16 %v2536_v21, %v2505_v43 }
 0x1ae   : > { %v7720_v30 = vpop.permute.xlu1 %5985  ;;  %v5024_v26 = vpack.c.bf16 %v2534_v25, %v2503_v27  ;;  %v5022_v18 = vpack.c.bf16 %v2535_v56, %v2504_v10  ;;  %v5993_v46 = vunpack.i.h.bf16 %v5991_v6  ;;  %v5992_v36 = vunpack.i.l.bf16 %v5991_v6 }
 0x1af   : > { %v5987_v31 = vunpack.i.l.bf16 %v7720_v30  ;;  %6265 = vrot.lane.b32.xlu0 %v7707_v28, %s8314_s30  ;;  %6270 = vrot.lane.b32.xlu1 %v6269_v47, %s8314_s30  ;;  %v3638_v25 = vunpack.c.l.bf16 %v7748_v33 }
 0x1b0   : > { %5023 = vmatprep.subr.bf16.mxu0 %v5022_v18  ;;  %v2569_v52 = vsel %vm330_vm1, %v5992_v36, %v5993_v46  ;;  %v7762_v18 = vld [vmem:[%s6626_s25 + $0x28] sm:$0xff]  }
 0x1b1   : > { %v2537_v3 = vsel %vm294_vm0, %v5983_v24, %v5987_v31  ;;  %5025 = vmatpush1.bf16.msra.mxu0 %v5024_v26  ;;  %v7738_v54 = vpop.permute.xlu0 %6000  ;;  %v6299_v24 = vpack.i.bf16 %v7684_v61, %v3603_v4  ;;  %v3673_v36 = vunpack.c.l.bf16 %v7762_v18  ;;  %v3858_v41 = vunpack.c.h.bf16 %v7762_v18 }
 0x1b2   : > { %v5996_v19 = vpop.permute.xlu1 %5995  ;;  %v5118_v48 = vpack.c.bf16 %v2537_v3, %v2506_v58  ;;  %v6002_v51 = vunpack.i.l.bf16 %v7738_v54 }
 0x1b3   : > { %6275 = vrot.lane.b32.xlu0 %v7707_v28, %s8315_s4  ;;  %6280 = vrot.lane.b32.xlu1 %v6279_v15, %s8315_s4  ;;  %v5997_v14 = vunpack.i.l.bf16 %v5996_v19  ;;  %v5998_v59 = vunpack.i.h.bf16 %v5996_v19 }
 0x1b4   : > { %5119 = vmatprep.subr.bf16.mxu1 %v5118_v48 }
 0x1b5   : > { %5121 = vmatpush1.bf16.msra.mxu1 %v5120_v12  ;;  %v6011_v11 = vpop.permute.xlu0 %6010  ;;  %v2570_v26 = vsel %vm330_vm1, %v5993_v46, %v5997_v14  ;;  %v2572_v21 = vsel %vm330_vm1, %v5998_v59, %v6002_v51  ;;  %v2571_v19 = vsel %vm330_vm1, %v5997_v14, %v5998_v59  ;;  %v7770_v12 = vld [vmem:[%s6626_s25 + $0x28] sm:$0xff]   ;;  %v6309_v46 = vpack.i.bf16 %v7684_v61, %v3638_v25 }
 0x1b6   : > { %v6006_v17 = vpop.permute.xlu1 %6005  ;;  %v6013_v22 = vunpack.i.h.bf16 %v6011_v11  ;;  %v6012_v10 = vunpack.i.l.bf16 %v6011_v11  ;;  %v3708_v14 = vunpack.c.l.bf16 %v7770_v12  ;;  %v7779_v11 = vld [vmem:[%s6626_s25 + $0x28] sm:$0xff]   ;;  %v3893_v18 = vunpack.c.h.bf16 %v7770_v12 }
 0x1b7   : > { %v6008_v27 = vunpack.i.h.bf16 %v6006_v17  ;;  %v6007_v45 = vunpack.i.l.bf16 %v6006_v17  ;;  %6285 = vrot.lane.b32.xlu0 %v7707_v28, %s6559_s21  ;;  %6290 = vrot.lane.b32.xlu1 %v6289_v20, %s6559_s21  ;;  %s8316_s21 = smov 72  }
 0x1b8   : > { %v2606_v0 = vsel %vm366_vm2, %v6012_v10, %v6013_v22 }
 0x1b9   : > { %v2604_v47 = vsel %vm366_vm2, %v6007_v45, %v6008_v27  ;;  %v2605_v31 = vsel %vm366_vm2, %v6008_v27, %v6012_v10  ;;  %v6016_v15 = vpop.permute.xlu0 %6015  ;;  %v5124_v4 = vpack.c.bf16 %v2606_v0, %v2571_v19  ;;  %v5401_v10 = vunpack.i.h.bf16 %v6927_v49 }
 0x1ba   : > { %v2603_v56 = vpop.permute.xlu1 %2602  ;;  %v5028_v6 = vpack.c.bf16 %v2604_v47, %v2569_v52  ;;  %v5026_v16 = vpack.c.bf16 %v2605_v31, %v2570_v26  ;;  %v6018_v59 = vunpack.i.h.bf16 %v6016_v15  ;;  %v6017_v51 = vunpack.i.l.bf16 %v6016_v15 }
 0x1bb   : > { %v2607_v3 = vsel %vm366_vm2, %v6013_v22, %v2603_v56  ;;  %6295 = vrot.lane.b32.xlu0 %v7707_v28, %s8316_s21  ;;  %6300 = vrot.lane.b32.xlu1 %v6299_v24, %s8316_s21  ;;  %v6319_v22 = vpack.i.bf16 %v7684_v61, %v3673_v36  ;;  %v6329_v0 = vpack.i.bf16 %v7684_v61, %v3708_v14  ;;  %v3743_v56 = vunpack.c.l.bf16 %v7779_v11 }
 0x1bc   : > { %v5122_v48 = vpack.c.bf16 %v2607_v3, %v2572_v21  ;;  %5027 = vmatprep.subr.bf16.mxu0 %v5026_v16  ;;  %v2639_v26 = vsel %vm402_vm3, %v6017_v51, %v6018_v59  ;;  %v3782_v51 = vld [vmem:[%s6626_s25 + $0x24] sm:$0xff] }
 0x1bd   : > { %5029 = vmatpush1.bf16.msra.mxu0 %v5028_v6  ;;  %v2638_v17 = vpop.permute.xlu0 %2637 }
 0x1be   : > { %v6021_v20 = vpop.permute.xlu1 %6020  ;;  %5123 = vmatprep.subr.bf16.mxu1 %v5122_v48 }
 0x1bf   : > { %5125 = vmatpush1.bf16.msra.mxu1 %v5124_v4  ;;  %v6023_v27 = vunpack.i.h.bf16 %v6021_v20  ;;  %v6022_v45 = vunpack.i.l.bf16 %v6021_v20  ;;  %6305 = vrot.lane.b32.xlu0 %v7707_v28, %s8317_s10 }
 0x1c0   : > { %6310 = vrot.lane.b32.xlu1 %v6309_v46, %s8317_s10 }
 0x1c1   : > { %v6031_v25 = vpop.permute.xlu0 %6030  ;;  %v2641_v31 = vsel %vm402_vm3, %v6022_v45, %v6023_v27  ;;  %v2642_v49 = vsel %vm402_vm3, %v6023_v27, %v2638_v17  ;;  %v2640_v15 = vsel %vm402_vm3, %v6018_v59, %v6022_v45  ;;  %v6334_v17 = vpack.i.bf16 %v3461_v63, %v2506_v58 }
 0x1c2   : > { %v6026_v24 = vpop.permute.xlu1 %6025  ;;  %v6033_v6 = vunpack.i.h.bf16 %v6031_v25  ;;  %v6032_v21 = vunpack.i.l.bf16 %v6031_v25  ;;  %v5416_v59 = vunpack.i.h.bf16 %v6935_v53 }
 0x1c3   : > { %v6028_v52 = vunpack.i.h.bf16 %v6026_v24  ;;  %v6027_v47 = vunpack.i.l.bf16 %v6026_v24  ;;  %6315 = vrot.lane.b32.xlu0 %v7707_v28, %s8318_s11  ;;  %v7808_v24 = vunpack.c.l.bf16 %v3782_v51 }
 0x1c4   : > { %6320 = vrot.lane.b32.xlu1 %v6319_v22, %s8318_s11  ;;  %v2677_v4 = vsel %vm438_vm4, %v6032_v21, %v6033_v6 }
 0x1c5   : > { %v2674_v3 = vsel %vm438_vm4, %v5401_v10, %v6027_v47  ;;  %v2675_v61 = vsel %vm438_vm4, %v6027_v47, %v6028_v52  ;;  %v2676_v16 = vsel %vm438_vm4, %v6028_v52, %v6032_v21  ;;  %v6041_v36 = vpop.permute.xlu0 %6040  ;;  %v5126_v20 = vpack.c.bf16 %v2677_v4, %v2642_v49 }
 0x1c6   : > { %v6036_v19 = vpop.permute.xlu1 %6035  ;;  %v5030_v48 = vpack.c.bf16 %v2675_v61, %v2640_v15  ;;  %v5032_v46 = vpack.c.bf16 %v2674_v3, %v2639_v26  ;;  %v5128_v14 = vpack.c.bf16 %v2676_v16, %v2641_v31  ;;  %v6339_v10 = vpack.i.bf16 %v3743_v56, %v3462_v37 }
 0x1c7   : > { %6325 = vrot.lane.b32.xlu0 %v7707_v28, %s8319_s20  ;;  %v6037_v27 = vunpack.i.l.bf16 %v6036_v19  ;;  %5127 = vmatprep.subr.bf16.mxu1 %v5126_v20  ;;  %v6038_v45 = vunpack.i.h.bf16 %v6036_v19  ;;  %v7810_v28 = vunpack.c.h.bf16 %v3782_v51  ;;  %v6043_v52 = vunpack.i.h.bf16 %v6041_v36 }
 0x1c8   : > { %5031 = vmatprep.subr.bf16.mxu0 %v5030_v48  ;;  %5129 = vmatpush1.bf16.msra.mxu1 %v5128_v14  ;;  %v6042_v47 = vunpack.i.l.bf16 %v6041_v36  ;;  %v3788_v31 = vunpack.c.h.bf16 %v7734_v23  ;;  %vm8323_vm4 = vcmask 326656  }
 0x1c9   : > { %5033 = vmatpush1.bf16.msra.mxu0 %v5032_v46  ;;  %6330 = vrot.lane.b32.xlu1 %v6329_v0, %s8319_s20  ;;  %v6051_v53 = vpop.permute.xlu0 %6050  ;;  %v2709_v0 = vsel %vm474_vm5, %v5416_v59, %v6037_v27  ;;  %v2710_v21 = vsel %vm474_vm5, %v6037_v27, %v6038_v45  ;;  %v6344_v16 = vpack.i.bf16 %v7810_v28, %v7808_v24  ;;  %v3823_v46 = vunpack.c.h.bf16 %v7748_v33 }
 0x1ca   : > { %v6046_v22 = vpop.permute.xlu1 %6045  ;;  %v6053_v25 = vunpack.i.h.bf16 %v6051_v53  ;;  %v6052_v26 = vunpack.i.l.bf16 %v6051_v53  ;;  %v2712_v3 = vsel %vm474_vm5, %v6042_v47, %v6043_v52  ;;  %v2711_v19 = vsel %vm474_vm5, %v6038_v45, %v6042_v47  ;;  %vm8324_vm5 = vmmov %vm8323_vm4 }
 0x1cb   : > { %v6048_v63 = vunpack.i.h.bf16 %v6046_v22  ;;  %v6047_v58 = vunpack.i.l.bf16 %v6046_v22  ;;  %6335 = vrot.lane.b32.xlu0 %v6334_v17, %s8320_s19  ;;  %v6349_v4 = vpack.i.bf16 %v7513_v34, %v3788_v31  ;;  %v6359_v51 = vpack.i.bf16 %v7513_v34, %v3823_v46 }
 0x1cc   : > { %v2746_v56 = vsel %vm8281_vm6, %v6052_v26, %v6053_v25  ;;  %v7838_v52 = vpack.i.bf16 %v7808_v24, %v3217_v1  ;;  %v6369_v34 = vpack.i.bf16 %v3858_v41, %v7810_v28 }
 0x1cd   : > { %v2744_v35 = vsel %vm8281_vm6, %v6047_v58, %v6048_v63  ;;  %v2745_v49 = vsel %vm8281_vm6, %v6048_v63, %v6052_v26  ;;  %6340 = vrot.lane.b32.xlu1 %v6339_v10, %s8320_s19  ;;  %v6056_v61 = vpop.permute.xlu0 %6055  ;;  %v5132_v36 = vpack.c.bf16 %v2746_v56, %v2711_v19  ;;  %v3958_v19 = vld [vmem:[%s6626_s25 + $0x2c] sm:$0xf] }
 0x1ce   : > { %v5036_v37 = vpack.c.bf16 %v2744_v35, %v2709_v0  ;;  %v2743_v6 = vpop.permute.xlu1 %2742  ;;  %v5034_v23 = vpack.c.bf16 %v2745_v49, %v2710_v21  ;;  %v6057_v17 = vunpack.i.l.bf16 %v6056_v61  ;;  %v6379_v21 = vpack.i.bf16 %v3893_v18, %v7810_v28 }
 0x1cf   : > { %v2747_v15 = vsel %vm8281_vm6, %v6053_v25, %v2743_v6  ;;  %3749 = vrot.lane.b32.xlu0 %v2505_v43, %s8320_s19  ;;  %v6058_v43 = vunpack.i.h.bf16 %v6056_v61  ;;  %v3928_v61 = vunpack.c.h.bf16 %v7779_v11  ;;  %v3963_v11 = vunpack.c.l.bf16 %v3958_v19 }
 0x1d0   : > { %v5130_v48 = vpack.c.bf16 %v2747_v15, %v2712_v3  ;;  %5035 = vmatprep.subr.bf16.mxu0 %v5034_v23 }
 0x1d1   : > { %5037 = vmatpush1.bf16.msra.mxu0 %v5036_v37  ;;  %v2778_v14 = vpop.permute.xlu0 %2777  ;;  %6345 = vrot.lane.b32.xlu1 %v6344_v16, %s6528_s26  ;;  %v2779_v58 = vsel %vm8280_vm7, %v6057_v17, %v6058_v43 }
 0x1d2   : > { %v6061_v20 = vpop.permute.xlu1 %6060  ;;  %5131 = vmatprep.subr.bf16.mxu1 %v5130_v48 }
 0x1d3   : > { %5133 = vmatpush1.bf16.msra.mxu1 %v5132_v36  ;;  %6350 = vrot.lane.b32.xlu0 %v6349_v4, %s6528_s26  ;;  %v6062_v59 = vunpack.i.l.bf16 %v6061_v20  ;;  %v6063_v33 = vunpack.i.h.bf16 %v6061_v20  ;;  %s8321_s26 = smov 56  }
 0x1d5   : > { %v6071_v10 = vpop.permute.xlu0 %6070  ;;  %6355 = vrot.lane.b32.xlu1 %v6344_v16, %s6529_s27  ;;  %v2780_v50 = vsel %vm8280_vm7, %v6058_v43, %v6062_v59  ;;  %v2782_v0 = vsel %vm8280_vm7, %v6063_v33, %v2778_v14  ;;  %v2781_v12 = vsel %vm8280_vm7, %v6062_v59, %v6063_v33  ;;  %v6389_v43 = vpack.i.bf16 %v3928_v61, %v7810_v28 }
 0x1d6   : > { %v6066_v27 = vpop.permute.xlu1 %6065  ;;  %v6073_v47 = vunpack.i.h.bf16 %v6071_v10  ;;  %v6072_v63 = vunpack.i.l.bf16 %v6071_v10 }
 0x1d7   : > { %v6068_v45 = vunpack.i.h.bf16 %v6066_v27  ;;  %v6067_v22 = vunpack.i.l.bf16 %v6066_v27  ;;  %6360 = vrot.lane.b32.xlu0 %v6359_v51, %s6529_s27  ;;  %s8322_s27 = smov 54  }
 0x1d8   : > { %v2816_v26 = vsel %vm8279_vm8, %v6072_v63, %v6073_v47 }
 0x1d9   : > { %v2814_v53 = vsel %vm8279_vm8, %v6067_v22, %v6068_v45  ;;  %v2815_v1 = vsel %vm8279_vm8, %v6068_v45, %v6072_v63  ;;  %v6076_v37 = vpop.permute.xlu0 %6075  ;;  %6365 = vrot.lane.b32.xlu1 %v7838_v52, %s6530_s28  ;;  %v5136_v49 = vpack.c.bf16 %v2816_v26, %v2781_v12 }
 0x1da   : > { %v5040_v25 = vpack.c.bf16 %v2814_v53, %v2779_v58  ;;  %v2813_v31 = vpop.permute.xlu1 %2812  ;;  %v5038_v56 = vpack.c.bf16 %v2815_v1, %v2780_v50  ;;  %v6078_v23 = vunpack.i.h.bf16 %v6076_v37  ;;  %v6077_v16 = vunpack.i.l.bf16 %v6076_v37 }
 0x1db   : > { %v2817_v35 = vsel %vm8279_vm8, %v6073_v47, %v2813_v31  ;;  %6370 = vrot.lane.b32.xlu0 %v6369_v34, %s6530_s28  ;;  %v3993_v31 = vld [vmem:[%s6626_s25 + $0x2c] sm:$0xf]  ;;  %v5521_v37 = vunpack.i.h.bf16 %v7078_v44 }
 0x1dc   : > { %v5134_v6 = vpack.c.bf16 %v2817_v35, %v2782_v0  ;;  %5039 = vmatprep.subr.bf16.mxu0 %v5038_v56  ;;  %v2849_v17 = vsel %vm8278_vm9, %v6077_v16, %v6078_v23  ;;  %v5506_v0 = vunpack.i.h.bf16 %v7041_v57 }
 0x1dd   : > { %5041 = vmatpush1.bf16.msra.mxu0 %v5040_v25  ;;  %v2848_v15 = vpop.permute.xlu0 %2847  ;;  %6375 = vrot.lane.b32.xlu1 %v7838_v52, %s6531_s29  ;;  %v6399_v25 = vpack.i.bf16 %v3963_v11, %v7810_v28 }
 0x1de   : > { %v6081_v3 = vpop.permute.xlu1 %6080  ;;  %5135 = vmatprep.subr.bf16.mxu1 %v5134_v6  ;;  %v3998_v6 = vunpack.c.l.bf16 %v3993_v31 }
 0x1df   : > { %5137 = vmatpush1.bf16.msra.mxu1 %v5136_v49  ;;  %6380 = vrot.lane.b32.xlu0 %v6379_v21, %s6531_s29  ;;  %v6082_v48 = vunpack.i.l.bf16 %v6081_v3  ;;  %v6083_v46 = vunpack.i.h.bf16 %v6081_v3  ;;  %v7884_v21 = vld [vmem:[%s6626_s25 + $0x1c] sm:$0xff] }
 0x1e1   : > { %v6091_v14 = vpop.permute.xlu0 %6090  ;;  %3864 = vrot.lane.b32.xlu1 %v7578_v32, %s6530_s28  ;;  %v2850_v22 = vsel %vm8278_vm9, %v6078_v23, %v6082_v48  ;;  %v2852_v47 = vsel %vm8278_vm9, %v6083_v46, %v2848_v15  ;;  %v2851_v58 = vsel %vm8278_vm9, %v6082_v48, %v6083_v46  ;;  %v4028_v15 = vld [vmem:[%s6626_s25 + $0x2c] sm:$0xf]  ;;  %v4030_v46 = vunpack.c.h.bf16 %v7884_v21 }
 0x1e2   : > { %v6086_v4 = vpop.permute.xlu1 %6085  ;;  %v6093_v51 = vunpack.i.h.bf16 %v6091_v14  ;;  %v6092_v41 = vunpack.i.l.bf16 %v6091_v14  ;;  %v4033_v14 = vunpack.c.l.bf16 %v4028_v15 }
 0x1e3   : > { %v6088_v36 = vunpack.i.h.bf16 %v6086_v4  ;;  %v6087_v20 = vunpack.i.l.bf16 %v6086_v4  ;;  %3899 = vrot.lane.b32.xlu0 %v7578_v32, %s6531_s29 }
 0x1e4   : > { %v2886_v33 = vsel %vm8277_vm10, %v6092_v41, %v6093_v51 }
 0x1e5   : > { %v2884_v59 = vsel %vm8277_vm10, %v6087_v20, %v6088_v36  ;;  %v2885_v10 = vsel %vm8277_vm10, %v6088_v36, %v6092_v41  ;;  %v6096_v34 = vpop.permute.xlu0 %6095  ;;  %6385 = vrot.lane.b32.xlu1 %v7838_v52, %s8321_s26  ;;  %v5140_v26 = vpack.c.bf16 %v2886_v33, %v2851_v58  ;;  %v6409_v20 = vpack.i.bf16 %v3998_v6, %v7810_v28 }
 0x1e6   : > { %v5044_v27 = vpack.c.bf16 %v2884_v59, %v2849_v17  ;;  %v2883_v45 = vpop.permute.xlu1 %2882  ;;  %v5042_v18 = vpack.c.bf16 %v2885_v10, %v2850_v22  ;;  %v6097_v50 = vunpack.i.l.bf16 %v6096_v34  ;;  %v6098_v61 = vunpack.i.h.bf16 %v6096_v34 }
 0x1e7   : > { %v2887_v63 = vsel %vm8277_vm10, %v6093_v51, %v2883_v45  ;;  %6390 = vrot.lane.b32.xlu0 %v6389_v43, %s8321_s26  ;;  %vm8325_vm10 = vmmov %vm8323_vm4  ;;  %v5536_v22 = vunpack.i.h.bf16 %v7088_v2  ;;  %v5551_v34 = vunpack.i.h.bf16 %v7109_v40  ;;  %v6419_v2 = vpack.i.bf16 %v4033_v14, %v7810_v28 }
 0x1e8   : > { %v5138_v53 = vpack.c.bf16 %v2887_v63, %v2852_v47  ;;  %5043 = vmatprep.subr.bf16.mxu0 %v5042_v18  ;;  %v2920_v57 = vsel %vm690_vm11, %v5506_v0, %v6097_v50  ;;  %v2921_v17 = vsel %vm690_vm11, %v6097_v50, %v6098_v61  ;;  %v7907_v63 = vpack.i.bf16 %v7808_v24, %v4030_v46  ;;  %v4063_v50 = vld [vmem:[%s6626_s25 + $0x2c] sm:$0xf] }
 0x1e9   : > { %5045 = vmatpush1.bf16.msra.mxu0 %v5044_v27  ;;  %v6106_v35 = vpop.permute.xlu0 %6105  ;;  %6395 = vrot.lane.b32.xlu1 %v7838_v52, %s8322_s27  ;;  %v4068_v15 = vunpack.c.l.bf16 %v4063_v50  ;;  %v5596_v50 = vunpack.i.h.bf16 %v7163_v60 }
 0x1ea   : > { %v6101_v1 = vpop.permute.xlu1 %6100  ;;  %5139 = vmatprep.subr.bf16.mxu1 %v5138_v53  ;;  %v6108_v56 = vunpack.i.h.bf16 %v6106_v35  ;;  %v6107_v12 = vunpack.i.l.bf16 %v6106_v35 }
 0x1eb   : > { %5141 = vmatpush1.bf16.msra.mxu1 %v5140_v26  ;;  %6400 = vrot.lane.b32.xlu0 %v6399_v25, %s8322_s27  ;;  %v6103_v49 = vunpack.i.h.bf16 %v6101_v1  ;;  %v6102_v3 = vunpack.i.l.bf16 %v6101_v1 }
 0x1ec   : > { %v2955_v16 = vsel %vm8323_vm4, %v5521_v37, %v6107_v12  ;;  %v2956_v36 = vsel %vm8324_vm5, %v6107_v12, %v6108_v56  ;;  %v7920_v12 = vunpack.c.l.bf16 %v7884_v21 }
 0x1ed   : > { %v6116_v4 = vpop.permute.xlu0 %6115  ;;  %v5046_v44 = vpack.c.bf16 %v2955_v16, %v2920_v57  ;;  %3934 = vrot.lane.b32.xlu1 %v7578_v32, %s8321_s26  ;;  %v2919_v51 = vsel %vm690_vm11, %v6103_v49, %v5506_v0  ;;  %v2922_v43 = vsel %vm690_vm11, %v6098_v61, %v6102_v3  ;;  %v5144_v10 = vpack.c.bf16 %v2956_v36, %v2921_v17  ;;  %v4098_v61 = vld [vmem:[%s6626_s25 + $0x2c] sm:$0xf] }
 0x1ee   : > { %v6111_v23 = vpop.permute.xlu1 %6110  ;;  %v6117_v27 = vunpack.i.l.bf16 %v6116_v4  ;;  %vm8327_vm11 = vcmask 834560  }
 0x1ef   : > { %v6113_v19 = vunpack.i.h.bf16 %v6111_v23  ;;  %v6112_v48 = vunpack.i.l.bf16 %v6111_v23  ;;  %3969 = vrot.lane.b32.xlu0 %v7578_v32, %s8322_s27  ;;  %5047 = vmatprep.subr.bf16.mxu0 %v5046_v44  ;;  %v5581_v44 = vunpack.i.h.bf16 %v7154_v39 }
 0x1f1   : > { %v2954_v41 = vsel %vm8323_vm4, %v6113_v19, %v5521_v37  ;;  %v2957_v11 = vsel %vm8325_vm10, %v6108_v56, %v6112_v48  ;;  %v6126_v47 = vpop.permute.xlu0 %6125  ;;  %6405 = vrot.lane.b32.xlu1 %v7838_v52, %s6534_s5  ;;  %v6118_v52 = vunpack.i.h.bf16 %v6116_v4  ;;  %vm8326_vm10 = vcmask 850944   ;;  %vm8329_vm4 = vmmov %vm8327_vm11 }
 0x1f2   : > { %v5048_v59 = vpack.c.bf16 %v2954_v41, %v2919_v51  ;;  %v6121_v33 = vpop.permute.xlu1 %6120  ;;  %v5142_v45 = vpack.c.bf16 %v2957_v11, %v2922_v43  ;;  %v6128_v58 = vunpack.i.h.bf16 %v6126_v47  ;;  %v6127_v53 = vunpack.i.l.bf16 %v6126_v47  ;;  %vm8328_vm5 = vmmov %vm8326_vm10 }
 0x1f3   : > { %v6123_v18 = vunpack.i.h.bf16 %v6121_v33  ;;  %v6122_v25 = vunpack.i.l.bf16 %v6121_v33  ;;  %6410 = vrot.lane.b32.xlu0 %v6409_v20, %s6534_s5  ;;  %v2990_v31 = vsel %vm8326_vm10, %v5536_v22, %v6117_v27  ;;  %vm8330_vm9 = vmmov %vm8329_vm4  ;;  %v5566_v4 = vunpack.i.h.bf16 %v7124_v7 }
 0x1f4   : > { %5049 = vmatpush1.bf16.msra.mxu0 %v5048_v59  ;;  %5143 = vmatprep.subr.bf16.mxu1 %v5142_v45  ;;  %v3025_v24 = vsel %vm8327_vm11, %v5551_v34, %v6127_v53  ;;  %v3026_v56 = vsel %vm8329_vm4, %v6127_v53, %v6128_v58  ;;  %vm8331_vm10 = vmmov %vm8328_vm5  ;;  %v4103_v43 = vunpack.c.l.bf16 %v4098_v61  ;;  %v6429_v7 = vpack.i.bf16 %v4068_v15, %v7810_v28 }
 0x1f5   : > { %5145 = vmatpush1.bf16.msra.mxu1 %v5144_v10  ;;  %v6136_v0 = vpop.permute.xlu0 %6135  ;;  %v5050_v35 = vpack.c.bf16 %v3025_v24, %v2990_v31  ;;  %6415 = vrot.lane.b32.xlu1 %v7907_v63, %s6535_s6  ;;  %v2989_v37 = vsel %vm8328_vm5, %v6123_v18, %v5536_v22  ;;  %v2992_v49 = vsel %vm8331_vm10, %v6118_v52, %v6122_v25  ;;  %vm8332_vm11 = vmmov %vm8329_vm4  ;;  %v4133_v25 = vld [vmem:[%s6626_s25 + $0x2c] sm:$0xf] }
 0x1f6   : > { %v6131_v26 = vpop.permute.xlu1 %6130  ;;  %vm8333_vm8 = vmmov %vm8328_vm5  ;;  %v6137_v16 = vunpack.i.l.bf16 %v6136_v0  ;;  %v6138_v17 = vunpack.i.h.bf16 %v6136_v0 }
 0x1f7   : > { %v6133_v40 = vunpack.i.h.bf16 %v6131_v26  ;;  %v6132_v1 = vunpack.i.l.bf16 %v6131_v26  ;;  %5051 = vmatprep.subr.bf16.mxu0 %v5050_v35  ;;  %6420 = vrot.lane.b32.xlu0 %v6419_v2, %s6535_s6  ;;  %v2991_v23 = vsel %vm8333_vm8, %v6117_v27, %v6118_v52  ;;  %vm8334_vm8 = vcmask 818176  }
 0x1f8   : > { %v5148_v36 = vpack.c.bf16 %v3026_v56, %v2991_v23  ;;  %v3060_v59 = vsel %vm8334_vm8, %v5566_v4, %v6137_v16  ;;  %vm8336_vm5 = vmmov %vm8334_vm8 }
 0x1f9   : > { %v3024_v6 = vsel %vm8330_vm9, %v6133_v40, %v5551_v34  ;;  %v3027_v3 = vsel %vm8332_vm11, %v6128_v58, %v6132_v1  ;;  %v6146_v20 = vpop.permute.xlu0 %6145  ;;  %4004 = vrot.lane.b32.xlu1 %v7578_v32, %s6534_s5  ;;  %vm8335_vm9 = vcmask 801792   ;;  %v6439_v34 = vpack.i.bf16 %v4103_v43, %v7810_v28  ;;  %vm8339_vm11 = vmmov %vm8336_vm5 }
 0x1fa   : > { %v5052_v57 = vpack.c.bf16 %v3024_v6, %v2989_v37  ;;  %v6141_v19 = vpop.permute.xlu1 %6140  ;;  %v5146_v48 = vpack.c.bf16 %v3027_v3, %v2992_v49  ;;  %v6148_v51 = vunpack.i.h.bf16 %v6146_v20  ;;  %v6147_v41 = vunpack.i.l.bf16 %v6146_v20  ;;  %vm8337_vm4 = vmmov %vm8335_vm9 }
 0x1fb   : > { %v6143_v14 = vunpack.i.h.bf16 %v6141_v19  ;;  %v6142_v11 = vunpack.i.l.bf16 %v6141_v19  ;;  %4039 = vrot.lane.b32.xlu0 %v7920_v12, %s6535_s6  ;;  %vm8338_vm10 = vmmov %vm8337_vm4  ;;  %v5611_v40 = vunpack.i.h.bf16 %v7183_v42  ;;  %v4138_v6 = vunpack.c.l.bf16 %v4133_v25 }
 0x1fc   : > { %5053 = vmatpush1.bf16.msra.mxu0 %v5052_v57  ;;  %5147 = vmatprep.subr.bf16.mxu1 %v5146_v48  ;;  %v3095_v32 = vsel %vm8335_vm9, %v5581_v44, %v6147_v41  ;;  %v3096_v47 = vsel %vm8337_vm4, %v6147_v41, %v6148_v51  ;;  %vm8340_vm8 = vmmov %vm8337_vm4  ;;  %vm8343_vm4 = vcmask 769024  }
 0x1fd   : > { %5149 = vmatpush1.bf16.msra.mxu1 %v5148_v36  ;;  %v6156_v45 = vpop.permute.xlu0 %6155  ;;  %v5054_v22 = vpack.c.bf16 %v3095_v32, %v3060_v59  ;;  %6425 = vrot.lane.b32.xlu1 %v7907_v63, %s6536_s7  ;;  %v3059_v10 = vsel %vm8336_vm5, %v6143_v14, %v5566_v4  ;;  %v3062_v58 = vsel %vm8339_vm11, %v6138_v17, %v6142_v11  ;;  %vm8341_vm9 = vmmov %vm8336_vm5  ;;  %vm8342_vm5 = vcmask 785408  }
 0x1fe   : > { %v6151_v39 = vpop.permute.xlu1 %6150  ;;  %v3061_v2 = vsel %vm8341_vm9, %v6137_v16, %v6138_v17  ;;  %v6157_v26 = vunpack.i.l.bf16 %v6156_v45  ;;  %v6158_v3 = vunpack.i.h.bf16 %v6156_v45  ;;  %vm8345_vm11 = vmmov %vm8343_vm4  ;;  %v6449_v4 = vpack.i.bf16 %v4138_v6, %v7810_v28 }
 0x1ff   : > { %v6153_v27 = vunpack.i.h.bf16 %v6151_v39  ;;  %v6152_v33 = vunpack.i.l.bf16 %v6151_v39  ;;  %5055 = vmatprep.subr.bf16.mxu0 %v5054_v22  ;;  %6430 = vrot.lane.b32.xlu0 %v6429_v7, %s6536_s7  ;;  %v5152_v1 = vpack.c.bf16 %v3096_v47, %v3061_v2  ;;  %vm8347_vm9 = vmmov %vm8342_vm5  ;;  %v5626_v28 = vunpack.i.h.bf16 %v7193_v5 }
 0x200   : > { %v3130_v60 = vsel %vm8342_vm5, %v5596_v50, %v6157_v26  ;;  %v5641_v39 = vunpack.i.h.bf16 %v7210_v29 }
 0x201   : > { %v3094_v18 = vsel %vm8338_vm10, %v6153_v27, %v5581_v44  ;;  %v3097_v53 = vsel %vm8340_vm8, %v6148_v51, %v6152_v33  ;;  %v6166_v0 = vpop.permute.xlu0 %6165  ;;  %6435 = vrot.lane.b32.xlu1 %v7907_v63, %s6537_s8  ;;  %vm8344_vm10 = vmmov %vm8342_vm5 }
 0x202   : > { %v5056_v52 = vpack.c.bf16 %v3094_v18, %v3059_v10  ;;  %v6161_v31 = vpop.permute.xlu1 %6160  ;;  %v5150_v24 = vpack.c.bf16 %v3097_v53, %v3062_v58  ;;  %v6168_v37 = vunpack.i.h.bf16 %v6166_v0  ;;  %v6167_v56 = vunpack.i.l.bf16 %v6166_v0  ;;  %vm8346_vm8 = vmmov %vm8343_vm4 }
 0x203   : > { %v6163_v35 = vunpack.i.h.bf16 %v6161_v31  ;;  %v6162_v49 = vunpack.i.l.bf16 %v6161_v31  ;;  %6440 = vrot.lane.b32.xlu0 %v6439_v34, %s6537_s8  ;;  %vm8348_vm5 = vmmov %vm8343_vm4  ;;  %v5656_v0 = vunpack.i.h.bf16 %v7221_v62 }
 0x204   : > { %5057 = vmatpush1.bf16.msra.mxu0 %v5056_v52  ;;  %5151 = vmatprep.subr.bf16.mxu1 %v5150_v24  ;;  %v3165_v42 = vsel %vm8343_vm4, %v5611_v40, %v6167_v56  ;;  %v3166_v48 = vsel %vm8345_vm11, %v6167_v56, %v6168_v37  ;;  %vm8349_vm4 = vmmov %vm8347_vm9  ;;  %vm8351_vm11 = vcmask 228352  }
 0x205   : > { %5153 = vmatpush1.bf16.msra.mxu1 %v5152_v1  ;;  %v6176_v57 = vpop.permute.xlu0 %6175  ;;  %v5058_v16 = vpack.c.bf16 %v3165_v42, %v3130_v60  ;;  %4074 = vrot.lane.b32.xlu1 %v7920_v12, %s6536_s7  ;;  %v3129_v19 = vsel %vm8344_vm10, %v6163_v35, %v5596_v50  ;;  %v3132_v36 = vsel %vm8347_vm9, %v6158_v3, %v6162_v49  ;;  %vm8350_vm10 = vcmask 752640   ;;  %v8358_v35 = vld [vmem:[#allocation3_spill] sm:$0xff] }
 0x206   : > { %v6171_v15 = vpop.permute.xlu1 %6170  ;;  %v3131_v14 = vsel %vm8349_vm4, %v6157_v26, %v6158_v3  ;;  %v6177_v41 = vunpack.i.l.bf16 %v6176_v57  ;;  %v6178_v45 = vunpack.i.h.bf16 %v6176_v57  ;;  %vm8353_vm9 = vmmov %vm8350_vm10 }
 0x207   : > { %v6173_v61 = vunpack.i.h.bf16 %v6171_v15  ;;  %v6172_v23 = vunpack.i.l.bf16 %v6171_v15  ;;  %5059 = vmatprep.subr.bf16.mxu0 %v5058_v16  ;;  %4109 = vrot.lane.b32.xlu0 %v7920_v12, %s6537_s8  ;;  %v5156_v7 = vpack.c.bf16 %v3166_v48, %v3131_v14  ;;  %vm8355_vm4 = vmmov %vm8353_vm9 }
 0x208   : > { %v3200_v10 = vsel %vm8350_vm10, %v5626_v28, %v6177_v41  ;;  %vm8357_vm10 = vmmov %vm8355_vm4 }
 0x209   : > { %v3164_v44 = vsel %vm8346_vm8, %v6173_v61, %v5611_v40  ;;  %v3167_v20 = vsel %vm8348_vm5, %v6168_v37, %v6172_v23  ;;  %v6186_v17 = vpop.permute.xlu0 %6185  ;;  %6445 = vrot.lane.b32.xlu1 %v7907_v63, %s6538_s9  ;;  %vm8352_vm8 = vmmov %vm8351_vm11  ;;  %v3201_v52 = vsel %vm8357_vm10, %v6177_v41, %v6178_v45  ;;  %v5671_v37 = vunpack.i.h.bf16 %v8358_v35  ;;  %v8377_v35 = vld [vmem:[#allocation6_spill] sm:$0xff] }
 0x20a   : > { %v5060_v51 = vpack.c.bf16 %v3164_v44, %v3129_v19  ;;  %v6181_v43 = vpop.permute.xlu1 %6180  ;;  %v5154_v11 = vpack.c.bf16 %v3167_v20, %v3132_v36  ;;  %v6188_v59 = vunpack.i.h.bf16 %v6186_v17  ;;  %v6187_v32 = vunpack.i.l.bf16 %v6186_v17  ;;  %vm8354_vm5 = vmmov %vm8352_vm8  ;;  %v8367_v17 = vld [vmem:[#allocation4_spill] sm:$0xff] }
 0x20b   : > { %v6183_v27 = vunpack.i.h.bf16 %v6181_v43  ;;  %v6182_v33 = vunpack.i.l.bf16 %v6181_v43  ;;  %6450 = vrot.lane.b32.xlu0 %v6449_v4, %s6538_s9  ;;  %vm8356_vm7 = vmmov %vm8354_vm5 }
 0x20c   : > { %5061 = vmatpush1.bf16.msra.mxu0 %v5060_v51  ;;  %5155 = vmatprep.subr.bf16.mxu1 %v5154_v11  ;;  %v3235_v47 = vsel %vm8351_vm11, %v5641_v39, %v6187_v32  ;;  %v3236_v29 = vsel %vm8352_vm8, %v6187_v32, %v6188_v59  ;;  %vm8360_vm11 = vcmask 195584  }
 0x20d   : > { %5157 = vmatpush1.bf16.msra.mxu1 %v5156_v7  ;;  %v6196_v5 = vpop.permute.xlu0 %6195  ;;  %v5062_v18 = vpack.c.bf16 %v3235_v47, %v3200_v10  ;;  %4144 = vrot.lane.b32.xlu1 %v7920_v12, %s6538_s9  ;;  %v3199_v58 = vsel %vm8353_vm9, %v6183_v27, %v5626_v28  ;;  %v3202_v25 = vsel %vm8355_vm4, %v6178_v45, %v6182_v33  ;;  %vm8361_vm8 = vmmov %vm8360_vm11  ;;  %v5686_v28 = vunpack.i.h.bf16 %v8367_v17 }
 0x20e   : > { %v6191_v22 = vpop.permute.xlu1 %6190  ;;  %v6197_v31 = vunpack.i.l.bf16 %v6196_v5  ;;  %v5160_v40 = vpack.c.bf16 %v3236_v29, %v3201_v52  ;;  %v6198_v15 = vunpack.i.h.bf16 %v6196_v5 }
 0x20f   : > { %v6193_v63 = vunpack.i.h.bf16 %v6191_v22  ;;  %v6192_v34 = vunpack.i.l.bf16 %v6191_v22  ;;  %5063 = vmatprep.subr.bf16.mxu0 %v5062_v18 }
 0x211   : > { %v3234_v53 = vsel %vm8354_vm5, %v6193_v63, %v5641_v39  ;;  %v3237_v2 = vsel %vm8356_vm7, %v6188_v59, %v6192_v34  ;;  %v6206_v1 = vpop.permute.xlu0 %6205  ;;  %vm8359_vm7 = vcmask 211968   ;;  %vm8363_vm5 = vmmov %vm8361_vm8  ;;  %v8368_v39 = vld [vmem:[#allocation5_spill] sm:$0xff] }
 0x212   : > { %v5064_v26 = vpack.c.bf16 %v3234_v53, %v3199_v58  ;;  %v6201_v24 = vpop.permute.xlu1 %6200  ;;  %v5158_v50 = vpack.c.bf16 %v3237_v2, %v3202_v25  ;;  %v6208_v56 = vunpack.i.h.bf16 %v6206_v1  ;;  %v6207_v6 = vunpack.i.l.bf16 %v6206_v1  ;;  %vm8362_vm9 = vmmov %vm8359_vm7 }
 0x213   : > { %v6203_v49 = vunpack.i.h.bf16 %v6201_v24  ;;  %v6202_v3 = vunpack.i.l.bf16 %v6201_v24  ;;  %v3270_v42 = vsel %vm8359_vm7, %v5656_v0, %v6197_v31  ;;  %vm8364_vm4 = vmmov %vm8359_vm7  ;;  %v5701_v59 = vunpack.i.h.bf16 %v8368_v39  ;;  %v8387_v39 = vld [vmem:[#allocation8_spill] sm:$0xff] }
 0x214   : > { %5065 = vmatpush1.bf16.msra.mxu0 %v5064_v26  ;;  %5159 = vmatprep.subr.bf16.mxu1 %v5158_v50  ;;  %v3305_v61 = vsel %vm8360_vm11, %v5671_v37, %v6207_v6  ;;  %v3306_v62 = vsel %vm8361_vm8, %v6207_v6, %v6208_v56  ;;  %vm8365_vm10 = vmmov %vm8363_vm5  ;;  %vm8370_vm7 = vcmask 162816  }
 0x215   : > { %5161 = vmatpush1.bf16.msra.mxu1 %v5160_v40  ;;  %v6216_v16 = vpop.permute.xlu0 %6215  ;;  %v5066_v19 = vpack.c.bf16 %v3305_v61, %v3270_v42  ;;  %v3269_v48 = vsel %vm8362_vm9, %v6203_v49, %v5656_v0  ;;  %v3272_v44 = vsel %vm8364_vm4, %v6198_v15, %v6202_v3  ;;  %vm8366_vm6 = vmmov %vm8364_vm4 }
 0x216   : > { %v6211_v60 = vpop.permute.xlu1 %6210  ;;  %v3271_v20 = vsel %vm8366_vm6, %v6197_v31, %v6198_v15  ;;  %v6217_v51 = vunpack.i.l.bf16 %v6216_v16  ;;  %v6218_v22 = vunpack.i.h.bf16 %v6216_v16  ;;  %vm8369_vm6 = vcmask 179200   ;;  %vm8371_vm11 = vmmov %vm8370_vm7 }
 0x217   : > { %v6213_v23 = vunpack.i.h.bf16 %v6211_v60  ;;  %v6212_v57 = vunpack.i.l.bf16 %v6211_v60  ;;  %5067 = vmatprep.subr.bf16.mxu0 %v5066_v19  ;;  %v5164_v11 = vpack.c.bf16 %v3306_v62, %v3271_v20  ;;  %vm8372_vm8 = vmmov %vm8369_vm6 }
 0x218   : > { %v3340_v47 = vsel %vm8369_vm6, %v5686_v28, %v6217_v51  ;;  %vm8373_vm9 = vmmov %vm8370_vm7 }
 0x219   : > { %v3304_v4 = vsel %vm8363_vm5, %v6213_v23, %v5671_v37  ;;  %v3307_v36 = vsel %vm8365_vm10, %v6208_v56, %v6212_v57  ;;  %v6226_v7 = vpop.permute.xlu0 %6225  ;;  %vm8374_vm5 = vmmov %vm8369_vm6  ;;  %v5716_v37 = vunpack.i.h.bf16 %v8377_v35  ;;  %v8378_v56 = vld [vmem:[#allocation7_spill] sm:$0xff]  ;;  %vm8379_vm6 = vcmask 146432  }
 0x21a   : > { %v5068_v14 = vpack.c.bf16 %v3304_v4, %v3269_v48  ;;  %v6221_v41 = vpop.permute.xlu1 %6220  ;;  %v5162_v43 = vpack.c.bf16 %v3307_v36, %v3272_v44  ;;  %v6228_v32 = vunpack.i.h.bf16 %v6226_v7  ;;  %v6227_v27 = vunpack.i.l.bf16 %v6226_v7  ;;  %vm8375_vm4 = vmmov %vm8370_vm7 }
 0x21b   : > { %v6223_v33 = vunpack.i.h.bf16 %v6221_v41  ;;  %v6222_v45 = vunpack.i.l.bf16 %v6221_v41  ;;  %vm8376_vm10 = vmmov %vm8374_vm5  ;;  %v5731_v6 = vunpack.i.h.bf16 %v8378_v56  ;;  %v8397_v56 = vld [vmem:[#allocation10_spill] sm:$0xff] }
 0x21c   : > { %5069 = vmatpush1.bf16.msra.mxu0 %v5068_v14  ;;  %5163 = vmatprep.subr.bf16.mxu1 %v5162_v43  ;;  %v3375_v63 = vsel %vm8370_vm7, %v5701_v59, %v6227_v27  ;;  %v3376_v58 = vsel %vm8371_vm11, %v6227_v27, %v6228_v32  ;;  %v3341_v26 = vsel %vm8376_vm10, %v6217_v51, %v6218_v22  ;;  %vm8380_vm7 = vcmask 130048  }
 0x21d   : > { %5165 = vmatpush1.bf16.msra.mxu1 %v5164_v11  ;;  %v6236_v18 = vpop.permute.xlu0 %6235  ;;  %v5070_v29 = vpack.c.bf16 %v3375_v63, %v3340_v47  ;;  %v3339_v53 = vsel %vm8372_vm8, %v6223_v33, %v5686_v28  ;;  %v3342_v2 = vsel %vm8374_vm5, %v6218_v22, %v6222_v45  ;;  %v5168_v1 = vpack.c.bf16 %v3376_v58, %v3341_v26  ;;  %vm8381_vm11 = vmmov %vm8380_vm7 }
 0x21e   : > { %v6231_v10 = vpop.permute.xlu1 %6230  ;;  %v6237_v24 = vunpack.i.l.bf16 %v6236_v18  ;;  %v6238_v42 = vunpack.i.h.bf16 %v6236_v18  ;;  %vm8382_vm8 = vmmov %vm8379_vm6 }
 0x21f   : > { %v6233_v34 = vunpack.i.h.bf16 %v6231_v10  ;;  %v6232_v5 = vunpack.i.l.bf16 %v6231_v10  ;;  %5071 = vmatprep.subr.bf16.mxu0 %v5070_v29  ;;  %vm8384_vm5 = vmmov %vm8379_vm6 }
 0x220   : > { %v3410_v23 = vsel %vm8379_vm6, %v5716_v37, %v6237_v24  ;;  %vm8386_vm10 = vmmov %vm8384_vm5  ;;  %vm8389_vm6 = vcmask 654336  }
 0x221   : > { %v3374_v25 = vsel %vm8373_vm9, %v6233_v34, %v5701_v59  ;;  %v3377_v52 = vsel %vm8375_vm4, %v6228_v32, %v6232_v5  ;;  %v6246_v0 = vpop.permute.xlu0 %6245  ;;  %vm8383_vm9 = vmmov %vm8380_vm7  ;;  %v3411_v51 = vsel %vm8386_vm10, %v6237_v24, %v6238_v42  ;;  %v5746_v59 = vunpack.i.h.bf16 %v8387_v39  ;;  %v8388_v32 = vld [vmem:[#allocation9_spill] sm:$0xff] }
 0x222   : > { %v5072_v31 = vpack.c.bf16 %v3374_v25, %v3339_v53  ;;  %v6241_v50 = vpop.permute.xlu1 %6240  ;;  %v5166_v40 = vpack.c.bf16 %v3377_v52, %v3342_v2  ;;  %v6248_v49 = vunpack.i.h.bf16 %v6246_v0  ;;  %v6247_v3 = vunpack.i.l.bf16 %v6246_v0  ;;  %vm8385_vm4 = vmmov %vm8380_vm7  ;;  %v8407_v39 = vld [vmem:[#allocation13_spill] sm:$0xff] }
 0x223   : > { %v6243_v15 = vunpack.i.h.bf16 %v6241_v50  ;;  %v6242_v60 = vunpack.i.l.bf16 %v6241_v50  ;;  %v5761_v27 = vunpack.i.h.bf16 %v8388_v32 }
 0x224   : > { %5073 = vmatpush1.bf16.msra.mxu0 %v5072_v31  ;;  %5167 = vmatprep.subr.bf16.mxu1 %v5166_v40  ;;  %v3445_v57 = vsel %vm8380_vm7, %v5731_v6, %v6247_v3  ;;  %v3446_v4 = vsel %vm8381_vm11, %v6247_v3, %v6248_v49  ;;  %vm8390_vm7 = vcmask 637952  }
 0x225   : > { %5169 = vmatpush1.bf16.msra.mxu1 %v5168_v1  ;;  %v6256_v62 = vpop.permute.xlu0 %6255  ;;  %v5074_v48 = vpack.c.bf16 %v3445_v57, %v3410_v23  ;;  %v3409_v44 = vsel %vm8382_vm8, %v6243_v15, %v5716_v37  ;;  %v3412_v20 = vsel %vm8384_vm5, %v6238_v42, %v6242_v60  ;;  %v5172_v17 = vpack.c.bf16 %v3446_v4, %v3411_v51  ;;  %vm8391_vm11 = vmmov %vm8390_vm7 }
 0x226   : > { %v6251_v61 = vpop.permute.xlu1 %6250  ;;  %v6257_v43 = vunpack.i.l.bf16 %v6256_v62  ;;  %v6258_v47 = vunpack.i.h.bf16 %v6256_v62  ;;  %vm8392_vm8 = vmmov %vm8389_vm6 }
 0x227   : > { %v6253_v16 = vunpack.i.h.bf16 %v6251_v61  ;;  %v6252_v19 = vunpack.i.l.bf16 %v6251_v61  ;;  %5075 = vmatprep.subr.bf16.mxu0 %v5074_v48  ;;  %vm8394_vm5 = vmmov %vm8389_vm6 }
 0x228   : > { %v3480_v34 = vsel %vm8389_vm6, %v5746_v59, %v6257_v43  ;;  %vm8396_vm10 = vmmov %vm8394_vm5  ;;  %vm8399_vm6 = vcmask 621568  }
 0x229   : > { %v3444_v36 = vsel %vm8383_vm9, %v6253_v16, %v5731_v6  ;;  %v3447_v14 = vsel %vm8385_vm4, %v6248_v49, %v6252_v19  ;;  %v6266_v28 = vpop.permute.xlu0 %6265  ;;  %vm8393_vm9 = vmmov %vm8390_vm7  ;;  %v3481_v24 = vsel %vm8396_vm10, %v6257_v43, %v6258_v47  ;;  %v5776_v6 = vunpack.i.h.bf16 %v8397_v56  ;;  %v8398_v49 = vld [vmem:[#allocation11_spill] sm:$0xff] }
 0x22a   : > { %v5076_v41 = vpack.c.bf16 %v3444_v36, %v3409_v44  ;;  %v6261_v11 = vpop.permute.xlu1 %6260  ;;  %v5170_v7 = vpack.c.bf16 %v3447_v14, %v3412_v20  ;;  %v6268_v33 = vunpack.i.h.bf16 %v6266_v28  ;;  %v6267_v45 = vunpack.i.l.bf16 %v6266_v28  ;;  %vm8395_vm4 = vmmov %vm8390_vm7 }
 0x22b   : > { %v6263_v22 = vunpack.i.h.bf16 %v6261_v11  ;;  %v6262_v10 = vunpack.i.l.bf16 %v6261_v11  ;;  %v5791_v3 = vunpack.i.h.bf16 %v8398_v49 }
 0x22c   : > { %5077 = vmatpush1.bf16.msra.mxu0 %v5076_v41  ;;  %5171 = vmatprep.subr.bf16.mxu1 %v5170_v7  ;;  %v3515_v5 = vsel %vm8390_vm7, %v5761_v27, %v6267_v45  ;;  %v3516_v25 = vsel %vm8391_vm11, %v6267_v45, %v6268_v33  ;;  %vm8400_vm7 = vcmask 605184  }
 0x22d   : > { %5173 = vmatpush1.bf16.msra.mxu1 %v5172_v17  ;;  %v6276_v58 = vpop.permute.xlu0 %6275  ;;  %v5078_v53 = vpack.c.bf16 %v3515_v5, %v3480_v34  ;;  %v3479_v2 = vsel %vm8392_vm8, %v6263_v22, %v5746_v59  ;;  %v3482_v26 = vsel %vm8394_vm5, %v6258_v47, %v6262_v10  ;;  %v5176_v35 = vpack.c.bf16 %v3516_v25, %v3481_v24  ;;  %vm8401_vm11 = vmmov %vm8400_vm7  ;;  %v8414_v24 = vld [vmem:[#allocation14_spill] sm:$0xff] }
 0x22e   : > { %v6271_v63 = vpop.permute.xlu1 %6270  ;;  %v6277_v40 = vunpack.i.l.bf16 %v6276_v58  ;;  %v6278_v23 = vunpack.i.h.bf16 %v6276_v58  ;;  %vm8402_vm8 = vmmov %vm8399_vm6  ;;  %v5806_v59 = vunpack.i.h.bf16 %v8407_v39 }
 0x22f   : > { %v6273_v18 = vunpack.i.h.bf16 %v6271_v63  ;;  %v6272_v29 = vunpack.i.l.bf16 %v6271_v63  ;;  %5079 = vmatprep.subr.bf16.mxu0 %v5078_v53  ;;  %vm8404_vm5 = vmmov %vm8399_vm6 }
 0x230   : > { %v3550_v16 = vsel %vm8399_vm6, %v5776_v6, %v6277_v40  ;;  %vm8406_vm10 = vmmov %vm8404_vm5  ;;  %vm8409_vm6 = vcmask 588800  }
 0x231   : > { %v3514_v52 = vsel %vm8393_vm9, %v6273_v18, %v5761_v27  ;;  %v3517_v31 = vsel %vm8395_vm4, %v6268_v33, %v6272_v29  ;;  %v6286_v37 = vpop.permute.xlu0 %6285  ;;  %vm8403_vm9 = vmmov %vm8400_vm7  ;;  %v3551_v43 = vsel %vm8406_vm10, %v6277_v40, %v6278_v23  ;;  %v8408_v33 = vld [vmem:[#allocation17_spill] sm:$0xff] }
 0x232   : > { %v5080_v50 = vpack.c.bf16 %v3514_v52, %v3479_v2  ;;  %v6281_v1 = vpop.permute.xlu1 %6280  ;;  %v5174_v0 = vpack.c.bf16 %v3517_v31, %v3482_v26  ;;  %v6288_v15 = vunpack.i.h.bf16 %v6286_v37  ;;  %v6287_v60 = vunpack.i.l.bf16 %v6286_v37  ;;  %vm8405_vm4 = vmmov %vm8400_vm7  ;;  %v8411_v52 = vld [vmem:[#allocation12_spill] sm:$0xff] }
 0x233   : > { %v6283_v42 = vunpack.i.h.bf16 %v6281_v1  ;;  %v6282_v61 = vunpack.i.l.bf16 %v6281_v1  ;;  %v5821_v45 = vunpack.i.h.bf16 %v8408_v33 }
 0x234   : > { %5081 = vmatpush1.bf16.msra.mxu0 %v5080_v50  ;;  %5175 = vmatprep.subr.bf16.mxu1 %v5174_v0  ;;  %v3585_v19 = vsel %vm8400_vm7, %v5791_v3, %v6287_v60  ;;  %v3586_v36 = vsel %vm8401_vm11, %v6287_v60, %v6288_v15  ;;  %vm8410_vm7 = vcmask 572416   ;;  %vm8412_vm11 = vmmov %vm8409_vm6  ;;  %v8420_v60 = vld [vmem:[#allocation18_spill] sm:$0xff] }
 0x235   : > { %5177 = vmatpush1.bf16.msra.mxu1 %v5176_v35  ;;  %v6296_v4 = vpop.permute.xlu0 %6295  ;;  %v5082_v44 = vpack.c.bf16 %v3585_v19, %v3550_v16  ;;  %v3549_v20 = vsel %vm8402_vm8, %v6283_v42, %v5776_v6  ;;  %v3552_v51 = vsel %vm8404_vm5, %v6278_v23, %v6282_v61  ;;  %v5180_v32 = vpack.c.bf16 %v3586_v36, %v3551_v43  ;;  %vm8413_vm8 = vmmov %vm8410_vm7  ;;  %v8421_v61 = vld [vmem:[#allocation19_spill] sm:$0xff] }
 0x236   : > { %v6291_v57 = vpop.permute.xlu1 %6290  ;;  %v6297_v7 = vunpack.i.l.bf16 %v6296_v4  ;;  %v6298_v34 = vunpack.i.h.bf16 %v6296_v4  ;;  %vm8416_vm5 = vmmov %vm8409_vm6  ;;  %v5836_v42 = vunpack.i.h.bf16 %v8420_v60  ;;  %v5851_v23 = vunpack.i.h.bf16 %v8421_v61  ;;  %v3772_v19 = vld [vmem:[%s6626_s25 + $0x24] sm:$0xff]  ;;  %s4816_s25 = sshll.u32 %s8464_s12, 5 }
 0x237   : > { %v6293_v62 = vunpack.i.h.bf16 %v6291_v57  ;;  %v6292_v48 = vunpack.i.l.bf16 %v6291_v57  ;;  %5083 = vmatprep.subr.bf16.mxu0 %v5082_v44  ;;  %vm8418_vm10 = vmmov %vm8416_vm5  ;;  %v8422_v4 = vld [vmem:[#allocation16_spill] sm:$0xff]  ;;  %s8105_s12 = sadd.s32 %s4829_s24, %s4816_s25 }
 0x238   : > { %v3620_v18 = vsel %vm8409_vm6, %v5806_v59, %v6297_v7  ;;  %v3621_v0 = vsel %vm8418_vm10, %v6297_v7, %v6298_v34  ;;  %vm8423_vm6 = vcmask 31744   ;;  %v3775_v7 = vunpack.c.l.bf16 %v3772_v19  ;;  %s4817_s13 = sshll.u32 %s8105_s12, 3 }
 0x239   : > { %v3584_v14 = vsel %vm8403_vm9, %v6293_v62, %v5791_v3  ;;  %v3587_v41 = vsel %vm8405_vm4, %v6288_v15, %v6292_v48  ;;  %v6306_v27 = vpop.permute.xlu0 %6305  ;;  %vm8415_vm9 = vmmov %vm8410_vm7  ;;  %v8419_v15 = vld [vmem:[#allocation15_spill] sm:$0xff]  ;;  %s8120_s5 = scalar_lea.vmem %s8184_s3, %s4817_s13 }
 0x23a   : > { %v5084_v11 = vpack.c.bf16 %v3584_v14, %v3549_v20  ;;  %v6301_v17 = vpop.permute.xlu1 %6300  ;;  %v5178_v28 = vpack.c.bf16 %v3587_v41, %v3552_v51  ;;  %v6308_v10 = vunpack.i.h.bf16 %v6306_v27  ;;  %v6307_v47 = vunpack.i.l.bf16 %v6306_v27  ;;  %vm8417_vm4 = vmmov %vm8410_vm7 }
 0x23b   : > { %v6303_v22 = vunpack.i.h.bf16 %v6301_v17  ;;  %v6302_v63 = vunpack.i.l.bf16 %v6301_v17 }
 0x23c   : > { %5085 = vmatpush1.bf16.msra.mxu0 %v5084_v11  ;;  %5179 = vmatprep.subr.bf16.mxu1 %v5178_v28  ;;  %v3655_v29 = vsel %vm8410_vm7, %v5821_v45, %v6307_v47  ;;  %v3656_v31 = vsel %vm8413_vm8, %v6307_v47, %v6308_v10  ;;  %vm8424_vm7 = vmmov %vm8423_vm6 }
 0x23d   : > { %5181 = vmatpush1.bf16.msra.mxu1 %v5180_v32  ;;  %v6316_v25 = vpop.permute.xlu0 %6315  ;;  %v5086_v2 = vpack.c.bf16 %v3655_v29, %v3620_v18  ;;  %v3619_v26 = vsel %vm8412_vm11, %v6303_v22, %v5806_v59  ;;  %v3622_v40 = vsel %vm8416_vm5, %v6298_v34, %v6302_v63  ;;  %v5184_v49 = vpack.c.bf16 %v3656_v31, %v3621_v0  ;;  %vm8425_vm11 = vmmov %vm8423_vm6 }
 0x23e   : > { %v6311_v5 = vpop.permute.xlu1 %6310  ;;  %v6317_v37 = vunpack.i.l.bf16 %v6316_v25  ;;  %v6318_v44 = vunpack.i.h.bf16 %v6316_v25  ;;  %v3776_v59 = vunpack.c.h.bf16 %v3772_v19  ;;  %vm8426_vm8 = vmmov %vm8423_vm6 }
 0x23f   : > { %v6313_v58 = vunpack.i.h.bf16 %v6311_v5  ;;  %v6312_v53 = vunpack.i.l.bf16 %v6311_v5  ;;  %4427 = vmatmul.mubr.f32.vlgmr.msra.gmra.mrb[4].mxu0 %v8411_v52  ;;  %5087 = vmatprep.subr.bf16.mxu0 %v5086_v2 }
 0x240   : > { %4581 = vmatmul.mubr.f32.vlgmr.msra.gmra.mrb[4].mxu1 %v8411_v52  ;;  %4432 = vmatprep.mubr.f32.mxu0 %v8414_v24  ;;  %v3690_v20 = vsel %vm1482_vm14, %v5836_v42, %v6317_v37  ;;  %v3691_v22 = vsel %vm1482_vm14, %v6317_v37, %v6318_v44 }
 0x241   : > { %v3654_v50 = vsel %vm8415_vm9, %v6313_v58, %v5821_v45  ;;  %v3657_v1 = vsel %vm8417_vm4, %v6308_v10, %v6312_v53  ;;  %4586 = vmatprep.mubr.f32.mxu1 %v8414_v24  ;;  %v6326_v3 = vpop.permute.xlu0 %6325  ;;  %vm8427_vm9 = vcmask 15360  }
 0x242   : > { %v5088_v35 = vpack.c.bf16 %v3654_v50, %v3619_v26  ;;  %v6321_v56 = vpop.permute.xlu1 %6320  ;;  %v5182_v6 = vpack.c.bf16 %v3657_v1, %v3622_v40  ;;  %v6328_v57 = vunpack.i.h.bf16 %v6326_v3  ;;  %v6327_v16 = vunpack.i.l.bf16 %v6326_v3  ;;  %vm8428_vm5 = vmmov %vm8427_vm9 }
 0x243   : > { %4433 = vmatmul.mubr.f32.gmra.mrb[6].mxu0 %v8419_v15  ;;  %v6323_v62 = vunpack.i.h.bf16 %v6321_v56  ;;  %v6322_v48 = vunpack.i.l.bf16 %v6321_v56  ;;  %vm8429_vm4 = vmmov %vm8428_vm5  ;;  %v6003_v56 = vunpack.i.h.bf16 %v7738_v54 }
 0x244   : > { %5089 = vmatpush1.bf16.msra.mxu0 %v5088_v35  ;;  %5183 = vmatprep.subr.bf16.mxu1 %v5182_v6  ;;  %v3725_v14 = vsel %vm8423_vm6, %v5851_v23, %v6327_v16  ;;  %v3726_v17 = vsel %vm8424_vm7, %v6327_v16, %v6328_v57  ;;  %v5988_v35 = vunpack.i.h.bf16 %v7720_v30  ;;  %vm8439_vm7 = vcmask 392192  }
 0x245   : > { %5185 = vmatpush1.bf16.msra.mxu1 %v5184_v49  ;;  %4822 = vmatprep.mubr.msk.f32.mxu0 %vm2170_vm13, %v8422_v4  ;;  %v6336_v43 = vpop.permute.xlu0 %6335  ;;  %v5090_v11 = vpack.c.bf16 %v3725_v14, %v3690_v20  ;;  %v3689_v32 = vsel %vm1482_vm14, %v6323_v62, %v5836_v42  ;;  %v3692_v33 = vsel %vm1482_vm14, %v6318_v44, %v6322_v48  ;;  %vm8430_vm14 = vmmov %vm8429_vm4 }
 0x246   : > { %v6331_v36 = vpop.permute.xlu1 %6330  ;;  %4587 = vmatmul.mubr.f32.gmra.mrb[6].mxu1 %v8419_v15  ;;  %v6338_v28 = vunpack.i.h.bf16 %v6336_v43  ;;  %v6337_v39 = vunpack.i.l.bf16 %v6336_v43  ;;  %v5188_v5 = vpack.c.bf16 %v3726_v17, %v3691_v22 }
 0x247   : > { %v6333_v51 = vunpack.i.h.bf16 %v6331_v36  ;;  %v6332_v41 = vunpack.i.l.bf16 %v6331_v36  ;;  %4824 = vmatprep.mubr.msk.f32.mxu1 %vm2170_vm13, %v8422_v4  ;;  %5091 = vmatprep.subr.bf16.mxu0 %v5090_v11 }
 0x248   : > { %v3760_v34 = vsel %vm8427_vm9, %v6337_v39, %v6338_v28 }
 0x249   : > { %v3724_v27 = vsel %vm8425_vm11, %v6333_v51, %v5851_v23  ;;  %v3727_v45 = vsel %vm8426_vm8, %v6328_v57, %v6332_v41  ;;  %v3750_v58 = vpop.permute.xlu0 %3749  ;;  %v5094_v53 = vpack.c.bf16 %v4030_v46, %v3760_v34  ;;  %vm8440_vm11 = vmmov %vm8439_vm7  ;;  %vm8441_vm8 = vcmask 375808  }
 0x24a   : > { %v5092_v10 = vpack.c.bf16 %v3724_v27, %v3689_v32  ;;  %v6341_v47 = vpop.permute.xlu1 %6340  ;;  %v5186_v63 = vpack.c.bf16 %v3727_v45, %v3692_v33  ;;  %v3759_v25 = vsel %vm8428_vm5, %v3750_v58, %v6337_v39  ;;  %vm8442_vm9 = vmmov %vm8441_vm8 }
 0x24b   : > { %v6343_v18 = vunpack.i.h.bf16 %v6341_v47  ;;  %v6342_v29 = vunpack.i.l.bf16 %v6341_v47  ;;  %v5096_v26 = vpack.c.bf16 %v7920_v12, %v3759_v25  ;;  %vm8443_vm5 = vmmov %vm8439_vm7 }
 0x24c   : > { %5093 = vmatpush1.bf16.msra.mxu0 %v5092_v10  ;;  %5187 = vmatprep.subr.bf16.mxu1 %v5186_v63 }
 0x24d   : > { %v3761_v2 = vsel %vm8429_vm4, %v6338_v28, %v6342_v29  ;;  %5095 = vmatprep.subr.bf16.mxu0 %v5094_v53  ;;  %5189 = vmatpush1.bf16.msra.mxu1 %v5188_v5  ;;  %v3762_v52 = vsel %vm8430_vm14, %v6342_v29, %v6343_v18  ;;  %v6351_v40 = vpop.permute.xlu0 %6350  ;;  %vm8444_vm4 = vmmov %vm8441_vm8 }
 0x24e   : > { %v6346_v31 = vpop.permute.xlu1 %6345  ;;  %v5190_v24 = vpack.c.bf16 %v3776_v59, %v3762_v52  ;;  %v5192_v50 = vpack.c.bf16 %v3775_v7, %v3761_v2  ;;  %v6353_v21 = vunpack.i.h.bf16 %v6351_v40  ;;  %v6352_v46 = vunpack.i.l.bf16 %v6351_v40  ;;  %vm8445_vm14 = vmmov %vm8443_vm5 }
 0x24f   : > { %v6348_v1 = vunpack.i.h.bf16 %v6346_v31  ;;  %v6347_v0 = vunpack.i.l.bf16 %v6346_v31 }
 0x250   : > { %5097 = vmatpush1.bf16.msra.mxu0 %v5096_v26  ;;  %5191 = vmatprep.subr.bf16.mxu1 %v5190_v24  ;;  %v3804_v61 = vsel %vm294_vm0, %v6353_v21, %v5988_v35 }
 0x251   : > { %5193 = vmatpush1.bf16.msra.mxu1 %v5192_v50  ;;  %v6361_v3 = vpop.permute.xlu0 %6360  ;;  %v3806_v12 = vsel %vm294_vm0, %v6347_v0, %v6348_v1  ;;  %v3805_v42 = vsel %vm294_vm0, %v5988_v35, %v6347_v0  ;;  %v3807_v30 = vsel %vm294_vm0, %v6348_v1, %v6352_v46  ;;  %vm8431_vm0 = vcmask 424960  }
 0x252   : > { %v6356_v37 = vpop.permute.xlu1 %6355  ;;  %v6363_v15 = vunpack.i.h.bf16 %v6361_v3  ;;  %v6362_v60 = vunpack.i.l.bf16 %v6361_v3 }
 0x253   : > { %v6358_v6 = vunpack.i.h.bf16 %v6356_v37  ;;  %v6357_v49 = vunpack.i.l.bf16 %v6356_v37 }
 0x254   : > { %v3839_v54 = vsel %vm330_vm1, %v6363_v15, %v6003_v56 }
 0x255   : > { %v3841_v23 = vsel %vm330_vm1, %v6357_v49, %v6358_v6  ;;  %v3840_v57 = vsel %vm330_vm1, %v6003_v56, %v6357_v49  ;;  %v3842_v48 = vsel %vm330_vm1, %v6358_v6, %v6362_v60  ;;  %v5100_v4 = vpack.c.bf16 %v3839_v54, %v3804_v61  ;;  %v6371_v44 = vpop.permute.xlu0 %6370  ;;  %vm8432_vm1 = vmmov %vm8431_vm0 }
 0x256   : > { %v5196_v16 = vpack.c.bf16 %v3841_v23, %v3806_v12  ;;  %v6366_v19 = vpop.permute.xlu1 %6365  ;;  %v5098_v62 = vpack.c.bf16 %v3840_v57, %v3805_v42  ;;  %v5194_v36 = vpack.c.bf16 %v3842_v48, %v3807_v30  ;;  %v6372_v51 = vunpack.i.l.bf16 %v6371_v44 }
 0x257   : > { %v6368_v20 = vunpack.i.h.bf16 %v6366_v19  ;;  %v6367_v14 = vunpack.i.l.bf16 %v6366_v19  ;;  %v6373_v41 = vunpack.i.h.bf16 %v6371_v44 }
 0x258   : > { %5099 = vmatprep.subr.bf16.mxu0 %v5098_v62  ;;  %5195 = vmatprep.subr.bf16.mxu1 %v5194_v36 }
 0x259   : > { %5101 = vmatpush1.bf16.msra.mxu0 %v5100_v4  ;;  %5197 = vmatpush1.bf16.msra.mxu1 %v5196_v16  ;;  %v6381_v17 = vpop.permute.xlu0 %6380  ;;  %v3876_v59 = vsel %vm366_vm2, %v6368_v20, %v6372_v51  ;;  %v3875_v32 = vsel %vm366_vm2, %v6367_v14, %v6368_v20  ;;  %v3877_v10 = vsel %vm366_vm2, %v6372_v51, %v6373_v41 }
 0x25a   : > { %v6376_v43 = vpop.permute.xlu1 %6375  ;;  %v6383_v28 = vunpack.i.h.bf16 %v6381_v17  ;;  %v6382_v39 = vunpack.i.l.bf16 %v6381_v17 }
 0x25b   : > { %v6378_v11 = vunpack.i.h.bf16 %v6376_v43  ;;  %v6377_v7 = vunpack.i.l.bf16 %v6376_v43 }
 0x25c   : > { %v3912_v47 = vsel %vm402_vm3, %v6382_v39, %v6383_v28 }
 0x25d   : > { %v3910_v27 = vsel %vm402_vm3, %v6377_v7, %v6378_v11  ;;  %v3911_v33 = vsel %vm402_vm3, %v6378_v11, %v6382_v39  ;;  %v3900_v5 = vpop.permute.xlu0 %3899  ;;  %v5198_v18 = vpack.c.bf16 %v3912_v47, %v3877_v10 }
 0x25e   : > { %v3865_v45 = vpop.permute.xlu1 %3864  ;;  %v5102_v22 = vpack.c.bf16 %v3910_v27, %v3875_v32  ;;  %v5200_v63 = vpack.c.bf16 %v3911_v33, %v3876_v59  ;;  %v3909_v29 = vsel %vm402_vm3, %v3900_v5, %v6377_v7  ;;  %vm8434_vm3 = vcmask 408576  }
 0x25f   : > { %v3874_v34 = vsel %vm366_vm2, %v3865_v45, %v6367_v14  ;;  %5199 = vmatprep.subr.bf16.mxu1 %v5198_v18  ;;  %vm8433_vm2 = vmmov %vm8431_vm0 }
 0x260   : > { %5103 = vmatprep.subr.bf16.mxu0 %v5102_v22  ;;  %v5104_v58 = vpack.c.bf16 %v3909_v29, %v3874_v34  ;;  %5201 = vmatpush1.bf16.msra.mxu1 %v5200_v63  ;;  %vm8437_vm10 = vmmov %vm8434_vm3 }
 0x261   : > { %v6391_v25 = vpop.permute.xlu0 %6390  ;;  %vm8438_vm6 = vmmov %vm8434_vm3 }
 0x262   : > { %v6386_v53 = vpop.permute.xlu1 %6385  ;;  %5105 = vmatpush1.bf16.msra.mxu0 %v5104_v58  ;;  %v6392_v26 = vunpack.i.l.bf16 %v6391_v25  ;;  %v6393_v31 = vunpack.i.h.bf16 %v6391_v25 }
 0x263   : > { %v6388_v2 = vunpack.i.h.bf16 %v6386_v53  ;;  %v6387_v52 = vunpack.i.l.bf16 %v6386_v53 }
 0x264   : > { %v3947_v3 = vsel %vm1740_vm12, %v6392_v26, %v6393_v31 }
 0x265   : > { %v6401_v1 = vpop.permute.xlu0 %6400  ;;  %v3946_v46 = vsel %vm1740_vm12, %v6388_v2, %v6392_v26  ;;  %v3945_v35 = vsel %vm1740_vm12, %v6387_v52, %v6388_v2 }
 0x266   : > { %v6396_v24 = vpop.permute.xlu1 %6395  ;;  %v6403_v0 = vunpack.i.h.bf16 %v6401_v1  ;;  %v6402_v21 = vunpack.i.l.bf16 %v6401_v1 }
 0x267   : > { %v6398_v50 = vunpack.i.h.bf16 %v6396_v24  ;;  %v6397_v40 = vunpack.i.l.bf16 %v6396_v24 }
 0x268   : > { %v3982_v12 = vsel %vm1776_vm15, %v6402_v21, %v6403_v0 }
 0x269   : > { %v3980_v37 = vsel %vm1776_vm15, %v6397_v40, %v6398_v50  ;;  %v3981_v56 = vsel %vm1776_vm15, %v6398_v50, %v6402_v21  ;;  %v3970_v42 = vpop.permute.xlu0 %3969  ;;  %v5202_v61 = vpack.c.bf16 %v3982_v12, %v3947_v3 }
 0x26a   : > { %v3935_v6 = vpop.permute.xlu1 %3934  ;;  %v5106_v49 = vpack.c.bf16 %v3980_v37, %v3945_v35  ;;  %v5204_v15 = vpack.c.bf16 %v3981_v56, %v3946_v46  ;;  %v3979_v23 = vsel %vm1776_vm15, %v3970_v42, %v6397_v40  ;;  %vm8436_vm15 = vmmov %vm8431_vm0 }
 0x26b   : > { %v3944_v60 = vsel %vm1740_vm12, %v3935_v6, %v6387_v52  ;;  %5203 = vmatprep.subr.bf16.mxu1 %v5202_v61  ;;  %vm8435_vm12 = vmmov %vm8434_vm3 }
 0x26c   : > { %5107 = vmatprep.subr.bf16.mxu0 %v5106_v49  ;;  %v5108_v57 = vpack.c.bf16 %v3979_v23, %v3944_v60  ;;  %5205 = vmatpush1.bf16.msra.mxu1 %v5204_v15 }
 0x26d   : > { %v6411_v19 = vpop.permute.xlu0 %6410 }
 0x26e   : > { %v6406_v30 = vpop.permute.xlu1 %6405  ;;  %5109 = vmatpush1.bf16.msra.mxu0 %v5108_v57  ;;  %v6412_v62 = vunpack.i.l.bf16 %v6411_v19  ;;  %v6413_v48 = vunpack.i.h.bf16 %v6411_v19 }
 0x26f   : > { %v6408_v16 = vunpack.i.h.bf16 %v6406_v30  ;;  %v6407_v54 = vunpack.i.l.bf16 %v6406_v30 }
 0x270   : > { %v2320_v4 = vpop.f32.mrb[0].mxu0  ;;  %v2474_v44 = vpop.f32.mrb[0].mxu1  ;;  %v4017_v22 = vsel %vm8433_vm2, %v6412_v62, %v6413_v48 }
 0x271   : > { %v5214_v36 = vadd.f32 %v2320_v4, %v7697_v9  ;;  %v5218_v20 = vadd.f32 %v2474_v44, %v7697_v9  ;;  %v2322_v14 = vpop.f32.mrb[1].mxu0  ;;  %v2476_v51 = vpop.f32.mrb[1].mxu1  ;;  %v4015_v17 = vsel %vm8431_vm0, %v6407_v54, %v6408_v16  ;;  %v4016_v28 = vsel %vm8432_vm1, %v6408_v16, %v6412_v62  ;;  %vm8446_vm0 = vmmov %vm8444_vm4 }
 0x272   : > { %v5215_v41 = vadd.f32 %v2322_v14, %v7697_v9  ;;  %v5219_v43 = vadd.f32 %v2476_v51, %v7697_v9  ;;  %v6416_v11 = vpop.permute.xlu1 %6415  ;;  %v6421_v7 = vpop.permute.xlu0 %6420  ;;  %vm8447_vm1 = vcmask 359424  }
 0x273   : > { %6454 = vtanh.f32 %v5214_v36  ;;  %v6418_v39 = vunpack.i.h.bf16 %v6416_v11  ;;  %v6417_v59 = vunpack.i.l.bf16 %v6416_v11  ;;  %v6423_v32 = vunpack.i.h.bf16 %v6421_v7  ;;  %vm8448_vm2 = vmmov %vm8447_vm1 }
 0x274   : > { %6456 = vtanh.f32 %v5218_v20  ;;  %v6422_v27 = vunpack.i.l.bf16 %v6421_v7  ;;  %v2326_v33 = vpop.f32.mrb[2].mxu0  ;;  %v2480_v45 = vpop.f32.mrb[2].mxu1 }
 0x275   : > { %6458 = vtanh.f32 %v5215_v41  ;;  %v5216_v10 = vadd.f32 %v2326_v33, %v7695_v13  ;;  %v5220_v47 = vadd.f32 %v2480_v45, %v7695_v13  ;;  %v2328_v63 = vpop.f32.mrb[3].mxu0  ;;  %v2482_v34 = vpop.f32.mrb[3].mxu1  ;;  %v4050_v5 = vsel %vm8434_vm3, %v6417_v59, %v6418_v39  ;;  %vm8449_vm3 = vmmov %vm8447_vm1 }
 0x276   : > { %6460 = vtanh.f32 %v5219_v43  ;;  %v4051_v18 = vsel %vm8435_vm12, %v6418_v39, %v6422_v27  ;;  %v5217_v29 = vadd.f32 %v2328_v63, %v7695_v13  ;;  %v5221_v58 = vadd.f32 %v2482_v34, %v7695_v13  ;;  %v4005_v53 = vpop.permute.xlu1 %4004  ;;  %v4040_v25 = vpop.permute.xlu0 %4039  ;;  %vm8450_vm12 = vmmov %vm8447_vm1 }
 0x277   : > { %v5208_v2 = vpack.c.bf16 %v4051_v18, %v4016_v28  ;;  %6462 = vtanh.f32 %v5216_v10  ;;  %v4014_v52 = vsel %vm8436_vm15, %v4005_v53, %v6407_v54  ;;  %v4049_v26 = vsel %vm8437_vm10, %v4040_v25, %v6417_v59 }
 0x278   : > { %6464 = vtanh.f32 %v5220_v47  ;;  %v5112_v31 = vpack.c.bf16 %v4049_v26, %v4014_v52  ;;  %v5110_v24 = vpack.c.bf16 %v4050_v5, %v4015_v17  ;;  %v4052_v50 = vsel %vm8438_vm6, %v6422_v27, %v6423_v32 }
 0x279   : > { %6466 = vtanh.f32 %v5217_v29  ;;  %v5206_v40 = vpack.c.bf16 %v4052_v50, %v4017_v22 }
 0x27a   : > { %6468 = vtanh.f32 %v5221_v58  ;;  %5111 = vmatprep.subr.bf16.mxu0 %v5110_v24  ;;  %v6426_v1 = vpop.permute.xlu1 %6425  ;;  %v6431_v0 = vpop.permute.xlu0 %6430 }
 0x27b   : > { %5207 = vmatprep.subr.bf16.mxu1 %v5206_v40  ;;  %5113 = vmatpush1.bf16.msra.mxu0 %v5112_v31  ;;  %v6428_v21 = vunpack.i.h.bf16 %v6426_v1  ;;  %v6427_v46 = vunpack.i.l.bf16 %v6426_v1  ;;  %v6432_v35 = vunpack.i.l.bf16 %v6431_v0  ;;  %v6433_v56 = vunpack.i.h.bf16 %v6431_v0 }
 0x27c   : > { %5209 = vmatpush1.bf16.msra.mxu1 %v5208_v2 }
 0x27d   : > { %v6455_v37 = vpop.eup %6454  ;;  %v4086_v57 = vsel %vm8439_vm7, %v6428_v21, %v6432_v35  ;;  %v4085_v30 = vsel %vm8440_vm11, %v6427_v46, %v6428_v21  ;;  %v4087_v62 = vsel %vm8443_vm5, %v6432_v35, %v6433_v56 }
 0x27e   : > { %v6457_v6 = vpop.eup %6456  ;;  %2493 = vst [vmem:[%s8120_s5] sm:$0xff] %v6455_v37  ;;  %v6436_v49 = vpop.permute.xlu1 %6435 }
 0x27f   : > { %v6441_v3 = vpop.permute.xlu0 %6440  ;;  %v6459_v12 = vpop.eup %6458  ;;  %2495 = vst [vmem:[%s8120_s5 + $0x10] sm:$0xff] %v6457_v6  ;;  %v6438_v15 = vunpack.i.h.bf16 %v6436_v49  ;;  %v6437_v60 = vunpack.i.l.bf16 %v6436_v49 }
 0x280   : > { %v6443_v42 = vunpack.i.h.bf16 %v6441_v3  ;;  %v6442_v61 = vunpack.i.l.bf16 %v6441_v3  ;;  %v6461_v23 = vpop.eup %6460  ;;  %2494 = vst [vmem:[%s8120_s5 + $0x8] sm:$0xff] %v6459_v12 }
 0x281   : > { %v6463_v16 = vpop.eup %6462  ;;  %2496 = vst [vmem:[%s8120_s5 + $0x18] sm:$0xff] %v6461_v23  ;;  %v4120_v19 = vsel %vm8442_vm9, %v6437_v60, %v6438_v15 }
 0x282   : > { %v4121_v54 = vsel %vm8441_vm8, %v6438_v15, %v6442_v61  ;;  %v4122_v48 = vsel %vm8444_vm4, %v6442_v61, %v6443_v42  ;;  %v6465_v4 = vpop.eup %6464  ;;  %2497 = vst [vmem:[%s8120_s5 + $0x40] sm:$0xff] %v6463_v16  ;;  %v4075_v36 = vpop.permute.xlu1 %4074  ;;  %v5114_v14 = vpack.c.bf16 %v4120_v19, %v4085_v30 }
 0x283   : > { %v5212_v44 = vpack.c.bf16 %v4121_v54, %v4086_v57  ;;  %v4110_v20 = vpop.permute.xlu0 %4109  ;;  %v5210_v51 = vpack.c.bf16 %v4122_v48, %v4087_v62  ;;  %v6467_v41 = vpop.eup %6466  ;;  %2499 = vst [vmem:[%s8120_s5 + $0x50] sm:$0xff] %v6465_v4  ;;  %v4084_v43 = vsel %vm8445_vm14, %v4075_v36, %v6427_v46 }
 0x284   : > { %v4119_v11 = vsel %vm8446_vm0, %v4110_v20, %v6437_v60  ;;  %v6469_v7 = vpop.eup %6468  ;;  %2498 = vst [vmem:[%s8120_s5 + $0x48] sm:$0xff] %v6467_v41  ;;  %5115 = vmatprep.subr.bf16.mxu0 %v5114_v14 }
 0x285   : > { %v5116_v17 = vpack.c.bf16 %v4119_v11, %v4084_v43  ;;  %5211 = vmatprep.subr.bf16.mxu1 %v5210_v51  ;;  %2500 = vst [vmem:[%s8120_s5 + $0x58] sm:$0xff] %v6469_v7 }
 0x286   : > { %5213 = vmatpush1.bf16.msra.mxu1 %v5212_v44  ;;  %v6446_v28 = vpop.permute.xlu1 %6445 }
 0x287   : > { %v6451_v39 = vpop.permute.xlu0 %6450  ;;  %5117 = vmatpush1.bf16.msra.mxu0 %v5116_v17  ;;  %v6448_v59 = vunpack.i.h.bf16 %v6446_v28  ;;  %v6447_v32 = vunpack.i.l.bf16 %v6446_v28 }
 0x288   : > { %v6453_v27 = vunpack.i.h.bf16 %v6451_v39  ;;  %v6452_v33 = vunpack.i.l.bf16 %v6451_v39 }
 0x289   : > { %v4155_v45 = vsel %vm8447_vm1, %v6447_v32, %v6448_v59 }
 0x28a   : > { %v4157_v22 = vsel %vm8448_vm2, %v6452_v33, %v6453_v27  ;;  %v4156_v10 = vsel %vm8449_vm3, %v6448_v59, %v6452_v33  ;;  %v4145_v47 = vpop.permute.xlu1 %4144  ;;  %4471 = vmatprep.subr.mxu0 %v4155_v45 }
 0x28b   : > { %4625 = vmatprep.subr.mxu1 %v4157_v22  ;;  %v4154_v63 = vsel %vm8450_vm12, %v4145_v47, %v6447_v32 }
 0x28c   : > { %4626 = vmatpush1.msra.mxu1 %v4156_v10  ;;  %4472 = vmatpush1.msra.mxu0 %v4154_v63 }
 0x28d   : > { %4658 = vmatmul.mubr.f32.vlgmr.msra.gmra.mrb[4].mxu1 %v7651_v38  ;;  %4504 = vmatmul.mubr.f32.vlgmr.msra.gmra.mrb[4].mxu0 %v7651_v38 }
 0x28e   : > { %4825 = vmatprep.mubr.msk.f32.mxu1 %vm2170_vm13, %v7653_v55  ;;  %4823 = vmatprep.mubr.msk.f32.mxu0 %vm2170_vm13, %v7653_v55 }
 0x291   : > { %4664 = vmatmul.mubr.f32.gmra.mrb[6].mxu1 %v7667_v8  ;;  %4510 = vmatmul.mubr.f32.gmra.mrb[6].mxu0 %v7667_v8 }
 0x360   : > { %v4659_v34 = vpop.f32.mrb[4].mxu1  ;;  %v4505_v18 = vpop.f32.mrb[4].mxu0 }
 0x361   : > { %v5226_v5 = vadd.f32 %v4659_v34, %v7697_v9  ;;  %v4661_v29 = vpop.f32.mrb[5].mxu1  ;;  %v5222_v58 = vadd.f32 %v4505_v18, %v7697_v9  ;;  %v4507_v38 = vpop.f32.mrb[5].mxu0 }
 0x362   : > { %v5227_v53 = vadd.f32 %v4661_v29, %v7697_v9  ;;  %v5223_v25 = vadd.f32 %v4507_v38, %v7697_v9 }
 0x363   : > { %6470 = vtanh.f32 %v5226_v5 }
 0x364   : > { %6472 = vtanh.f32 %v5222_v58  ;;  %v4665_v2 = vpop.f32.mrb[6].mxu1  ;;  %v4511_v8 = vpop.f32.mrb[6].mxu0 }
 0x365   : > { %6474 = vtanh.f32 %v5227_v53  ;;  %v5228_v55 = vadd.f32 %v4665_v2, %v7695_v13  ;;  %v4667_v52 = vpop.f32.mrb[7].mxu1  ;;  %v5224_v26 = vadd.f32 %v4511_v8, %v7695_v13  ;;  %v4513_v24 = vpop.f32.mrb[7].mxu0 }
 0x366   : > { %6476 = vtanh.f32 %v5223_v25  ;;  %v5229_v31 = vadd.f32 %v4667_v52, %v7695_v13  ;;  %v5225_v9 = vadd.f32 %v4513_v24, %v7695_v13 }
 0x367   : > { %6478 = vtanh.f32 %v5228_v55 }
 0x368   : > { %6480 = vtanh.f32 %v5224_v26 }
 0x369   : > { %6482 = vtanh.f32 %v5229_v31 }
 0x36a   : > { %6484 = vtanh.f32 %v5225_v9 }
 0x36d   : > { %v6471_v50 = vpop.eup %6470 }
 0x36e   : > { %v6473_v40 = vpop.eup %6472  ;;  %4680 = vst [vmem:[%s8120_s5 + $0x30] sm:$0xff] %v6471_v50 }
 0x36f   : > { %v6475_v1 = vpop.eup %6474  ;;  %4678 = vst [vmem:[%s8120_s5 + $0x20] sm:$0xff] %v6473_v40 }
 0x370   : > { %v6477_v0 = vpop.eup %6476  ;;  %4681 = vst [vmem:[%s8120_s5 + $0x38] sm:$0xff] %v6475_v1 }
 0x371   : > { %v6479_v21 = vpop.eup %6478  ;;  %4679 = vst [vmem:[%s8120_s5 + $0x28] sm:$0xff] %v6477_v0 }
 0x372   : > { %v6481_v46 = vpop.eup %6480  ;;  %4684 = vst [vmem:[%s8120_s5 + $0x70] sm:$0xff] %v6479_v21 }
 0x373   : > { %v6483_v35 = vpop.eup %6482  ;;  %4682 = vst [vmem:[%s8120_s5 + $0x60] sm:$0xff] %v6481_v46 }
 0x374   : > { %v6485_v13 = vpop.eup %6484  ;;  %4685 = vst [vmem:[%s8120_s5 + $0x78] sm:$0xff] %v6483_v35 }
 0x375   : > { %4683 = vst [vmem:[%s8120_s5 + $0x68] sm:$0xff] %v6485_v13 }
 0x376 PF: > { %s13_s16 = sadd.s32 1, %s6526_s16   ;;  %s8451_s12 = smov %s6518_s14 }
 0x377   : > { %p10_p7 = scmp.ge.s32.totalorder %s13_s16, 6   ;;  %s8452_s13 = smov %s6522_s15 }
 0x378   : > { %s8453_s14 = smov %s8456_s17  ;;  %s8454_s15 = smov %s8460_s18 }
 0x379   :  { %12 = sbr.rel (!%p10_p7) target bundleno = 3 (0x3), region = 68 }

</bundles_post_ra>
